<compile_context>
chip_gen: v6e
topology: v6e:2x2x1
jax: 0.10.0
libtpu: 0.0.40
codegen_flags: <defaults>
</compile_context>

<pallas_src>
import functools
import math

import jax
import jax.numpy as jnp
from jax.experimental import pallas as pl
from jax.experimental.pallas import tpu as pltpu


_VMEM_LIMIT_BYTES = 48 * 1024 * 1024  # safe on v5e/v6e (128 MiB) and v7x (64 MiB)


def _round_up(x, m):
    return ((x + m - 1) // m) * m


def _erf_f32(x):
    # Abramowitz & Stegun 7.1.26 rational approximation, |err| < 1.5e-7.
    # Used as an exact-GELU surrogate inside kernels (only exp/mul/add needed).
    a1, a2, a3, a4, a5 = (0.254829592, -0.284496736, 1.421413741,
                          -1.453152027, 1.061405429)
    p = 0.3275911
    ax = jnp.abs(x)
    t = 1.0 / (1.0 + p * ax)
    poly = ((((a5 * t + a4) * t + a3) * t + a2) * t + a1) * t
    y = 1.0 - poly * jnp.exp(-ax * ax)
    return jnp.where(x >= 0, y, -y)


# ----------------------- fused linear (matmul) kernel -----------------------

def _make_fused_linear_kernel(*, act, has_bias, has_bn, has_res, has_ln):
    def kernel(*refs):
        x_ref, w_ref = refs[0], refs[1]
        idx = 2
        if has_bias:
            b_ref = refs[idx]; idx += 1
        if has_bn:
            scale_ref, shift_ref = refs[idx], refs[idx + 1]; idx += 2
        if has_res:
            res_ref = refs[idx]; idx += 1
        if has_ln:
            g_ref, beta_ref = refs[idx], refs[idx + 1]; idx += 2
        o_ref, acc_ref = refs[idx], refs[idx + 1]

        k = pl.program_id(1)

        @pl.when(k == 0)
        def _init():
            acc_ref[...] = jnp.zeros_like(acc_ref)

        xv = x_ref[...]
        if has_ln:
            # LayerNorm prologue (requires the full K extent in this block).
            xf = xv.astype(jnp.float32)
            mu = jnp.mean(xf, axis=-1, keepdims=True)
            xc = xf - mu
            var = jnp.mean(xc * xc, axis=-1, keepdims=True)
            xf = xc * jax.lax.rsqrt(var + 1e-5)
            xf = xf * g_ref[...] + beta_ref[...]
            xb = xf.astype(jnp.bfloat16)
        else:
            xb = xv.astype(jnp.bfloat16)

        acc_ref[...] += jnp.dot(xb, w_ref[...].astype(jnp.bfloat16),
                                preferred_element_type=jnp.float32)

        @pl.when(k == pl.num_programs(1) - 1)
        def _finalize():
            z = acc_ref[...]
            if has_bias:
                z = z + b_ref[...]
            if has_bn:
                z = z * scale_ref[...] + shift_ref[...]
            if act == 'relu':
                z = jnp.maximum(z, 0.0)
            elif act == 'gelu':
                z = 0.5 * z * (1.0 + _erf_f32(z * 0.7071067811865476))
            if has_res:
                z = z + res_ref[...].astype(jnp.float32)
            o_ref[...] = z.astype(o_ref.dtype)

    return kernel


def fused_linear(x, w, b=None, *, ln=None, bn=None, residual=None, act='none',
                 tile_m=512, tile_k=512):
    """y = act((LN(x) if ln else x) @ w + b [* bn_scale + bn_shift]) (+ residual).

    x: (M, K) float32;  w: (K, N) (bf16 preferred, pre-transposed);
    ln = (gamma, beta) over K;  bn = (scale, shift) over N.
    Internally pads N up to a multiple of 128 (lane-dense stores), M up to a
    multiple of 8 / tile_m, and K up to a multiple of tile_k when K-tiling.
    """
    M, K = x.shape
    Kw, N = w.shape
    assert K == Kw
    out_dtype = x.dtype

    # Lane-dense output width.
    Np = _round_up(N, 128)
    if Np != N:
        w = jnp.pad(w, ((0, 0), (0, Np - N)))

    # K tiling (LayerNorm prologue needs the whole row in one block).
    has_ln = ln is not None
    if has_ln or K <= tile_k:
        tk, Kp = K, K
    else:
        tk = tile_k
        Kp = _round_up(K, tk)
        if Kp != K:
            x = jnp.pad(x, ((0, 0), (0, Kp - K)))
            w = jnp.pad(w, ((0, Kp - K), (0, 0)))
    nk = Kp // tk

    # M tiling.
    tm = min(tile_m, _round_up(M, 8))
    Mp = _round_up(M, tm)
    if Mp != M:
        x = jnp.pad(x, ((0, Mp - M), (0, 0)))

    inputs = [x, w]
    in_specs = [pl.BlockSpec((tm, tk), lambda i, k: (i, k)),
                pl.BlockSpec((tk, Np), lambda i, k: (k, 0))]

    has_bias = b is not None
    if has_bias:
        bb = b.astype(jnp.float32)
        if Np != N:
            bb = jnp.pad(bb, (0, Np - N))
        inputs.append(bb.reshape(1, Np))
        in_specs.append(pl.BlockSpec((1, Np), lambda i, k: (0, 0)))

    has_bn = bn is not None
    if has_bn:
        s, t = bn
        s = s.astype(jnp.float32)
        t = t.astype(jnp.float32)
        if Np != N:
            s = jnp.pad(s, (0, Np - N))
            t = jnp.pad(t, (0, Np - N))
        inputs += [s.reshape(1, Np), t.reshape(1, Np)]
        in_specs += [pl.BlockSpec((1, Np), lambda i, k: (0, 0)),
                     pl.BlockSpec((1, Np), lambda i, k: (0, 0))]

    has_res = residual is not None
    if has_res:
        r = residual
        if (Mp != M) or (Np != N):
            r = jnp.pad(r, ((0, Mp - M), (0, Np - N)))
        inputs.append(r)
        in_specs.append(pl.BlockSpec((tm, Np), lambda i, k: (i, 0)))

    if has_ln:
        g, be = ln
        inputs += [g.astype(jnp.float32).reshape(1, K),
                   be.astype(jnp.float32).reshape(1, K)]
        in_specs += [pl.BlockSpec((1, K), lambda i, k: (0, 0)),
                     pl.BlockSpec((1, K), lambda i, k: (0, 0))]

    kernel = _make_fused_linear_kernel(act=act, has_bias=has_bias, has_bn=has_bn,
                                       has_res=has_res, has_ln=has_ln)
    out = pl.pallas_call(
        kernel,
        out_shape=jax.ShapeDtypeStruct((Mp, Np), out_dtype),
        grid=(Mp // tm, nk),
        in_specs=in_specs,
        out_specs=pl.BlockSpec((tm, Np), lambda i, k: (i, 0)),
        scratch_shapes=[pltpu.VMEM((tm, Np), jnp.float32)],
        compiler_params=pltpu.CompilerParams(
            dimension_semantics=("parallel", "arbitrary"),
            vmem_limit_bytes=_VMEM_LIMIT_BYTES),
    )(*inputs)
    if (Mp != M) or (Np != N):
        out = out[:M, :N]
    return out


# ----------------------------- layernorm kernel -----------------------------

def _layernorm_kernel(x_ref, g_ref, b_ref, o_ref):
    x = x_ref[...].astype(jnp.float32)
    mu = jnp.mean(x, axis=-1, keepdims=True)
    xc = x - mu
    var = jnp.mean(xc * xc, axis=-1, keepdims=True)
    y = xc * jax.lax.rsqrt(var + 1e-5)
    o_ref[...] = (y * g_ref[...] + b_ref[...]).astype(o_ref.dtype)


def pallas_layernorm(x2d, gamma, beta, tile_m=512):
    M, C = x2d.shape
    tm = min(tile_m, _round_up(M, 8))
    Mp = _round_up(M, tm)
    xp = jnp.pad(x2d, ((0, Mp - M), (0, 0))) if Mp != M else x2d
    out = pl.pallas_call(
        _layernorm_kernel,
        out_shape=jax.ShapeDtypeStruct((Mp, C), x2d.dtype),
        grid=(Mp // tm,),
        in_specs=[pl.BlockSpec((tm, C), lambda i: (i, 0)),
                  pl.BlockSpec((1, C), lambda i: (0, 0)),
                  pl.BlockSpec((1, C), lambda i: (0, 0))],
        out_specs=pl.BlockSpec((tm, C), lambda i: (i, 0)),
        compiler_params=pltpu.CompilerParams(
            dimension_semantics=("parallel",),
            vmem_limit_bytes=_VMEM_LIMIT_BYTES),
    )(xp, gamma.astype(jnp.float32).reshape(1, C),
      beta.astype(jnp.float32).reshape(1, C))
    return out[:M] if Mp != M else out


# ----------------------------- attention kernel -----------------------------

def _attention_kernel(q_ref, k_ref, v_ref, o_ref, *, scale):
    q = q_ref[0].astype(jnp.bfloat16)
    k = k_ref[0].astype(jnp.bfloat16)
    v = v_ref[0].astype(jnp.bfloat16)
    s = jax.lax.dot_general(q, k, (((1,), (1,)), ((), ())),
                            preferred_element_type=jnp.float32) * scale
    m = jnp.max(s, axis=-1, keepdims=True)
    p = jnp.exp(s - m)
    l = jnp.sum(p, axis=-1, keepdims=True)
    o = jnp.dot(p.astype(jnp.bfloat16), v, preferred_element_type=jnp.float32)
    o = o * pl.reciprocal(l, approx=True)
    o_ref[0] = o.astype(o_ref.dtype)


def pallas_attention(q, k, v):
    """q, k, v: (B*heads, S, head_dim) -> softmax(qk^T/sqrt(d)) v, tiled per head."""
    # TODO(synk): for long sequences a kv-tiled flash-style online softmax would
    # be needed; here the full S x S score tile fits VMEM comfortably.
    BH, S, Dh = q.shape
    return pl.pallas_call(
        functools.partial(_attention_kernel, scale=1.0 / math.sqrt(Dh)),
        out_shape=jax.ShapeDtypeStruct((BH, S, Dh), q.dtype),
        grid=(BH,),
        in_specs=[pl.BlockSpec((1, S, Dh), lambda i: (i, 0, 0)),
                  pl.BlockSpec((1, S, Dh), lambda i: (i, 0, 0)),
                  pl.BlockSpec((1, S, Dh), lambda i: (i, 0, 0))],
        out_specs=pl.BlockSpec((1, S, Dh), lambda i: (i, 0, 0)),
        compiler_params=pltpu.CompilerParams(
            dimension_semantics=("parallel",),
            vmem_limit_bytes=_VMEM_LIMIT_BYTES),
    )(q, k, v)


# --------------------- JAX glue (layout / resample / im2col) ---------------------

def im2col_3x3(volumes):
    """3x3x3 'same' im2col over a list of channel-last volumes (concatenated
    along channels per tap, matching torch.cat([x, skip], dim=1) ordering)."""
    # TODO(synk): taps are still materialized host-side; an in-kernel tap
    # reduction was not implemented (Mosaic reshape constraints on the small,
    # crop-to-skip-resolution decoder volumes make the payoff marginal here).
    B, D, H, W = volumes[0].shape[:4]
    padded = [jnp.pad(v, ((0, 0), (1, 1), (1, 1), (1, 1), (0, 0))) for v in volumes]
    cols = []
    for kd in range(3):
        for kh in range(3):
            for kw in range(3):
                for vp in padded:
                    cols.append(vp[:, kd:kd + D, kh:kh + H, kw:kw + W, :])
    cols = jnp.concatenate(cols, axis=-1)
    return cols.reshape(B * D * H * W, -1)


def _interp_axis(x, axis, out_size):
    """1-D linear interpolation (align_corners=False, PyTorch semantics)."""
    in_size = x.shape[axis]
    if in_size == out_size:
        return x
    scale = in_size / out_size
    dst = jnp.arange(out_size, dtype=jnp.float32)
    src = jnp.clip((dst + 0.5) * scale - 0.5, 0.0, float(in_size - 1))
    i0 = jnp.floor(src).astype(jnp.int32)
    i1 = jnp.minimum(i0 + 1, in_size - 1)
    lam = src - i0.astype(jnp.float32)
    x0 = jnp.take(x, i0, axis=axis)
    x1 = jnp.take(x, i1, axis=axis)
    shape = [1] * x.ndim
    shape[axis] = out_size
    lam = lam.reshape(shape)
    return x0 * (1.0 - lam) + x1 * lam


def trilinear_resize(x, out_dhw):
    # TODO(synk): trilinear resample done in plain JAX (separable gather+lerp),
    # not folded into a Pallas gather kernel.
    for axis, out_size in zip((1, 2, 3), out_dhw):
        x = _interp_axis(x, axis, out_size)
    return x


def pad_or_crop(x, target_dhw):
    """Mimic F.pad(x, [wl,wr,hl,hr,dl,dr]) with diff = skip - x (negative => crop)."""
    B, D, H, W, C = x.shape
    sizes = (D, H, W)
    pads = []
    for size, tgt in zip(sizes, target_dhw):
        diff = tgt - size
        lo = diff // 2
        pads.append((lo, diff - lo))
    pos = [(max(lo, 0), max(hi, 0)) for lo, hi in pads]
    x = jnp.pad(x, ((0, 0), pos[0], pos[1], pos[2], (0, 0)))
    slices = [slice(None)]
    for (lo, hi), (plo, phi), size in zip(pads, pos, sizes):
        new_size = size + plo + phi
        start = -lo if lo < 0 else 0
        stop = new_size + hi if hi < 0 else new_size
        slices.append(slice(start, stop))
    slices.append(slice(None))
    return x[tuple(slices)]


# ----------------------------- Model blocks -----------------------------

def transformer_block(x, p, num_heads):
    B, N, E = x.shape
    Dh = E // num_heads
    x2 = x.reshape(B * N, E)

    # LN1 fused as matmul prologue; packed QKV projection.
    qkv = fused_linear(x2, p['in_proj_w_t'], p['in_proj_b'],
                       ln=(p['ln1_g'], p['ln1_b']))
    qkv = qkv.reshape(B, N, 3, num_heads, Dh)
    q = qkv[:, :, 0].transpose(0, 2, 1, 3).reshape(B * num_heads, N, Dh)
    k = qkv[:, :, 1].transpose(0, 2, 1, 3).reshape(B * num_heads, N, Dh)
    v = qkv[:, :, 2].transpose(0, 2, 1, 3).reshape(B * num_heads, N, Dh)

    attn = pallas_attention(q, k, v)
    attn = attn.reshape(B, num_heads, N, Dh).transpose(0, 2, 1, 3).reshape(B * N, E)

    # out_proj with fused residual add.
    x2 = fused_linear(attn, p['out_proj_w_t'], p['out_proj_b'], residual=x2)

    # MLP: LN2 fused as prologue of fc1, GELU fused as epilogue, residual into fc2.
    h = fused_linear(x2, p['fc1_w_t'], p['fc1_b'],
                     ln=(p['ln2_g'], p['ln2_b']), act='gelu')
    x2 = fused_linear(h, p['fc2_w_t'], p['fc2_b'], residual=x2)
    return x2.reshape(B, N, E)


def decoder_block(x, skip, p):
    """x, skip: (B, D, H, W, C) channel-last."""
    B, D, H, W, C = x.shape
    x = trilinear_resize(x, (2 * D, 2 * H, 2 * W))
    if x.shape[1:4] != skip.shape[1:4]:
        x = pad_or_crop(x, skip.shape[1:4])
    Do, Ho, Wo = skip.shape[1:4]

    cols = im2col_3x3([x, skip])
    Cout = p['conv1_wt'].shape[1]
    y = fused_linear(cols, p['conv1_wt'],
                     bn=(p['bn1_scale'], p['bn1_shift']), act='relu')
    y = y.reshape(B, Do, Ho, Wo, Cout)

    cols2 = im2col_3x3([y])
    y = fused_linear(cols2, p['conv2_wt'],
                     bn=(p['bn2_scale'], p['bn2_shift']), act='relu')
    return y.reshape(B, Do, Ho, Wo, Cout)


def vit3d_unetr_forward(params, x, cfg):
    """x: (B, Cin, D, H, W) -> (B, out_channels, D, H, W)."""
    E = cfg['embed_dim']
    pd, ph, pw = cfg['patch_size']
    num_heads = cfg['num_heads']
    out_ch = cfg['out_channels']

    B, Cin, D, H, W = x.shape
    gd, gh, gw = D // pd, H // ph, W // pw
    N = gd * gh * gw

    # Patch embedding (Conv3d stride=kernel) as a Pallas matmul.
    xp = x.reshape(B, Cin, gd, pd, gh, ph, gw, pw)
    xp = xp.transpose(0, 2, 4, 6, 1, 3, 5, 7).reshape(B * N, Cin * pd * ph * pw)
    tok = fused_linear(xp, params['patch_w_t'], params['patch_b']).reshape(B, N, E)

    # Position embedding (N == num_patches at this resolution; no resample path).
    tok = tok + params['pos_embed']

    skips = []
    for i, blk in enumerate(params['blocks']):
        tok = transformer_block(tok, blk, num_heads)
        if i in cfg['skip_indices']:
            skips.append(tok)

    tokn = pallas_layernorm(tok.reshape(-1, E), params['norm_g'],
                            params['norm_b']).reshape(B, N, E)

    def to_volume(t):  # tokens (d-major, h, w) -> (B, gd, gh, gw, E) channel-last
        return t.reshape(B, gd, gh, gw, E)

    d = decoder_block(to_volume(tokn), to_volume(skips[-1]), params['dec1'])
    d = decoder_block(d, to_volume(skips[0]), params['dec2'])

    dD, dH, dW = d.shape[1:4]
    d = trilinear_resize(d, (dD * pd, dH * ph, dW * pw))  # scale_factor = patch_size
    FD, FH, FW = d.shape[1:4]

    # Final 1x1x1 conv as a Pallas matmul.
    y = fused_linear(d.reshape(B * FD * FH * FW, E),
                     params['final_w_t'], params['final_b'])
    # TODO(synk): final channel-first transpose done in plain JAX, not fused into
    # the matmul output BlockSpec.
    y = y.reshape(B, FD, FH, FW, out_ch).transpose(0, 4, 1, 2, 3)
    return y


# ----------------------------- Parameters -----------------------------

def init_params(key, cfg):
    """Raw parameters in PyTorch layout (matches nn.Module state-dict shapes)."""
    E = cfg['embed_dim']
    Cin = cfg['in_channels']
    out_ch = cfg['out_channels']
    pd, ph, pw = cfg['patch_size']
    mlp_dim = cfg['mlp_dim']
    num_patches = cfg['num_patches']

    keys = iter(jax.random.split(key, 256))

    def nrm(shape, std=0.02):
        return jax.random.normal(next(keys), shape, jnp.float32) * std

    zeros = lambda *s: jnp.zeros(s, jnp.float32)
    ones = lambda *s: jnp.ones(s, jnp.float32)

    p = {
        'patch_w': nrm((E, Cin, pd, ph, pw)),
        'patch_b': zeros(E),
        'pos_embed': nrm((1, num_patches, E)),
        'norm_g': ones(E), 'norm_b': zeros(E),
        'final_w': nrm((out_ch, E, 1, 1, 1)),
        'final_b': zeros(out_ch),
    }
    p['blocks'] = []
    for _ in range(cfg['depth']):
        p['blocks'].append({
            'ln1_g': ones(E), 'ln1_b': zeros(E),
            'in_proj_w': nrm((3 * E, E)), 'in_proj_b': zeros(3 * E),
            'out_proj_w': nrm((E, E)), 'out_proj_b': zeros(E),
            'ln2_g': ones(E), 'ln2_b': zeros(E),
            'fc1_w': nrm((mlp_dim, E)), 'fc1_b': zeros(mlp_dim),
            'fc2_w': nrm((E, mlp_dim)), 'fc2_b': zeros(E),
        })

    def dec_params():
        return {
            'conv1_w': nrm((E, 2 * E, 3, 3, 3)), 'conv1_b': zeros(E),
            'bn1_g': ones(E), 'bn1_b': zeros(E), 'bn1_mean': zeros(E), 'bn1_var': ones(E),
            'conv2_w': nrm((E, E, 3, 3, 3)), 'conv2_b': zeros(E),
            'bn2_g': ones(E), 'bn2_b': zeros(E), 'bn2_mean': zeros(E), 'bn2_var': ones(E),
        }

    p['dec1'] = dec_params()
    p['dec2'] = dec_params()
    return p


def prepare_params(raw, cfg, eps=1e-5):
    """One-time parameter preparation (outside the jitted forward):
    pre-transpose matmul weights, cast them to bf16, fold conv-bias + BN into a
    per-channel scale/shift."""
    E = cfg['embed_dim']
    bf = jnp.bfloat16

    p = {
        'patch_w_t': raw['patch_w'].reshape(E, -1).T.astype(bf),
        'patch_b': raw['patch_b'],
        'pos_embed': raw['pos_embed'],
        'norm_g': raw['norm_g'], 'norm_b': raw['norm_b'],
        'final_w_t': raw['final_w'].reshape(cfg['out_channels'], E).T.astype(bf),
        'final_b': raw['final_b'],
    }
    blocks = []
    for b in raw['blocks']:
        blocks.append({
            'ln1_g': b['ln1_g'], 'ln1_b': b['ln1_b'],
            'in_proj_w_t': b['in_proj_w'].T.astype(bf), 'in_proj_b': b['in_proj_b'],
            'out_proj_w_t': b['out_proj_w'].T.astype(bf), 'out_proj_b': b['out_proj_b'],
            'ln2_g': b['ln2_g'], 'ln2_b': b['ln2_b'],
            'fc1_w_t': b['fc1_w'].T.astype(bf), 'fc1_b': b['fc1_b'],
            'fc2_w_t': b['fc2_w'].T.astype(bf), 'fc2_b': b['fc2_b'],
        })
    p['blocks'] = blocks

    def prep_dec(d):
        out = {}
        for i in (1, 2):
            w = d[f'conv{i}_w']                       # (Cout, Cin, 3, 3, 3)
            Cout = w.shape[0]
            wt = jnp.transpose(w, (2, 3, 4, 1, 0)).reshape(-1, Cout).astype(bf)
            s = d[f'bn{i}_g'] / jnp.sqrt(d[f'bn{i}_var'] + eps)
            t = (d[f'conv{i}_b'] - d[f'bn{i}_mean']) * s + d[f'bn{i}_b']
            out[f'conv{i}_wt'] = wt
            out[f'bn{i}_scale'] = s
            out[f'bn{i}_shift'] = t
        return out

    p['dec1'] = prep_dec(raw['dec1'])
    p['dec2'] = prep_dec(raw['dec2'])
    return p


# ----------------------------- Main -----------------------------

if __name__ == "__main__":
    cfg = dict(
        in_channels=1,
        out_channels=3,
        img_size=(16, 16, 16),
        patch_size=(8, 8, 8),
        embed_dim=32,
        depth=3,
        num_heads=4,
        mlp_dim=64,
    )
    cfg['grid_size'] = tuple(cfg['img_size'][i] // cfg['patch_size'][i] for i in range(3))
    cfg['num_patches'] = cfg['grid_size'][0] * cfg['grid_size'][1] * cfg['grid_size'][2]
    cfg['skip_indices'] = [cfg['depth'] // 3, 2 * cfg['depth'] // 3]

    key = jax.random.PRNGKey(0)
    kx, kp = jax.random.split(key)
    x = jax.random.normal(kx, (2, cfg['in_channels']) + cfg['img_size'], jnp.float32)

    raw_params = init_params(kp, cfg)
    params = prepare_params(raw_params, cfg)   # one-time weight prep (transpose/bf16/BN fold)

    fwd = jax.jit(functools.partial(vit3d_unetr_forward, cfg=cfg))
    out = fwd(params, x)
    out = jax.block_until_ready(out)

    expected = (2, cfg['out_channels']) + cfg['img_size']
    assert out.shape == expected, (out.shape, expected)
    assert jnp.all(jnp.isfinite(out))
    print("KERNEL_OK")
</pallas_src>

<mosaic_0001>
module attributes {stable_mosaic.version = 11 : i64} {
  func.func @kernel(%arg0: i32, %arg1: i32, %arg2: memref<16x512xf32, #tpu.memory_space<vmem>>, %arg3: memref<512x128xbf16, #tpu.memory_space<vmem>>, %arg4: memref<1x128xf32, #tpu.memory_space<vmem>>, %arg5: memref<16x128xf32, #tpu.memory_space<vmem>>, %arg6: memref<16x128xf32, #tpu.memory_space<vmem>>) attributes {dimension_semantics = [#tpu.dimension_semantics<parallel>, #tpu.dimension_semantics<arbitrary>], iteration_bounds = array<i64: 1, 1>, scalar_prefetch = 0 : i64, scratch_operands = 1 : i64, tpu.core_type = #tpu.core_type<tc>, window_params = [{transform_indices = @transform_0, window_bounds = array<i64: 16, 512>}, {transform_indices = @transform_1, window_bounds = array<i64: 512, 128>}, {pipeline_mode = #tpu.pipeline_mode<synchronous>, transform_indices = @transform_2, window_bounds = array<i64: 1, 128>}, {transform_indices = @transform_3, window_bounds = array<i64: 16, 128>}]} {
    %c0_i32 = arith.constant 0 : i32
    %0 = arith.cmpi eq, %arg1, %c0_i32 : i32
    %1 = arith.extui %0 : i1 to i32
    %c0_i32_0 = arith.constant 0 : i32
    %2 = arith.cmpi ne, %1, %c0_i32_0 : i32
    scf.if %2 {
      %cst_10 = arith.constant 0.000000e+00 : f32
      %13 = vector.broadcast %cst_10 : f32 to vector<16x128xf32>
      %c0_11 = arith.constant 0 : index
      %c0_12 = arith.constant 0 : index
      %14 = vector.load %arg6[%c0_11, %c0_12] : memref<16x128xf32, #tpu.memory_space<vmem>>, vector<16x128xf32>
      tpu.vector_store %arg6[%c0_11, %c0_12], %13 {strides = array<i32>} : memref<16x128xf32, #tpu.memory_space<vmem>>, vector<16x128xf32>,
    } else {
    }
    %c0 = arith.constant 0 : index
    %c0_1 = arith.constant 0 : index
    %3 = vector.load %arg2[%c0, %c0_1] : memref<16x512xf32, #tpu.memory_space<vmem>>, vector<16x512xf32>
    %4 = arith.truncf %3 : vector<16x512xf32> to vector<16x512xbf16>
    %c0_2 = arith.constant 0 : index
    %c0_3 = arith.constant 0 : index
    %5 = vector.load %arg6[%c0_2, %c0_3] : memref<16x128xf32, #tpu.memory_space<vmem>>, vector<16x128xf32>
    %c0_4 = arith.constant 0 : index
    %c0_5 = arith.constant 0 : index
    %6 = vector.load %arg3[%c0_4, %c0_5] : memref<512x128xbf16, #tpu.memory_space<vmem>>, vector<512x128xbf16>
    %cst = arith.constant dense<0.000000e+00> : vector<16x128xf32>
    %7 = tpu.matmul %4, %6, %cst {dimension_numbers = #tpu.dot_dimension_numbers<[1], [0], [0], [1], [0, 0, 1, 1], [], []>} : vector<16x512xbf16>, vector<512x128xbf16>, vector<16x128xf32> -> vector<16x128xf32>
    %8 = arith.addf %5, %7 : vector<16x128xf32>
    %c0_6 = arith.constant 0 : index
    %c0_7 = arith.constant 0 : index
    %9 = vector.load %arg6[%c0_6, %c0_7] : memref<16x128xf32, #tpu.memory_space<vmem>>, vector<16x128xf32>
    tpu.vector_store %arg6[%c0_6, %c0_7], %8 {strides = array<i32>} : memref<16x128xf32, #tpu.memory_space<vmem>>, vector<16x128xf32>,
    %c0_i32_8 = arith.constant 0 : i32
    %10 = arith.cmpi eq, %arg1, %c0_i32_8 : i32
    %11 = arith.extui %10 : i1 to i32
    %c0_i32_9 = arith.constant 0 : i32
    %12 = arith.cmpi ne, %11, %c0_i32_9 : i32
    scf.if %12 {
      %c0_10 = arith.constant 0 : index
      %c0_11 = arith.constant 0 : index
      %13 = vector.load %arg6[%c0_10, %c0_11] : memref<16x128xf32, #tpu.memory_space<vmem>>, vector<16x128xf32>
      %c0_12 = arith.constant 0 : index
      %c0_13 = arith.constant 0 : index
      %14 = vector.load %arg4[%c0_12, %c0_13] : memref<1x128xf32, #tpu.memory_space<vmem>>, vector<1x128xf32>
      %15 = vector.broadcast %14 : vector<1x128xf32> to vector<16x128xf32>
      %16 = arith.addf %13, %15 : vector<16x128xf32>
      %c0_14 = arith.constant 0 : index
      %c0_15 = arith.constant 0 : index
      %17 = vector.load %arg5[%c0_14, %c0_15] : memref<16x128xf32, #tpu.memory_space<vmem>>, vector<16x128xf32>
      tpu.vector_store %arg5[%c0_14, %c0_15], %16 {strides = array<i32>} : memref<16x128xf32, #tpu.memory_space<vmem>>, vector<16x128xf32>,
    } else {
    }
    return
  }
  func.func @transform_0(%arg0: i32, %arg1: i32) -> (i32, i32) {
    %c0_i32 = arith.constant 0 : i32
    return %arg0, %arg1 : i32, i32
  }
  func.func @transform_1(%arg0: i32, %arg1: i32) -> (i32, i32) {
    %c0_i32 = arith.constant 0 : i32
    %c0_i32_0 = arith.constant 0 : i32
    return %arg1, %c0_i32 : i32, i32
  }
  func.func @transform_2(%arg0: i32, %arg1: i32) -> (i32, i32) {
    %c0_i32 = arith.constant 0 : i32
    %c0_i32_0 = arith.constant 0 : i32
    %c0_i32_1 = arith.constant 0 : i32
    return %c0_i32, %c0_i32_0 : i32, i32
  }
  func.func @transform_3(%arg0: i32, %arg1: i32) -> (i32, i32) {
    %c0_i32 = arith.constant 0 : i32
    %c0_i32_0 = arith.constant 0 : i32
    return %arg0, %c0_i32 : i32, i32
  }
}

module attributes {stable_mosaic.version = 11 : i64} {
  func.func @kernel(%arg0: i32, %arg1: i32, %arg2: memref<16x32xf32, #tpu.memory_space<vmem>>, %arg3: memref<32x128xbf16, #tpu.memory_space<vmem>>, %arg4: memref<1x128xf32, #tpu.memory_space<vmem>>, %arg5: memref<1x32xf32, #tpu.memory_space<vmem>>, %arg6: memref<1x32xf32, #tpu.memory_space<vmem>>, %arg7: memref<16x128xf32, #tpu.memory_space<vmem>>, %arg8: memref<16x128xf32, #tpu.memory_space<vmem>>) attributes {dimension_semantics = [#tpu.dimension_semantics<parallel>, #tpu.dimension_semantics<arbitrary>], iteration_bounds = array<i64: 1, 1>, scalar_prefetch = 0 : i64, scratch_operands = 1 : i64, tpu.core_type = #tpu.core_type<tc>, window_params = [{transform_indices = @transform_0, window_bounds = array<i64: 16, 32>}, {transform_indices = @transform_1, window_bounds = array<i64: 32, 128>}, {pipeline_mode = #tpu.pipeline_mode<synchronous>, transform_indices = @transform_2, window_bounds = array<i64: 1, 128>}, {pipeline_mode = #tpu.pipeline_mode<synchronous>, transform_indices = @transform_3, window_bounds = array<i64: 1, 32>}, {pipeline_mode = #tpu.pipeline_mode<synchronous>, transform_indices = @transform_4, window_bounds = array<i64: 1, 32>}, {transform_indices = @transform_5, window_bounds = array<i64: 16, 128>}]} {
    %c0_i32 = arith.constant 0 : i32
    %0 = arith.cmpi eq, %arg1, %c0_i32 : i32
    %1 = arith.extui %0 : i1 to i32
    %c0_i32_0 = arith.constant 0 : i32
    %2 = arith.cmpi ne, %1, %c0_i32_0 : i32
    scf.if %2 {
      %cst_19 = arith.constant 0.000000e+00 : f32
      %35 = vector.broadcast %cst_19 : f32 to vector<16x128xf32>
      %c0_20 = arith.constant 0 : index
      %c0_21 = arith.constant 0 : index
      %36 = vector.load %arg8[%c0_20, %c0_21] : memref<16x128xf32, #tpu.memory_space<vmem>>, vector<16x128xf32>
      tpu.vector_store %arg8[%c0_20, %c0_21], %35 {strides = array<i32>} : memref<16x128xf32, #tpu.memory_space<vmem>>, vector<16x128xf32>,
    } else {
    }
    %c0 = arith.constant 0 : index
    %c0_1 = arith.constant 0 : index
    %3 = vector.load %arg2[%c0, %c0_1] : memref<16x32xf32, #tpu.memory_space<vmem>>, vector<16x32xf32>
    %cst = arith.constant dense<0.000000e+00> : vector<16xf32>
    %4 = vector.multi_reduction <add>, %3, %cst [1] : vector<16x32xf32> to vector<16xf32>
    %5 = vector.shape_cast %4 : vector<16xf32> to vector<16x1xf32>
    %cst_2 = arith.constant 3.200000e+01 : f32
    %6 = vector.broadcast %cst_2 : f32 to vector<16x1xf32>
    %7 = arith.divf %5, %6 : vector<16x1xf32>
    %8 = vector.broadcast %7 : vector<16x1xf32> to vector<16x32xf32>
    %9 = arith.subf %3, %8 : vector<16x32xf32>
    %10 = arith.mulf %9, %9 : vector<16x32xf32>
    %cst_3 = arith.constant dense<0.000000e+00> : vector<16xf32>
    %11 = vector.multi_reduction <add>, %10, %cst_3 [1] : vector<16x32xf32> to vector<16xf32>
    %12 = vector.shape_cast %11 : vector<16xf32> to vector<16x1xf32>
    %cst_4 = arith.constant 3.200000e+01 : f32
    %13 = vector.broadcast %cst_4 : f32 to vector<16x1xf32>
    %14 = arith.divf %12, %13 : vector<16x1xf32>
    %cst_5 = arith.constant 9.99999974E-6 : f32
    %15 = vector.broadcast %cst_5 : f32 to vector<16x1xf32>
    %16 = arith.addf %14, %15 : vector<16x1xf32>
    %17 = math.rsqrt %16 : vector<16x1xf32>
    %18 = vector.broadcast %17 : vector<16x1xf32> to vector<16x32xf32>
    %19 = arith.mulf %9, %18 : vector<16x32xf32>
    %c0_6 = arith.constant 0 : index
    %c0_7 = arith.constant 0 : index
    %20 = vector.load %arg5[%c0_6, %c0_7] : memref<1x32xf32, #tpu.memory_space<vmem>>, vector<1x32xf32>
    %21 = vector.broadcast %20 : vector<1x32xf32> to vector<16x32xf32>
    %22 = arith.mulf %19, %21 : vector<16x32xf32>
    %c0_8 = arith.constant 0 : index
    %c0_9 = arith.constant 0 : index
    %23 = vector.load %arg6[%c0_8, %c0_9] : memref<1x32xf32, #tpu.memory_space<vmem>>, vector<1x32xf32>
    %24 = vector.broadcast %23 : vector<1x32xf32> to vector<16x32xf32>
    %25 = arith.addf %22, %24 : vector<16x32xf32>
    %26 = arith.truncf %25 : vector<16x32xf32> to vector<16x32xbf16>
    %c0_10 = arith.constant 0 : index
    %c0_11 = arith.constant 0 : index
    %27 = vector.load %arg8[%c0_10, %c0_11] : memref<16x128xf32, #tpu.memory_space<vmem>>, vector<16x128xf32>
    %c0_12 = arith.constant 0 : index
    %c0_13 = arith.constant 0 : index
    %28 = vector.load %arg3[%c0_12, %c0_13] : memref<32x128xbf16, #tpu.memory_space<vmem>>, vector<32x128xbf16>
    %cst_14 = arith.constant dense<0.000000e+00> : vector<16x128xf32>
    %29 = tpu.matmul %26, %28, %cst_14 {dimension_numbers = #tpu.dot_dimension_numbers<[1], [0], [0], [1], [0, 0, 1, 1], [], []>} : vector<16x32xbf16>, vector<32x128xbf16>, vector<16x128xf32> -> vector<16x128xf32>
    %30 = arith.addf %27, %29 : vector<16x128xf32>
    %c0_15 = arith.constant 0 : index
    %c0_16 = arith.constant 0 : index
    %31 = vector.load %arg8[%c0_15, %c0_16] : memref<16x128xf32, #tpu.memory_space<vmem>>, vector<16x128xf32>
    tpu.vector_store %arg8[%c0_15, %c0_16], %30 {strides = array<i32>} : memref<16x128xf32, #tpu.memory_space<vmem>>, vector<16x128xf32>,
    %c0_i32_17 = arith.constant 0 : i32
    %32 = arith.cmpi eq, %arg1, %c0_i32_17 : i32
    %33 = arith.extui %32 : i1 to i32
    %c0_i32_18 = arith.constant 0 : i32
    %34 = arith.cmpi ne, %33, %c0_i32_18 : i32
    scf.if %34 {
      %c0_19 = arith.constant 0 : index
      %c0_20 = arith.constant 0 : index
      %35 = vector.load %arg8[%c0_19, %c0_20] : memref<16x128xf32, #tpu.memory_space<vmem>>, vector<16x128xf32>
      %c0_21 = arith.constant 0 : index
      %c0_22 = arith.constant 0 : index
      %36 = vector.load %arg4[%c0_21, %c0_22] : memref<1x128xf32, #tpu.memory_space<vmem>>, vector<1x128xf32>
      %37 = vector.broadcast %36 : vector<1x128xf32> to vector<16x128xf32>
      %38 = arith.addf %35, %37 : vector<16x128xf32>
      %c0_23 = arith.constant 0 : index
      %c0_24 = arith.constant 0 : index
      %39 = vector.load %arg7[%c0_23, %c0_24] : memref<16x128xf32, #tpu.memory_space<vmem>>, vector<16x128xf32>
      tpu.vector_store %arg7[%c0_23, %c0_24], %38 {strides = array<i32>} : memref<16x128xf32, #tpu.memory_space<vmem>>, vector<16x128xf32>,
    } else {
    }
    return
  }
  func.func @transform_0(%arg0: i32, %arg1: i32) -> (i32, i32) {
    %c0_i32 = arith.constant 0 : i32
    return %arg0, %arg1 : i32, i32
  }
  func.func @transform_1(%arg0: i32, %arg1: i32) -> (i32, i32) {
    %c0_i32 = arith.constant 0 : i32
    %c0_i32_0 = arith.constant 0 : i32
    return %arg1, %c0_i32 : i32, i32
  }
  func.func @transform_2(%arg0: i32, %arg1: i32) -> (i32, i32) {
    %c0_i32 = arith.constant 0 : i32
    %c0_i32_0 = arith.constant 0 : i32
    %c0_i32_1 = arith.constant 0 : i32
    return %c0_i32, %c0_i32_0 : i32, i32
  }
  func.func @transform_3(%arg0: i32, %arg1: i32) -> (i32, i32) {
    %c0_i32 = arith.constant 0 : i32
    %c0_i32_0 = arith.constant 0 : i32
    %c0_i32_1 = arith.constant 0 : i32
    return %c0_i32, %c0_i32_0 : i32, i32
  }
  func.func @transform_4(%arg0: i32, %arg1: i32) -> (i32, i32) {
    %c0_i32 = arith.constant 0 : i32
    %c0_i32_0 = arith.constant 0 : i32
    %c0_i32_1 = arith.constant 0 : i32
    return %c0_i32, %c0_i32_0 : i32, i32
  }
  func.func @transform_5(%arg0: i32, %arg1: i32) -> (i32, i32) {
    %c0_i32 = arith.constant 0 : i32
    %c0_i32_0 = arith.constant 0 : i32
    return %arg0, %c0_i32 : i32, i32
  }
}

module attributes {stable_mosaic.version = 11 : i64} {
  func.func @_attention_kernel(%arg0: i32, %arg1: memref<1x8x8xf32, #tpu.memory_space<vmem>>, %arg2: memref<1x8x8xf32, #tpu.memory_space<vmem>>, %arg3: memref<1x8x8xf32, #tpu.memory_space<vmem>>, %arg4: memref<1x8x8xf32, #tpu.memory_space<vmem>>) attributes {dimension_semantics = [#tpu.dimension_semantics<parallel>], iteration_bounds = array<i64: 8>, scalar_prefetch = 0 : i64, scratch_operands = 0 : i64, tpu.core_type = #tpu.core_type<tc>, window_params = [{transform_indices = @transform_0, window_bounds = array<i64: 1, 8, 8>}, {transform_indices = @transform_1, window_bounds = array<i64: 1, 8, 8>}, {transform_indices = @transform_2, window_bounds = array<i64: 1, 8, 8>}, {transform_indices = @transform_3, window_bounds = array<i64: 1, 8, 8>}]} {
    %c0 = arith.constant 0 : index
    %c0_0 = arith.constant 0 : index
    %c0_1 = arith.constant 0 : index
    %0 = vector.load %arg1[%c0, %c0_0, %c0_1] : memref<1x8x8xf32, #tpu.memory_space<vmem>>, vector<1x8x8xf32>
    %1 = vector.shape_cast %0 : vector<1x8x8xf32> to vector<8x8xf32>
    %2 = arith.truncf %1 : vector<8x8xf32> to vector<8x8xbf16>
    %c0_2 = arith.constant 0 : index
    %c0_3 = arith.constant 0 : index
    %c0_4 = arith.constant 0 : index
    %3 = vector.load %arg2[%c0_2, %c0_3, %c0_4] : memref<1x8x8xf32, #tpu.memory_space<vmem>>, vector<1x8x8xf32>
    %4 = vector.shape_cast %3 : vector<1x8x8xf32> to vector<8x8xf32>
    %5 = arith.truncf %4 : vector<8x8xf32> to vector<8x8xbf16>
    %c0_5 = arith.constant 0 : index
    %c0_6 = arith.constant 0 : index
    %c0_7 = arith.constant 0 : index
    %6 = vector.load %arg3[%c0_5, %c0_6, %c0_7] : memref<1x8x8xf32, #tpu.memory_space<vmem>>, vector<1x8x8xf32>
    %7 = vector.shape_cast %6 : vector<1x8x8xf32> to vector<8x8xf32>
    %8 = arith.truncf %7 : vector<8x8xf32> to vector<8x8xbf16>
    %cst = arith.constant dense<0.000000e+00> : vector<8x8xf32>
    %9 = tpu.matmul %2, %5, %cst {dimension_numbers = #tpu.dot_dimension_numbers<[1], [1], [0], [0], [0, 0, 1, 0], [], []>} : vector<8x8xbf16>, vector<8x8xbf16>, vector<8x8xf32> -> vector<8x8xf32>
    %cst_8 = arith.constant 0.353553385 : f32
    %10 = vector.broadcast %cst_8 : f32 to vector<8x8xf32>
    %11 = arith.mulf %9, %10 : vector<8x8xf32>
    %cst_9 = arith.constant dense<0xFF800000> : vector<8xf32>
    %12 = vector.multi_reduction <maximumf>, %11, %cst_9 [1] : vector<8x8xf32> to vector<8xf32>
    %13 = vector.shape_cast %12 : vector<8xf32> to vector<8x1xf32>
    %14 = vector.broadcast %13 : vector<8x1xf32> to vector<8x8xf32>
    %15 = arith.subf %11, %14 : vector<8x8xf32>
    %16 = math.exp %15 : vector<8x8xf32>
    %cst_10 = arith.constant dense<0.000000e+00> : vector<8xf32>
    %17 = vector.multi_reduction <add>, %16, %cst_10 [1] : vector<8x8xf32> to vector<8xf32>
    %18 = vector.shape_cast %17 : vector<8xf32> to vector<8x1xf32>
    %19 = arith.truncf %16 : vector<8x8xf32> to vector<8x8xbf16>
    %cst_11 = arith.constant dense<0.000000e+00> : vector<8x8xf32>
    %20 = tpu.matmul %19, %8, %cst_11 {dimension_numbers = #tpu.dot_dimension_numbers<[1], [0], [0], [1], [0, 0, 1, 1], [], []>} : vector<8x8xbf16>, vector<8x8xbf16>, vector<8x8xf32> -> vector<8x8xf32>
    %21 = tpu.reciprocal %18 {approx = true} : vector<8x1xf32> -> vector<8x1xf32>
    %22 = vector.broadcast %21 : vector<8x1xf32> to vector<8x8xf32>
    %23 = arith.mulf %20, %22 : vector<8x8xf32>
    %c0_12 = arith.constant 0 : index
    %c0_13 = arith.constant 0 : index
    %c0_14 = arith.constant 0 : index
    %24 = vector.load %arg4[%c0_12, %c0_13, %c0_14] : memref<1x8x8xf32, #tpu.memory_space<vmem>>, vector<1x8x8xf32>
    %25 = vector.shape_cast %24 : vector<1x8x8xf32> to vector<8x8xf32>
    %26 = vector.shape_cast %23 : vector<8x8xf32> to vector<1x8x8xf32>
    tpu.vector_store %arg4[%c0_12, %c0_13, %c0_14], %26 {strides = array<i32>} : memref<1x8x8xf32, #tpu.memory_space<vmem>>, vector<1x8x8xf32>,
    return
  }
  func.func @transform_0(%arg0: i32) -> (i32, i32, i32) {
    %c0_i32 = arith.constant 0 : i32
    %c0_i32_0 = arith.constant 0 : i32
    %c0_i32_1 = arith.constant 0 : i32
    return %arg0, %c0_i32, %c0_i32_0 : i32, i32, i32
  }
  func.func @transform_1(%arg0: i32) -> (i32, i32, i32) {
    %c0_i32 = arith.constant 0 : i32
    %c0_i32_0 = arith.constant 0 : i32
    %c0_i32_1 = arith.constant 0 : i32
    return %arg0, %c0_i32, %c0_i32_0 : i32, i32, i32
  }
  func.func @transform_2(%arg0: i32) -> (i32, i32, i32) {
    %c0_i32 = arith.constant 0 : i32
    %c0_i32_0 = arith.constant 0 : i32
    %c0_i32_1 = arith.constant 0 : i32
    return %arg0, %c0_i32, %c0_i32_0 : i32, i32, i32
  }
  func.func @transform_3(%arg0: i32) -> (i32, i32, i32) {
    %c0_i32 = arith.constant 0 : i32
    %c0_i32_0 = arith.constant 0 : i32
    %c0_i32_1 = arith.constant 0 : i32
    return %arg0, %c0_i32, %c0_i32_0 : i32, i32, i32
  }
}

module attributes {stable_mosaic.version = 11 : i64} {
  func.func @kernel(%arg0: i32, %arg1: i32, %arg2: memref<16x32xf32, #tpu.memory_space<vmem>>, %arg3: memref<32x128xbf16, #tpu.memory_space<vmem>>, %arg4: memref<1x128xf32, #tpu.memory_space<vmem>>, %arg5: memref<1x32xf32, #tpu.memory_space<vmem>>, %arg6: memref<1x32xf32, #tpu.memory_space<vmem>>, %arg7: memref<16x128xf32, #tpu.memory_space<vmem>>, %arg8: memref<16x128xf32, #tpu.memory_space<vmem>>) attributes {dimension_semantics = [#tpu.dimension_semantics<parallel>, #tpu.dimension_semantics<arbitrary>], iteration_bounds = array<i64: 1, 1>, scalar_prefetch = 0 : i64, scratch_operands = 1 : i64, tpu.core_type = #tpu.core_type<tc>, window_params = [{transform_indices = @transform_0, window_bounds = array<i64: 16, 32>}, {transform_indices = @transform_1, window_bounds = array<i64: 32, 128>}, {pipeline_mode = #tpu.pipeline_mode<synchronous>, transform_indices = @transform_2, window_bounds = array<i64: 1, 128>}, {pipeline_mode = #tpu.pipeline_mode<synchronous>, transform_indices = @transform_3, window_bounds = array<i64: 1, 32>}, {pipeline_mode = #tpu.pipeline_mode<synchronous>, transform_indices = @transform_4, window_bounds = array<i64: 1, 32>}, {transform_indices = @transform_5, window_bounds = array<i64: 16, 128>}]} {
    %c0_i32 = arith.constant 0 : i32
    %0 = arith.cmpi eq, %arg1, %c0_i32 : i32
    %1 = arith.extui %0 : i1 to i32
    %c0_i32_0 = arith.constant 0 : i32
    %2 = arith.cmpi ne, %1, %c0_i32_0 : i32
    scf.if %2 {
      %cst_19 = arith.constant 0.000000e+00 : f32
      %35 = vector.broadcast %cst_19 : f32 to vector<16x128xf32>
      %c0_20 = arith.constant 0 : index
      %c0_21 = arith.constant 0 : index
      %36 = vector.load %arg8[%c0_20, %c0_21] : memref<16x128xf32, #tpu.memory_space<vmem>>, vector<16x128xf32>
      tpu.vector_store %arg8[%c0_20, %c0_21], %35 {strides = array<i32>} : memref<16x128xf32, #tpu.memory_space<vmem>>, vector<16x128xf32>,
    } else {
    }
    %c0 = arith.constant 0 : index
    %c0_1 = arith.constant 0 : index
    %3 = vector.load %arg2[%c0, %c0_1] : memref<16x32xf32, #tpu.memory_space<vmem>>, vector<16x32xf32>
    %cst = arith.constant dense<0.000000e+00> : vector<16xf32>
    %4 = vector.multi_reduction <add>, %3, %cst [1] : vector<16x32xf32> to vector<16xf32>
    %5 = vector.shape_cast %4 : vector<16xf32> to vector<16x1xf32>
    %cst_2 = arith.constant 3.200000e+01 : f32
    %6 = vector.broadcast %cst_2 : f32 to vector<16x1xf32>
    %7 = arith.divf %5, %6 : vector<16x1xf32>
    %8 = vector.broadcast %7 : vector<16x1xf32> to vector<16x32xf32>
    %9 = arith.subf %3, %8 : vector<16x32xf32>
    %10 = arith.mulf %9, %9 : vector<16x32xf32>
    %cst_3 = arith.constant dense<0.000000e+00> : vector<16xf32>
    %11 = vector.multi_reduction <add>, %10, %cst_3 [1] : vector<16x32xf32> to vector<16xf32>
    %12 = vector.shape_cast %11 : vector<16xf32> to vector<16x1xf32>
    %cst_4 = arith.constant 3.200000e+01 : f32
    %13 = vector.broadcast %cst_4 : f32 to vector<16x1xf32>
    %14 = arith.divf %12, %13 : vector<16x1xf32>
    %cst_5 = arith.constant 9.99999974E-6 : f32
    %15 = vector.broadcast %cst_5 : f32 to vector<16x1xf32>
    %16 = arith.addf %14, %15 : vector<16x1xf32>
    %17 = math.rsqrt %16 : vector<16x1xf32>
    %18 = vector.broadcast %17 : vector<16x1xf32> to vector<16x32xf32>
    %19 = arith.mulf %9, %18 : vector<16x32xf32>
    %c0_6 = arith.constant 0 : index
    %c0_7 = arith.constant 0 : index
    %20 = vector.load %arg5[%c0_6, %c0_7] : memref<1x32xf32, #tpu.memory_space<vmem>>, vector<1x32xf32>
    %21 = vector.broadcast %20 : vector<1x32xf32> to vector<16x32xf32>
    %22 = arith.mulf %19, %21 : vector<16x32xf32>
    %c0_8 = arith.constant 0 : index
    %c0_9 = arith.constant 0 : index
    %23 = vector.load %arg6[%c0_8, %c0_9] : memref<1x32xf32, #tpu.memory_space<vmem>>, vector<1x32xf32>
    %24 = vector.broadcast %23 : vector<1x32xf32> to vector<16x32xf32>
    %25 = arith.addf %22, %24 : vector<16x32xf32>
    %26 = arith.truncf %25 : vector<16x32xf32> to vector<16x32xbf16>
    %c0_10 = arith.constant 0 : index
    %c0_11 = arith.constant 0 : index
    %27 = vector.load %arg8[%c0_10, %c0_11] : memref<16x128xf32, #tpu.memory_space<vmem>>, vector<16x128xf32>
    %c0_12 = arith.constant 0 : index
    %c0_13 = arith.constant 0 : index
    %28 = vector.load %arg3[%c0_12, %c0_13] : memref<32x128xbf16, #tpu.memory_space<vmem>>, vector<32x128xbf16>
    %cst_14 = arith.constant dense<0.000000e+00> : vector<16x128xf32>
    %29 = tpu.matmul %26, %28, %cst_14 {dimension_numbers = #tpu.dot_dimension_numbers<[1], [0], [0], [1], [0, 0, 1, 1], [], []>} : vector<16x32xbf16>, vector<32x128xbf16>, vector<16x128xf32> -> vector<16x128xf32>
    %30 = arith.addf %27, %29 : vector<16x128xf32>
    %c0_15 = arith.constant 0 : index
    %c0_16 = arith.constant 0 : index
    %31 = vector.load %arg8[%c0_15, %c0_16] : memref<16x128xf32, #tpu.memory_space<vmem>>, vector<16x128xf32>
    tpu.vector_store %arg8[%c0_15, %c0_16], %30 {strides = array<i32>} : memref<16x128xf32, #tpu.memory_space<vmem>>, vector<16x128xf32>,
    %c0_i32_17 = arith.constant 0 : i32
    %32 = arith.cmpi eq, %arg1, %c0_i32_17 : i32
    %33 = arith.extui %32 : i1 to i32
    %c0_i32_18 = arith.constant 0 : i32
    %34 = arith.cmpi ne, %33, %c0_i32_18 : i32
    scf.if %34 {
      %c0_19 = arith.constant 0 : index
      %c0_20 = arith.constant 0 : index
      %35 = vector.load %arg8[%c0_19, %c0_20] : memref<16x128xf32, #tpu.memory_space<vmem>>, vector<16x128xf32>
      %c0_21 = arith.constant 0 : index
      %c0_22 = arith.constant 0 : index
      %36 = vector.load %arg4[%c0_21, %c0_22] : memref<1x128xf32, #tpu.memory_space<vmem>>, vector<1x128xf32>
      %37 = vector.broadcast %36 : vector<1x128xf32> to vector<16x128xf32>
      %38 = arith.addf %35, %37 : vector<16x128xf32>
      %cst_23 = arith.constant 5.000000e-01 : f32
      %39 = vector.broadcast %cst_23 : f32 to vector<16x128xf32>
      %40 = arith.mulf %39, %38 : vector<16x128xf32>
      %cst_24 = arith.constant 0.707106769 : f32
      %41 = vector.broadcast %cst_24 : f32 to vector<16x128xf32>
      %42 = arith.mulf %38, %41 : vector<16x128xf32>
      %43 = math.absf %42 : vector<16x128xf32>
      %cst_25 = arith.constant 0.327591091 : f32
      %44 = vector.broadcast %cst_25 : f32 to vector<16x128xf32>
      %45 = arith.mulf %44, %43 : vector<16x128xf32>
      %cst_26 = arith.constant 1.000000e+00 : f32
      %46 = vector.broadcast %cst_26 : f32 to vector<16x128xf32>
      %47 = arith.addf %46, %45 : vector<16x128xf32>
      %cst_27 = arith.constant 1.000000e+00 : f32
      %48 = vector.broadcast %cst_27 : f32 to vector<16x128xf32>
      %49 = arith.divf %48, %47 : vector<16x128xf32>
      %cst_28 = arith.constant 1.06140542 : f32
      %50 = vector.broadcast %cst_28 : f32 to vector<16x128xf32>
      %51 = arith.mulf %50, %49 : vector<16x128xf32>
      %cst_29 = arith.constant -1.45315206 : f32
      %52 = vector.broadcast %cst_29 : f32 to vector<16x128xf32>
      %53 = arith.addf %51, %52 : vector<16x128xf32>
      %54 = arith.mulf %53, %49 : vector<16x128xf32>
      %cst_30 = arith.constant 1.42141378 : f32
      %55 = vector.broadcast %cst_30 : f32 to vector<16x128xf32>
      %56 = arith.addf %54, %55 : vector<16x128xf32>
      %57 = arith.mulf %56, %49 : vector<16x128xf32>
      %cst_31 = arith.constant -0.284496725 : f32
      %58 = vector.broadcast %cst_31 : f32 to vector<16x128xf32>
      %59 = arith.addf %57, %58 : vector<16x128xf32>
      %60 = arith.mulf %59, %49 : vector<16x128xf32>
      %cst_32 = arith.constant 0.254829586 : f32
      %61 = vector.broadcast %cst_32 : f32 to vector<16x128xf32>
      %62 = arith.addf %60, %61 : vector<16x128xf32>
      %63 = arith.mulf %62, %49 : vector<16x128xf32>
      %cst_33 = arith.constant 0.000000e+00 : f32
      %64 = vector.broadcast %cst_33 : f32 to vector<16x128xf32>
      %65 = arith.subf %64, %43 : vector<16x128xf32>
      %66 = arith.mulf %65, %43 : vector<16x128xf32>
      %67 = math.exp %66 : vector<16x128xf32>
      %68 = arith.mulf %63, %67 : vector<16x128xf32>
      %cst_34 = arith.constant 1.000000e+00 : f32
      %69 = vector.broadcast %cst_34 : f32 to vector<16x128xf32>
      %70 = arith.subf %69, %68 : vector<16x128xf32>
      %cst_35 = arith.constant 0.000000e+00 : f32
      %71 = vector.broadcast %cst_35 : f32 to vector<16x128xf32>
      %72 = arith.cmpf oge, %42, %71 : vector<16x128xf32>
      %cst_36 = arith.constant 0.000000e+00 : f32
      %73 = vector.broadcast %cst_36 : f32 to vector<16x128xf32>
      %74 = arith.subf %73, %70 : vector<16x128xf32>
      %75 = arith.select %72, %70, %74 : vector<16x128xi1>, vector<16x128xf32>
      %cst_37 = arith.constant 1.000000e+00 : f32
      %76 = vector.broadcast %cst_37 : f32 to vector<16x128xf32>
      %77 = arith.addf %76, %75 : vector<16x128xf32>
      %78 = arith.mulf %40, %77 : vector<16x128xf32>
      %c0_38 = arith.constant 0 : index
      %c0_39 = arith.constant 0 : index
      %79 = vector.load %arg7[%c0_38, %c0_39] : memref<16x128xf32, #tpu.memory_space<vmem>>, vector<16x128xf32>
      tpu.vector_store %arg7[%c0_38, %c0_39], %78 {strides = array<i32>} : memref<16x128xf32, #tpu.memory_space<vmem>>, vector<16x128xf32>,
    } else {
    }
    return
  }
  func.func @transform_0(%arg0: i32, %arg1: i32) -> (i32, i32) {
    %c0_i32 = arith.constant 0 : i32
    return %arg0, %arg1 : i32, i32
  }
  func.func @transform_1(%arg0: i32, %arg1: i32) -> (i32, i32) {
    %c0_i32 = arith.constant 0 : i32
    %c0_i32_0 = arith.constant 0 : i32
    return %arg1, %c0_i32 : i32, i32
  }
  func.func @transform_2(%arg0: i32, %arg1: i32) -> (i32, i32) {
    %c0_i32 = arith.constant 0 : i32
    %c0_i32_0 = arith.constant 0 : i32
    %c0_i32_1 = arith.constant 0 : i32
    return %c0_i32, %c0_i32_0 : i32, i32
  }
  func.func @transform_3(%arg0: i32, %arg1: i32) -> (i32, i32) {
    %c0_i32 = arith.constant 0 : i32
    %c0_i32_0 = arith.constant 0 : i32
    %c0_i32_1 = arith.constant 0 : i32
    return %c0_i32, %c0_i32_0 : i32, i32
  }
  func.func @transform_4(%arg0: i32, %arg1: i32) -> (i32, i32) {
    %c0_i32 = arith.constant 0 : i32
    %c0_i32_0 = arith.constant 0 : i32
    %c0_i32_1 = arith.constant 0 : i32
    return %c0_i32, %c0_i32_0 : i32, i32
  }
  func.func @transform_5(%arg0: i32, %arg1: i32) -> (i32, i32) {
    %c0_i32 = arith.constant 0 : i32
    %c0_i32_0 = arith.constant 0 : i32
    return %arg0, %c0_i32 : i32, i32
  }
}

module attributes {stable_mosaic.version = 11 : i64} {
  func.func @kernel(%arg0: i32, %arg1: i32, %arg2: memref<16x32xf32, #tpu.memory_space<vmem>>, %arg3: memref<32x128xbf16, #tpu.memory_space<vmem>>, %arg4: memref<1x128xf32, #tpu.memory_space<vmem>>, %arg5: memref<16x128xf32, #tpu.memory_space<vmem>>, %arg6: memref<16x128xf32, #tpu.memory_space<vmem>>, %arg7: memref<16x128xf32, #tpu.memory_space<vmem>>) attributes {dimension_semantics = [#tpu.dimension_semantics<parallel>, #tpu.dimension_semantics<arbitrary>], iteration_bounds = array<i64: 1, 1>, scalar_prefetch = 0 : i64, scratch_operands = 1 : i64, tpu.core_type = #tpu.core_type<tc>, window_params = [{transform_indices = @transform_0, window_bounds = array<i64: 16, 32>}, {transform_indices = @transform_1, window_bounds = array<i64: 32, 128>}, {pipeline_mode = #tpu.pipeline_mode<synchronous>, transform_indices = @transform_2, window_bounds = array<i64: 1, 128>}, {transform_indices = @transform_3, window_bounds = array<i64: 16, 128>}, {transform_indices = @transform_4, window_bounds = array<i64: 16, 128>}]} {
    %c0_i32 = arith.constant 0 : i32
    %0 = arith.cmpi eq, %arg1, %c0_i32 : i32
    %1 = arith.extui %0 : i1 to i32
    %c0_i32_0 = arith.constant 0 : i32
    %2 = arith.cmpi ne, %1, %c0_i32_0 : i32
    scf.if %2 {
      %cst_10 = arith.constant 0.000000e+00 : f32
      %13 = vector.broadcast %cst_10 : f32 to vector<16x128xf32>
      %c0_11 = arith.constant 0 : index
      %c0_12 = arith.constant 0 : index
      %14 = vector.load %arg7[%c0_11, %c0_12] : memref<16x128xf32, #tpu.memory_space<vmem>>, vector<16x128xf32>
      tpu.vector_store %arg7[%c0_11, %c0_12], %13 {strides = array<i32>} : memref<16x128xf32, #tpu.memory_space<vmem>>, vector<16x128xf32>,
    } else {
    }
    %c0 = arith.constant 0 : index
    %c0_1 = arith.constant 0 : index
    %3 = vector.load %arg2[%c0, %c0_1] : memref<16x32xf32, #tpu.memory_space<vmem>>, vector<16x32xf32>
    %4 = arith.truncf %3 : vector<16x32xf32> to vector<16x32xbf16>
    %c0_2 = arith.constant 0 : index
    %c0_3 = arith.constant 0 : index
    %5 = vector.load %arg7[%c0_2, %c0_3] : memref<16x128xf32, #tpu.memory_space<vmem>>, vector<16x128xf32>
    %c0_4 = arith.constant 0 : index
    %c0_5 = arith.constant 0 : index
    %6 = vector.load %arg3[%c0_4, %c0_5] : memref<32x128xbf16, #tpu.memory_space<vmem>>, vector<32x128xbf16>
    %cst = arith.constant dense<0.000000e+00> : vector<16x128xf32>
    %7 = tpu.matmul %4, %6, %cst {dimension_numbers = #tpu.dot_dimension_numbers<[1], [0], [0], [1], [0, 0, 1, 1], [], []>} : vector<16x32xbf16>, vector<32x128xbf16>, vector<16x128xf32> -> vector<16x128xf32>
    %8 = arith.addf %5, %7 : vector<16x128xf32>
    %c0_6 = arith.constant 0 : index
    %c0_7 = arith.constant 0 : index
    %9 = vector.load %arg7[%c0_6, %c0_7] : memref<16x128xf32, #tpu.memory_space<vmem>>, vector<16x128xf32>
    tpu.vector_store %arg7[%c0_6, %c0_7], %8 {strides = array<i32>} : memref<16x128xf32, #tpu.memory_space<vmem>>, vector<16x128xf32>,
    %c0_i32_8 = arith.constant 0 : i32
    %10 = arith.cmpi eq, %arg1, %c0_i32_8 : i32
    %11 = arith.extui %10 : i1 to i32
    %c0_i32_9 = arith.constant 0 : i32
    %12 = arith.cmpi ne, %11, %c0_i32_9 : i32
    scf.if %12 {
      %c0_10 = arith.constant 0 : index
      %c0_11 = arith.constant 0 : index
      %13 = vector.load %arg7[%c0_10, %c0_11] : memref<16x128xf32, #tpu.memory_space<vmem>>, vector<16x128xf32>
      %c0_12 = arith.constant 0 : index
      %c0_13 = arith.constant 0 : index
      %14 = vector.load %arg4[%c0_12, %c0_13] : memref<1x128xf32, #tpu.memory_space<vmem>>, vector<1x128xf32>
      %15 = vector.broadcast %14 : vector<1x128xf32> to vector<16x128xf32>
      %16 = arith.addf %13, %15 : vector<16x128xf32>
      %c0_14 = arith.constant 0 : index
      %c0_15 = arith.constant 0 : index
      %17 = vector.load %arg5[%c0_14, %c0_15] : memref<16x128xf32, #tpu.memory_space<vmem>>, vector<16x128xf32>
      %18 = arith.addf %16, %17 : vector<16x128xf32>
      %c0_16 = arith.constant 0 : index
      %c0_17 = arith.constant 0 : index
      %19 = vector.load %arg6[%c0_16, %c0_17] : memref<16x128xf32, #tpu.memory_space<vmem>>, vector<16x128xf32>
      tpu.vector_store %arg6[%c0_16, %c0_17], %18 {strides = array<i32>} : memref<16x128xf32, #tpu.memory_space<vmem>>, vector<16x128xf32>,
    } else {
    }
    return
  }
  func.func @transform_0(%arg0: i32, %arg1: i32) -> (i32, i32) {
    %c0_i32 = arith.constant 0 : i32
    return %arg0, %arg1 : i32, i32
  }
  func.func @transform_1(%arg0: i32, %arg1: i32) -> (i32, i32) {
    %c0_i32 = arith.constant 0 : i32
    %c0_i32_0 = arith.constant 0 : i32
    return %arg1, %c0_i32 : i32, i32
  }
  func.func @transform_2(%arg0: i32, %arg1: i32) -> (i32, i32) {
    %c0_i32 = arith.constant 0 : i32
    %c0_i32_0 = arith.constant 0 : i32
    %c0_i32_1 = arith.constant 0 : i32
    return %c0_i32, %c0_i32_0 : i32, i32
  }
  func.func @transform_3(%arg0: i32, %arg1: i32) -> (i32, i32) {
    %c0_i32 = arith.constant 0 : i32
    %c0_i32_0 = arith.constant 0 : i32
    return %arg0, %c0_i32 : i32, i32
  }
  func.func @transform_4(%arg0: i32, %arg1: i32) -> (i32, i32) {
    %c0_i32 = arith.constant 0 : i32
    %c0_i32_0 = arith.constant 0 : i32
    return %arg0, %c0_i32 : i32, i32
  }
}

module attributes {stable_mosaic.version = 11 : i64} {
  func.func @kernel(%arg0: i32, %arg1: i32, %arg2: memref<16x64xf32, #tpu.memory_space<vmem>>, %arg3: memref<64x128xbf16, #tpu.memory_space<vmem>>, %arg4: memref<1x128xf32, #tpu.memory_space<vmem>>, %arg5: memref<16x128xf32, #tpu.memory_space<vmem>>, %arg6: memref<16x128xf32, #tpu.memory_space<vmem>>, %arg7: memref<16x128xf32, #tpu.memory_space<vmem>>) attributes {dimension_semantics = [#tpu.dimension_semantics<parallel>, #tpu.dimension_semantics<arbitrary>], iteration_bounds = array<i64: 1, 1>, scalar_prefetch = 0 : i64, scratch_operands = 1 : i64, tpu.core_type = #tpu.core_type<tc>, window_params = [{transform_indices = @transform_0, window_bounds = array<i64: 16, 64>}, {transform_indices = @transform_1, window_bounds = array<i64: 64, 128>}, {pipeline_mode = #tpu.pipeline_mode<synchronous>, transform_indices = @transform_2, window_bounds = array<i64: 1, 128>}, {transform_indices = @transform_3, window_bounds = array<i64: 16, 128>}, {transform_indices = @transform_4, window_bounds = array<i64: 16, 128>}]} {
    %c0_i32 = arith.constant 0 : i32
    %0 = arith.cmpi eq, %arg1, %c0_i32 : i32
    %1 = arith.extui %0 : i1 to i32
    %c0_i32_0 = arith.constant 0 : i32
    %2 = arith.cmpi ne, %1, %c0_i32_0 : i32
    scf.if %2 {
      %cst_10 = arith.constant 0.000000e+00 : f32
      %13 = vector.broadcast %cst_10 : f32 to vector<16x128xf32>
      %c0_11 = arith.constant 0 : index
      %c0_12 = arith.constant 0 : index
      %14 = vector.load %arg7[%c0_11, %c0_12] : memref<16x128xf32, #tpu.memory_space<vmem>>, vector<16x128xf32>
      tpu.vector_store %arg7[%c0_11, %c0_12], %13 {strides = array<i32>} : memref<16x128xf32, #tpu.memory_space<vmem>>, vector<16x128xf32>,
    } else {
    }
    %c0 = arith.constant 0 : index
    %c0_1 = arith.constant 0 : index
    %3 = vector.load %arg2[%c0, %c0_1] : memref<16x64xf32, #tpu.memory_space<vmem>>, vector<16x64xf32>
    %4 = arith.truncf %3 : vector<16x64xf32> to vector<16x64xbf16>
    %c0_2 = arith.constant 0 : index
    %c0_3 = arith.constant 0 : index
    %5 = vector.load %arg7[%c0_2, %c0_3] : memref<16x128xf32, #tpu.memory_space<vmem>>, vector<16x128xf32>
    %c0_4 = arith.constant 0 : index
    %c0_5 = arith.constant 0 : index
    %6 = vector.load %arg3[%c0_4, %c0_5] : memref<64x128xbf16, #tpu.memory_space<vmem>>, vector<64x128xbf16>
    %cst = arith.constant dense<0.000000e+00> : vector<16x128xf32>
    %7 = tpu.matmul %4, %6, %cst {dimension_numbers = #tpu.dot_dimension_numbers<[1], [0], [0], [1], [0, 0, 1, 1], [], []>} : vector<16x64xbf16>, vector<64x128xbf16>, vector<16x128xf32> -> vector<16x128xf32>
    %8 = arith.addf %5, %7 : vector<16x128xf32>
    %c0_6 = arith.constant 0 : index
    %c0_7 = arith.constant 0 : index
    %9 = vector.load %arg7[%c0_6, %c0_7] : memref<16x128xf32, #tpu.memory_space<vmem>>, vector<16x128xf32>
    tpu.vector_store %arg7[%c0_6, %c0_7], %8 {strides = array<i32>} : memref<16x128xf32, #tpu.memory_space<vmem>>, vector<16x128xf32>,
    %c0_i32_8 = arith.constant 0 : i32
    %10 = arith.cmpi eq, %arg1, %c0_i32_8 : i32
    %11 = arith.extui %10 : i1 to i32
    %c0_i32_9 = arith.constant 0 : i32
    %12 = arith.cmpi ne, %11, %c0_i32_9 : i32
    scf.if %12 {
      %c0_10 = arith.constant 0 : index
      %c0_11 = arith.constant 0 : index
      %13 = vector.load %arg7[%c0_10, %c0_11] : memref<16x128xf32, #tpu.memory_space<vmem>>, vector<16x128xf32>
      %c0_12 = arith.constant 0 : index
      %c0_13 = arith.constant 0 : index
      %14 = vector.load %arg4[%c0_12, %c0_13] : memref<1x128xf32, #tpu.memory_space<vmem>>, vector<1x128xf32>
      %15 = vector.broadcast %14 : vector<1x128xf32> to vector<16x128xf32>
      %16 = arith.addf %13, %15 : vector<16x128xf32>
      %c0_14 = arith.constant 0 : index
      %c0_15 = arith.constant 0 : index
      %17 = vector.load %arg5[%c0_14, %c0_15] : memref<16x128xf32, #tpu.memory_space<vmem>>, vector<16x128xf32>
      %18 = arith.addf %16, %17 : vector<16x128xf32>
      %c0_16 = arith.constant 0 : index
      %c0_17 = arith.constant 0 : index
      %19 = vector.load %arg6[%c0_16, %c0_17] : memref<16x128xf32, #tpu.memory_space<vmem>>, vector<16x128xf32>
      tpu.vector_store %arg6[%c0_16, %c0_17], %18 {strides = array<i32>} : memref<16x128xf32, #tpu.memory_space<vmem>>, vector<16x128xf32>,
    } else {
    }
    return
  }
  func.func @transform_0(%arg0: i32, %arg1: i32) -> (i32, i32) {
    %c0_i32 = arith.constant 0 : i32
    return %arg0, %arg1 : i32, i32
  }
  func.func @transform_1(%arg0: i32, %arg1: i32) -> (i32, i32) {
    %c0_i32 = arith.constant 0 : i32
    %c0_i32_0 = arith.constant 0 : i32
    return %arg1, %c0_i32 : i32, i32
  }
  func.func @transform_2(%arg0: i32, %arg1: i32) -> (i32, i32) {
    %c0_i32 = arith.constant 0 : i32
    %c0_i32_0 = arith.constant 0 : i32
    %c0_i32_1 = arith.constant 0 : i32
    return %c0_i32, %c0_i32_0 : i32, i32
  }
  func.func @transform_3(%arg0: i32, %arg1: i32) -> (i32, i32) {
    %c0_i32 = arith.constant 0 : i32
    %c0_i32_0 = arith.constant 0 : i32
    return %arg0, %c0_i32 : i32, i32
  }
  func.func @transform_4(%arg0: i32, %arg1: i32) -> (i32, i32) {
    %c0_i32 = arith.constant 0 : i32
    %c0_i32_0 = arith.constant 0 : i32
    return %arg0, %c0_i32 : i32, i32
  }
}

module attributes {stable_mosaic.version = 11 : i64} {
  func.func @kernel(%arg0: i32, %arg1: i32, %arg2: memref<16x32xf32, #tpu.memory_space<vmem>>, %arg3: memref<32x128xbf16, #tpu.memory_space<vmem>>, %arg4: memref<1x128xf32, #tpu.memory_space<vmem>>, %arg5: memref<1x32xf32, #tpu.memory_space<vmem>>, %arg6: memref<1x32xf32, #tpu.memory_space<vmem>>, %arg7: memref<16x128xf32, #tpu.memory_space<vmem>>, %arg8: memref<16x128xf32, #tpu.memory_space<vmem>>) attributes {dimension_semantics = [#tpu.dimension_semantics<parallel>, #tpu.dimension_semantics<arbitrary>], iteration_bounds = array<i64: 1, 1>, scalar_prefetch = 0 : i64, scratch_operands = 1 : i64, tpu.core_type = #tpu.core_type<tc>, window_params = [{transform_indices = @transform_0, window_bounds = array<i64: 16, 32>}, {transform_indices = @transform_1, window_bounds = array<i64: 32, 128>}, {pipeline_mode = #tpu.pipeline_mode<synchronous>, transform_indices = @transform_2, window_bounds = array<i64: 1, 128>}, {pipeline_mode = #tpu.pipeline_mode<synchronous>, transform_indices = @transform_3, window_bounds = array<i64: 1, 32>}, {pipeline_mode = #tpu.pipeline_mode<synchronous>, transform_indices = @transform_4, window_bounds = array<i64: 1, 32>}, {transform_indices = @transform_5, window_bounds = array<i64: 16, 128>}]} {
    %c0_i32 = arith.constant 0 : i32
    %0 = arith.cmpi eq, %arg1, %c0_i32 : i32
    %1 = arith.extui %0 : i1 to i32
    %c0_i32_0 = arith.constant 0 : i32
    %2 = arith.cmpi ne, %1, %c0_i32_0 : i32
    scf.if %2 {
      %cst_19 = arith.constant 0.000000e+00 : f32
      %35 = vector.broadcast %cst_19 : f32 to vector<16x128xf32>
      %c0_20 = arith.constant 0 : index
      %c0_21 = arith.constant 0 : index
      %36 = vector.load %arg8[%c0_20, %c0_21] : memref<16x128xf32, #tpu.memory_space<vmem>>, vector<16x128xf32>
      tpu.vector_store %arg8[%c0_20, %c0_21], %35 {strides = array<i32>} : memref<16x128xf32, #tpu.memory_space<vmem>>, vector<16x128xf32>,
    } else {
    }
    %c0 = arith.constant 0 : index
    %c0_1 = arith.constant 0 : index
    %3 = vector.load %arg2[%c0, %c0_1] : memref<16x32xf32, #tpu.memory_space<vmem>>, vector<16x32xf32>
    %cst = arith.constant dense<0.000000e+00> : vector<16xf32>
    %4 = vector.multi_reduction <add>, %3, %cst [1] : vector<16x32xf32> to vector<16xf32>
    %5 = vector.shape_cast %4 : vector<16xf32> to vector<16x1xf32>
    %cst_2 = arith.constant 3.200000e+01 : f32
    %6 = vector.broadcast %cst_2 : f32 to vector<16x1xf32>
    %7 = arith.divf %5, %6 : vector<16x1xf32>
    %8 = vector.broadcast %7 : vector<16x1xf32> to vector<16x32xf32>
    %9 = arith.subf %3, %8 : vector<16x32xf32>
    %10 = arith.mulf %9, %9 : vector<16x32xf32>
    %cst_3 = arith.constant dense<0.000000e+00> : vector<16xf32>
    %11 = vector.multi_reduction <add>, %10, %cst_3 [1] : vector<16x32xf32> to vector<16xf32>
    %12 = vector.shape_cast %11 : vector<16xf32> to vector<16x1xf32>
    %cst_4 = arith.constant 3.200000e+01 : f32
    %13 = vector.broadcast %cst_4 : f32 to vector<16x1xf32>
    %14 = arith.divf %12, %13 : vector<16x1xf32>
    %cst_5 = arith.constant 9.99999974E-6 : f32
    %15 = vector.broadcast %cst_5 : f32 to vector<16x1xf32>
    %16 = arith.addf %14, %15 : vector<16x1xf32>
    %17 = math.rsqrt %16 : vector<16x1xf32>
    %18 = vector.broadcast %17 : vector<16x1xf32> to vector<16x32xf32>
    %19 = arith.mulf %9, %18 : vector<16x32xf32>
    %c0_6 = arith.constant 0 : index
    %c0_7 = arith.constant 0 : index
    %20 = vector.load %arg5[%c0_6, %c0_7] : memref<1x32xf32, #tpu.memory_space<vmem>>, vector<1x32xf32>
    %21 = vector.broadcast %20 : vector<1x32xf32> to vector<16x32xf32>
    %22 = arith.mulf %19, %21 : vector<16x32xf32>
    %c0_8 = arith.constant 0 : index
    %c0_9 = arith.constant 0 : index
    %23 = vector.load %arg6[%c0_8, %c0_9] : memref<1x32xf32, #tpu.memory_space<vmem>>, vector<1x32xf32>
    %24 = vector.broadcast %23 : vector<1x32xf32> to vector<16x32xf32>
    %25 = arith.addf %22, %24 : vector<16x32xf32>
    %26 = arith.truncf %25 : vector<16x32xf32> to vector<16x32xbf16>
    %c0_10 = arith.constant 0 : index
    %c0_11 = arith.constant 0 : index
    %27 = vector.load %arg8[%c0_10, %c0_11] : memref<16x128xf32, #tpu.memory_space<vmem>>, vector<16x128xf32>
    %c0_12 = arith.constant 0 : index
    %c0_13 = arith.constant 0 : index
    %28 = vector.load %arg3[%c0_12, %c0_13] : memref<32x128xbf16, #tpu.memory_space<vmem>>, vector<32x128xbf16>
    %cst_14 = arith.constant dense<0.000000e+00> : vector<16x128xf32>
    %29 = tpu.matmul %26, %28, %cst_14 {dimension_numbers = #tpu.dot_dimension_numbers<[1], [0], [0], [1], [0, 0, 1, 1], [], []>} : vector<16x32xbf16>, vector<32x128xbf16>, vector<16x128xf32> -> vector<16x128xf32>
    %30 = arith.addf %27, %29 : vector<16x128xf32>
    %c0_15 = arith.constant 0 : index
    %c0_16 = arith.constant 0 : index
    %31 = vector.load %arg8[%c0_15, %c0_16] : memref<16x128xf32, #tpu.memory_space<vmem>>, vector<16x128xf32>
    tpu.vector_store %arg8[%c0_15, %c0_16], %30 {strides = array<i32>} : memref<16x128xf32, #tpu.memory_space<vmem>>, vector<16x128xf32>,
    %c0_i32_17 = arith.constant 0 : i32
    %32 = arith.cmpi eq, %arg1, %c0_i32_17 : i32
    %33 = arith.extui %32 : i1 to i32
    %c0_i32_18 = arith.constant 0 : i32
    %34 = arith.cmpi ne, %33, %c0_i32_18 : i32
    scf.if %34 {
      %c0_19 = arith.constant 0 : index
      %c0_20 = arith.constant 0 : index
      %35 = vector.load %arg8[%c0_19, %c0_20] : memref<16x128xf32, #tpu.memory_space<vmem>>, vector<16x128xf32>
      %c0_21 = arith.constant 0 : index
      %c0_22 = arith.constant 0 : index
      %36 = vector.load %arg4[%c0_21, %c0_22] : memref<1x128xf32, #tpu.memory_space<vmem>>, vector<1x128xf32>
      %37 = vector.broadcast %36 : vector<1x128xf32> to vector<16x128xf32>
      %38 = arith.addf %35, %37 : vector<16x128xf32>
      %cst_23 = arith.constant 5.000000e-01 : f32
      %39 = vector.broadcast %cst_23 : f32 to vector<16x128xf32>
      %40 = arith.mulf %39, %38 : vector<16x128xf32>
      %cst_24 = arith.constant 0.707106769 : f32
      %41 = vector.broadcast %cst_24 : f32 to vector<16x128xf32>
      %42 = arith.mulf %38, %41 : vector<16x128xf32>
      %43 = math.absf %42 : vector<16x128xf32>
      %cst_25 = arith.constant 0.327591091 : f32
      %44 = vector.broadcast %cst_25 : f32 to vector<16x128xf32>
      %45 = arith.mulf %44, %43 : vector<16x128xf32>
      %cst_26 = arith.constant 1.000000e+00 : f32
      %46 = vector.broadcast %cst_26 : f32 to vector<16x128xf32>
      %47 = arith.addf %46, %45 : vector<16x128xf32>
      %cst_27 = arith.constant 1.000000e+00 : f32
      %48 = vector.broadcast %cst_27 : f32 to vector<16x128xf32>
      %49 = arith.divf %48, %47 : vector<16x128xf32>
      %cst_28 = arith.constant 1.06140542 : f32
      %50 = vector.broadcast %cst_28 : f32 to vector<16x128xf32>
      %51 = arith.mulf %50, %49 : vector<16x128xf32>
      %cst_29 = arith.constant -1.45315206 : f32
      %52 = vector.broadcast %cst_29 : f32 to vector<16x128xf32>
      %53 = arith.addf %51, %52 : vector<16x128xf32>
      %54 = arith.mulf %53, %49 : vector<16x128xf32>
      %cst_30 = arith.constant 1.42141378 : f32
      %55 = vector.broadcast %cst_30 : f32 to vector<16x128xf32>
      %56 = arith.addf %54, %55 : vector<16x128xf32>
      %57 = arith.mulf %56, %49 : vector<16x128xf32>
      %cst_31 = arith.constant -0.284496725 : f32
      %58 = vector.broadcast %cst_31 : f32 to vector<16x128xf32>
      %59 = arith.addf %57, %58 : vector<16x128xf32>
      %60 = arith.mulf %59, %49 : vector<16x128xf32>
      %cst_32 = arith.constant 0.254829586 : f32
      %61 = vector.broadcast %cst_32 : f32 to vector<16x128xf32>
      %62 = arith.addf %60, %61 : vector<16x128xf32>
      %63 = arith.mulf %62, %49 : vector<16x128xf32>
      %cst_33 = arith.constant 0.000000e+00 : f32
      %64 = vector.broadcast %cst_33 : f32 to vector<16x128xf32>
      %65 = arith.subf %64, %43 : vector<16x128xf32>
      %66 = arith.mulf %65, %43 : vector<16x128xf32>
      %67 = math.exp %66 : vector<16x128xf32>
      %68 = arith.mulf %63, %67 : vector<16x128xf32>
      %cst_34 = arith.constant 1.000000e+00 : f32
      %69 = vector.broadcast %cst_34 : f32 to vector<16x128xf32>
      %70 = arith.subf %69, %68 : vector<16x128xf32>
      %cst_35 = arith.constant 0.000000e+00 : f32
      %71 = vector.broadcast %cst_35 : f32 to vector<16x128xf32>
      %72 = arith.cmpf oge, %42, %71 : vector<16x128xf32>
      %cst_36 = arith.constant 0.000000e+00 : f32
      %73 = vector.broadcast %cst_36 : f32 to vector<16x128xf32>
      %74 = arith.subf %73, %70 : vector<16x128xf32>
      %75 = arith.select %72, %70, %74 : vector<16x128xi1>, vector<16x128xf32>
      %cst_37 = arith.constant 1.000000e+00 : f32
      %76 = vector.broadcast %cst_37 : f32 to vector<16x128xf32>
      %77 = arith.addf %76, %75 : vector<16x128xf32>
      %78 = arith.mulf %40, %77 : vector<16x128xf32>
      %c0_38 = arith.constant 0 : index
      %c0_39 = arith.constant 0 : index
      %79 = vector.load %arg7[%c0_38, %c0_39] : memref<16x128xf32, #tpu.memory_space<vmem>>, vector<16x128xf32>
      tpu.vector_store %arg7[%c0_38, %c0_39], %78 {strides = array<i32>} : memref<16x128xf32, #tpu.memory_space<vmem>>, vector<16x128xf32>,
    } else {
    }
    return
  }
  func.func @transform_0(%arg0: i32, %arg1: i32) -> (i32, i32) {
    %c0_i32 = arith.constant 0 : i32
    return %arg0, %arg1 : i32, i32
  }
  func.func @transform_1(%arg0: i32, %arg1: i32) -> (i32, i32) {
    %c0_i32 = arith.constant 0 : i32
    %c0_i32_0 = arith.constant 0 : i32
    return %arg1, %c0_i32 : i32, i32
  }
  func.func @transform_2(%arg0: i32, %arg1: i32) -> (i32, i32) {
    %c0_i32 = arith.constant 0 : i32
    %c0_i32_0 = arith.constant 0 : i32
    %c0_i32_1 = arith.constant 0 : i32
    return %c0_i32, %c0_i32_0 : i32, i32
  }
  func.func @transform_3(%arg0: i32, %arg1: i32) -> (i32, i32) {
    %c0_i32 = arith.constant 0 : i32
    %c0_i32_0 = arith.constant 0 : i32
    %c0_i32_1 = arith.constant 0 : i32
    return %c0_i32, %c0_i32_0 : i32, i32
  }
  func.func @transform_4(%arg0: i32, %arg1: i32) -> (i32, i32) {
    %c0_i32 = arith.constant 0 : i32
    %c0_i32_0 = arith.constant 0 : i32
    %c0_i32_1 = arith.constant 0 : i32
    return %c0_i32, %c0_i32_0 : i32, i32
  }
  func.func @transform_5(%arg0: i32, %arg1: i32) -> (i32, i32) {
    %c0_i32 = arith.constant 0 : i32
    %c0_i32_0 = arith.constant 0 : i32
    return %arg0, %c0_i32 : i32, i32
  }
}

module attributes {stable_mosaic.version = 11 : i64} {
  func.func @kernel(%arg0: i32, %arg1: i32, %arg2: memref<16x32xf32, #tpu.memory_space<vmem>>, %arg3: memref<32x128xbf16, #tpu.memory_space<vmem>>, %arg4: memref<1x128xf32, #tpu.memory_space<vmem>>, %arg5: memref<1x32xf32, #tpu.memory_space<vmem>>, %arg6: memref<1x32xf32, #tpu.memory_space<vmem>>, %arg7: memref<16x128xf32, #tpu.memory_space<vmem>>, %arg8: memref<16x128xf32, #tpu.memory_space<vmem>>) attributes {dimension_semantics = [#tpu.dimension_semantics<parallel>, #tpu.dimension_semantics<arbitrary>], iteration_bounds = array<i64: 1, 1>, scalar_prefetch = 0 : i64, scratch_operands = 1 : i64, tpu.core_type = #tpu.core_type<tc>, window_params = [{transform_indices = @transform_0, window_bounds = array<i64: 16, 32>}, {transform_indices = @transform_1, window_bounds = array<i64: 32, 128>}, {pipeline_mode = #tpu.pipeline_mode<synchronous>, transform_indices = @transform_2, window_bounds = array<i64: 1, 128>}, {pipeline_mode = #tpu.pipeline_mode<synchronous>, transform_indices = @transform_3, window_bounds = array<i64: 1, 32>}, {pipeline_mode = #tpu.pipeline_mode<synchronous>, transform_indices = @transform_4, window_bounds = array<i64: 1, 32>}, {transform_indices = @transform_5, window_bounds = array<i64: 16, 128>}]} {
    %c0_i32 = arith.constant 0 : i32
    %0 = arith.cmpi eq, %arg1, %c0_i32 : i32
    %1 = arith.extui %0 : i1 to i32
    %c0_i32_0 = arith.constant 0 : i32
    %2 = arith.cmpi ne, %1, %c0_i32_0 : i32
    scf.if %2 {
      %cst_19 = arith.constant 0.000000e+00 : f32
      %35 = vector.broadcast %cst_19 : f32 to vector<16x128xf32>
      %c0_20 = arith.constant 0 : index
      %c0_21 = arith.constant 0 : index
      %36 = vector.load %arg8[%c0_20, %c0_21] : memref<16x128xf32, #tpu.memory_space<vmem>>, vector<16x128xf32>
      tpu.vector_store %arg8[%c0_20, %c0_21], %35 {strides = array<i32>} : memref<16x128xf32, #tpu.memory_space<vmem>>, vector<16x128xf32>,
    } else {
    }
    %c0 = arith.constant 0 : index
    %c0_1 = arith.constant 0 : index
    %3 = vector.load %arg2[%c0, %c0_1] : memref<16x32xf32, #tpu.memory_space<vmem>>, vector<16x32xf32>
    %cst = arith.constant dense<0.000000e+00> : vector<16xf32>
    %4 = vector.multi_reduction <add>, %3, %cst [1] : vector<16x32xf32> to vector<16xf32>
    %5 = vector.shape_cast %4 : vector<16xf32> to vector<16x1xf32>
    %cst_2 = arith.constant 3.200000e+01 : f32
    %6 = vector.broadcast %cst_2 : f32 to vector<16x1xf32>
    %7 = arith.divf %5, %6 : vector<16x1xf32>
    %8 = vector.broadcast %7 : vector<16x1xf32> to vector<16x32xf32>
    %9 = arith.subf %3, %8 : vector<16x32xf32>
    %10 = arith.mulf %9, %9 : vector<16x32xf32>
    %cst_3 = arith.constant dense<0.000000e+00> : vector<16xf32>
    %11 = vector.multi_reduction <add>, %10, %cst_3 [1] : vector<16x32xf32> to vector<16xf32>
    %12 = vector.shape_cast %11 : vector<16xf32> to vector<16x1xf32>
    %cst_4 = arith.constant 3.200000e+01 : f32
    %13 = vector.broadcast %cst_4 : f32 to vector<16x1xf32>
    %14 = arith.divf %12, %13 : vector<16x1xf32>
    %cst_5 = arith.constant 9.99999974E-6 : f32
    %15 = vector.broadcast %cst_5 : f32 to vector<16x1xf32>
    %16 = arith.addf %14, %15 : vector<16x1xf32>
    %17 = math.rsqrt %16 : vector<16x1xf32>
    %18 = vector.broadcast %17 : vector<16x1xf32> to vector<16x32xf32>
    %19 = arith.mulf %9, %18 : vector<16x32xf32>
    %c0_6 = arith.constant 0 : index
    %c0_7 = arith.constant 0 : index
    %20 = vector.load %arg5[%c0_6, %c0_7] : memref<1x32xf32, #tpu.memory_space<vmem>>, vector<1x32xf32>
    %21 = vector.broadcast %20 : vector<1x32xf32> to vector<16x32xf32>
    %22 = arith.mulf %19, %21 : vector<16x32xf32>
    %c0_8 = arith.constant 0 : index
    %c0_9 = arith.constant 0 : index
    %23 = vector.load %arg6[%c0_8, %c0_9] : memref<1x32xf32, #tpu.memory_space<vmem>>, vector<1x32xf32>
    %24 = vector.broadcast %23 : vector<1x32xf32> to vector<16x32xf32>
    %25 = arith.addf %22, %24 : vector<16x32xf32>
    %26 = arith.truncf %25 : vector<16x32xf32> to vector<16x32xbf16>
    %c0_10 = arith.constant 0 : index
    %c0_11 = arith.constant 0 : index
    %27 = vector.load %arg8[%c0_10, %c0_11] : memref<16x128xf32, #tpu.memory_space<vmem>>, vector<16x128xf32>
    %c0_12 = arith.constant 0 : index
    %c0_13 = arith.constant 0 : index
    %28 = vector.load %arg3[%c0_12, %c0_13] : memref<32x128xbf16, #tpu.memory_space<vmem>>, vector<32x128xbf16>
    %cst_14 = arith.constant dense<0.000000e+00> : vector<16x128xf32>
    %29 = tpu.matmul %26, %28, %cst_14 {dimension_numbers = #tpu.dot_dimension_numbers<[1], [0], [0], [1], [0, 0, 1, 1], [], []>} : vector<16x32xbf16>, vector<32x128xbf16>, vector<16x128xf32> -> vector<16x128xf32>
    %30 = arith.addf %27, %29 : vector<16x128xf32>
    %c0_15 = arith.constant 0 : index
    %c0_16 = arith.constant 0 : index
    %31 = vector.load %arg8[%c0_15, %c0_16] : memref<16x128xf32, #tpu.memory_space<vmem>>, vector<16x128xf32>
    tpu.vector_store %arg8[%c0_15, %c0_16], %30 {strides = array<i32>} : memref<16x128xf32, #tpu.memory_space<vmem>>, vector<16x128xf32>,
    %c0_i32_17 = arith.constant 0 : i32
    %32 = arith.cmpi eq, %arg1, %c0_i32_17 : i32
    %33 = arith.extui %32 : i1 to i32
    %c0_i32_18 = arith.constant 0 : i32
    %34 = arith.cmpi ne, %33, %c0_i32_18 : i32
    scf.if %34 {
      %c0_19 = arith.constant 0 : index
      %c0_20 = arith.constant 0 : index
      %35 = vector.load %arg8[%c0_19, %c0_20] : memref<16x128xf32, #tpu.memory_space<vmem>>, vector<16x128xf32>
      %c0_21 = arith.constant 0 : index
      %c0_22 = arith.constant 0 : index
      %36 = vector.load %arg4[%c0_21, %c0_22] : memref<1x128xf32, #tpu.memory_space<vmem>>, vector<1x128xf32>
      %37 = vector.broadcast %36 : vector<1x128xf32> to vector<16x128xf32>
      %38 = arith.addf %35, %37 : vector<16x128xf32>
      %c0_23 = arith.constant 0 : index
      %c0_24 = arith.constant 0 : index
      %39 = vector.load %arg7[%c0_23, %c0_24] : memref<16x128xf32, #tpu.memory_space<vmem>>, vector<16x128xf32>
      tpu.vector_store %arg7[%c0_23, %c0_24], %38 {strides = array<i32>} : memref<16x128xf32, #tpu.memory_space<vmem>>, vector<16x128xf32>,
    } else {
    }
    return
  }
  func.func @transform_0(%arg0: i32, %arg1: i32) -> (i32, i32) {
    %c0_i32 = arith.constant 0 : i32
    return %arg0, %arg1 : i32, i32
  }
  func.func @transform_1(%arg0: i32, %arg1: i32) -> (i32, i32) {
    %c0_i32 = arith.constant 0 : i32
    %c0_i32_0 = arith.constant 0 : i32
    return %arg1, %c0_i32 : i32, i32
  }
  func.func @transform_2(%arg0: i32, %arg1: i32) -> (i32, i32) {
    %c0_i32 = arith.constant 0 : i32
    %c0_i32_0 = arith.constant 0 : i32
    %c0_i32_1 = arith.constant 0 : i32
    return %c0_i32, %c0_i32_0 : i32, i32
  }
  func.func @transform_3(%arg0: i32, %arg1: i32) -> (i32, i32) {
    %c0_i32 = arith.constant 0 : i32
    %c0_i32_0 = arith.constant 0 : i32
    %c0_i32_1 = arith.constant 0 : i32
    return %c0_i32, %c0_i32_0 : i32, i32
  }
  func.func @transform_4(%arg0: i32, %arg1: i32) -> (i32, i32) {
    %c0_i32 = arith.constant 0 : i32
    %c0_i32_0 = arith.constant 0 : i32
    %c0_i32_1 = arith.constant 0 : i32
    return %c0_i32, %c0_i32_0 : i32, i32
  }
  func.func @transform_5(%arg0: i32, %arg1: i32) -> (i32, i32) {
    %c0_i32 = arith.constant 0 : i32
    %c0_i32_0 = arith.constant 0 : i32
    return %arg0, %c0_i32 : i32, i32
  }
}

module attributes {stable_mosaic.version = 11 : i64} {
  func.func @_layernorm_kernel(%arg0: i32, %arg1: memref<16x32xf32, #tpu.memory_space<vmem>>, %arg2: memref<1x32xf32, #tpu.memory_space<vmem>>, %arg3: memref<1x32xf32, #tpu.memory_space<vmem>>, %arg4: memref<16x32xf32, #tpu.memory_space<vmem>>) attributes {dimension_semantics = [#tpu.dimension_semantics<parallel>], iteration_bounds = array<i64: 1>, scalar_prefetch = 0 : i64, scratch_operands = 0 : i64, tpu.core_type = #tpu.core_type<tc>, window_params = [{transform_indices = @transform_0, window_bounds = array<i64: 16, 32>}, {pipeline_mode = #tpu.pipeline_mode<synchronous>, transform_indices = @transform_1, window_bounds = array<i64: 1, 32>}, {pipeline_mode = #tpu.pipeline_mode<synchronous>, transform_indices = @transform_2, window_bounds = array<i64: 1, 32>}, {transform_indices = @transform_3, window_bounds = array<i64: 16, 32>}]} {
    %c0 = arith.constant 0 : index
    %c0_0 = arith.constant 0 : index
    %0 = vector.load %arg1[%c0, %c0_0] : memref<16x32xf32, #tpu.memory_space<vmem>>, vector<16x32xf32>
    %cst = arith.constant dense<0.000000e+00> : vector<16xf32>
    %1 = vector.multi_reduction <add>, %0, %cst [1] : vector<16x32xf32> to vector<16xf32>
    %2 = vector.shape_cast %1 : vector<16xf32> to vector<16x1xf32>
    %cst_1 = arith.constant 3.200000e+01 : f32
    %3 = vector.broadcast %cst_1 : f32 to vector<16x1xf32>
    %4 = arith.divf %2, %3 : vector<16x1xf32>
    %5 = vector.broadcast %4 : vector<16x1xf32> to vector<16x32xf32>
    %6 = arith.subf %0, %5 : vector<16x32xf32>
    %7 = arith.mulf %6, %6 : vector<16x32xf32>
    %cst_2 = arith.constant dense<0.000000e+00> : vector<16xf32>
    %8 = vector.multi_reduction <add>, %7, %cst_2 [1] : vector<16x32xf32> to vector<16xf32>
    %9 = vector.shape_cast %8 : vector<16xf32> to vector<16x1xf32>
    %cst_3 = arith.constant 3.200000e+01 : f32
    %10 = vector.broadcast %cst_3 : f32 to vector<16x1xf32>
    %11 = arith.divf %9, %10 : vector<16x1xf32>
    %cst_4 = arith.constant 9.99999974E-6 : f32
    %12 = vector.broadcast %cst_4 : f32 to vector<16x1xf32>
    %13 = arith.addf %11, %12 : vector<16x1xf32>
    %14 = math.rsqrt %13 : vector<16x1xf32>
    %15 = vector.broadcast %14 : vector<16x1xf32> to vector<16x32xf32>
    %16 = arith.mulf %6, %15 : vector<16x32xf32>
    %c0_5 = arith.constant 0 : index
    %c0_6 = arith.constant 0 : index
    %17 = vector.load %arg2[%c0_5, %c0_6] : memref<1x32xf32, #tpu.memory_space<vmem>>, vector<1x32xf32>
    %18 = vector.broadcast %17 : vector<1x32xf32> to vector<16x32xf32>
    %19 = arith.mulf %16, %18 : vector<16x32xf32>
    %c0_7 = arith.constant 0 : index
    %c0_8 = arith.constant 0 : index
    %20 = vector.load %arg3[%c0_7, %c0_8] : memref<1x32xf32, #tpu.memory_space<vmem>>, vector<1x32xf32>
    %21 = vector.broadcast %20 : vector<1x32xf32> to vector<16x32xf32>
    %22 = arith.addf %19, %21 : vector<16x32xf32>
    %c0_9 = arith.constant 0 : index
    %c0_10 = arith.constant 0 : index
    %23 = vector.load %arg4[%c0_9, %c0_10] : memref<16x32xf32, #tpu.memory_space<vmem>>, vector<16x32xf32>
    tpu.vector_store %arg4[%c0_9, %c0_10], %22 {strides = array<i32>} : memref<16x32xf32, #tpu.memory_space<vmem>>, vector<16x32xf32>,
    return
  }
  func.func @transform_0(%arg0: i32) -> (i32, i32) {
    %c0_i32 = arith.constant 0 : i32
    %c0_i32_0 = arith.constant 0 : i32
    return %arg0, %c0_i32 : i32, i32
  }
  func.func @transform_1(%arg0: i32) -> (i32, i32) {
    %c0_i32 = arith.constant 0 : i32
    %c0_i32_0 = arith.constant 0 : i32
    %c0_i32_1 = arith.constant 0 : i32
    return %c0_i32, %c0_i32_0 : i32, i32
  }
  func.func @transform_2(%arg0: i32) -> (i32, i32) {
    %c0_i32 = arith.constant 0 : i32
    %c0_i32_0 = arith.constant 0 : i32
    %c0_i32_1 = arith.constant 0 : i32
    return %c0_i32, %c0_i32_0 : i32, i32
  }
  func.func @transform_3(%arg0: i32) -> (i32, i32) {
    %c0_i32 = arith.constant 0 : i32
    %c0_i32_0 = arith.constant 0 : i32
    return %arg0, %c0_i32 : i32, i32
  }
}

module attributes {stable_mosaic.version = 11 : i64} {
  func.func @kernel(%arg0: i32, %arg1: i32, %arg2: memref<16x512xf32, #tpu.memory_space<vmem>>, %arg3: memref<512x128xbf16, #tpu.memory_space<vmem>>, %arg4: memref<1x128xf32, #tpu.memory_space<vmem>>, %arg5: memref<1x128xf32, #tpu.memory_space<vmem>>, %arg6: memref<16x128xf32, #tpu.memory_space<vmem>>, %arg7: memref<16x128xf32, #tpu.memory_space<vmem>>) attributes {dimension_semantics = [#tpu.dimension_semantics<parallel>, #tpu.dimension_semantics<arbitrary>], iteration_bounds = array<i64: 1, 4>, scalar_prefetch = 0 : i64, scratch_operands = 1 : i64, tpu.core_type = #tpu.core_type<tc>, window_params = [{transform_indices = @transform_0, window_bounds = array<i64: 16, 512>}, {transform_indices = @transform_1, window_bounds = array<i64: 512, 128>}, {pipeline_mode = #tpu.pipeline_mode<synchronous>, transform_indices = @transform_2, window_bounds = array<i64: 1, 128>}, {pipeline_mode = #tpu.pipeline_mode<synchronous>, transform_indices = @transform_3, window_bounds = array<i64: 1, 128>}, {transform_indices = @transform_4, window_bounds = array<i64: 16, 128>}]} {
    %c0_i32 = arith.constant 0 : i32
    %0 = arith.cmpi eq, %arg1, %c0_i32 : i32
    %1 = arith.extui %0 : i1 to i32
    %c0_i32_0 = arith.constant 0 : i32
    %2 = arith.cmpi ne, %1, %c0_i32_0 : i32
    scf.if %2 {
      %cst_9 = arith.constant 0.000000e+00 : f32
      %13 = vector.broadcast %cst_9 : f32 to vector<16x128xf32>
      %c0_10 = arith.constant 0 : index
      %c0_11 = arith.constant 0 : index
      %14 = vector.load %arg7[%c0_10, %c0_11] : memref<16x128xf32, #tpu.memory_space<vmem>>, vector<16x128xf32>
      tpu.vector_store %arg7[%c0_10, %c0_11], %13 {strides = array<i32>} : memref<16x128xf32, #tpu.memory_space<vmem>>, vector<16x128xf32>,
    } else {
    }
    %c0 = arith.constant 0 : index
    %c0_1 = arith.constant 0 : index
    %3 = vector.load %arg2[%c0, %c0_1] : memref<16x512xf32, #tpu.memory_space<vmem>>, vector<16x512xf32>
    %4 = arith.truncf %3 : vector<16x512xf32> to vector<16x512xbf16>
    %c0_2 = arith.constant 0 : index
    %c0_3 = arith.constant 0 : index
    %5 = vector.load %arg7[%c0_2, %c0_3] : memref<16x128xf32, #tpu.memory_space<vmem>>, vector<16x128xf32>
    %c0_4 = arith.constant 0 : index
    %c0_5 = arith.constant 0 : index
    %6 = vector.load %arg3[%c0_4, %c0_5] : memref<512x128xbf16, #tpu.memory_space<vmem>>, vector<512x128xbf16>
    %cst = arith.constant dense<0.000000e+00> : vector<16x128xf32>
    %7 = tpu.matmul %4, %6, %cst {dimension_numbers = #tpu.dot_dimension_numbers<[1], [0], [0], [1], [0, 0, 1, 1], [], []>} : vector<16x512xbf16>, vector<512x128xbf16>, vector<16x128xf32> -> vector<16x128xf32>
    %8 = arith.addf %5, %7 : vector<16x128xf32>
    %c0_6 = arith.constant 0 : index
    %c0_7 = arith.constant 0 : index
    %9 = vector.load %arg7[%c0_6, %c0_7] : memref<16x128xf32, #tpu.memory_space<vmem>>, vector<16x128xf32>
    tpu.vector_store %arg7[%c0_6, %c0_7], %8 {strides = array<i32>} : memref<16x128xf32, #tpu.memory_space<vmem>>, vector<16x128xf32>,
    %c3_i32 = arith.constant 3 : i32
    %10 = arith.cmpi eq, %arg1, %c3_i32 : i32
    %11 = arith.extui %10 : i1 to i32
    %c0_i32_8 = arith.constant 0 : i32
    %12 = arith.cmpi ne, %11, %c0_i32_8 : i32
    scf.if %12 {
      %c0_9 = arith.constant 0 : index
      %c0_10 = arith.constant 0 : index
      %13 = vector.load %arg7[%c0_9, %c0_10] : memref<16x128xf32, #tpu.memory_space<vmem>>, vector<16x128xf32>
      %c0_11 = arith.constant 0 : index
      %c0_12 = arith.constant 0 : index
      %14 = vector.load %arg4[%c0_11, %c0_12] : memref<1x128xf32, #tpu.memory_space<vmem>>, vector<1x128xf32>
      %15 = vector.broadcast %14 : vector<1x128xf32> to vector<16x128xf32>
      %16 = arith.mulf %13, %15 : vector<16x128xf32>
      %c0_13 = arith.constant 0 : index
      %c0_14 = arith.constant 0 : index
      %17 = vector.load %arg5[%c0_13, %c0_14] : memref<1x128xf32, #tpu.memory_space<vmem>>, vector<1x128xf32>
      %18 = vector.broadcast %17 : vector<1x128xf32> to vector<16x128xf32>
      %19 = arith.addf %16, %18 : vector<16x128xf32>
      %cst_15 = arith.constant 0.000000e+00 : f32
      %20 = vector.broadcast %cst_15 : f32 to vector<16x128xf32>
      %21 = arith.maximumf %19, %20 : vector<16x128xf32>
      %c0_16 = arith.constant 0 : index
      %c0_17 = arith.constant 0 : index
      %22 = vector.load %arg6[%c0_16, %c0_17] : memref<16x128xf32, #tpu.memory_space<vmem>>, vector<16x128xf32>
      tpu.vector_store %arg6[%c0_16, %c0_17], %21 {strides = array<i32>} : memref<16x128xf32, #tpu.memory_space<vmem>>, vector<16x128xf32>,
    } else {
    }
    return
  }
  func.func @transform_0(%arg0: i32, %arg1: i32) -> (i32, i32) {
    %c0_i32 = arith.constant 0 : i32
    return %arg0, %arg1 : i32, i32
  }
  func.func @transform_1(%arg0: i32, %arg1: i32) -> (i32, i32) {
    %c0_i32 = arith.constant 0 : i32
    %c0_i32_0 = arith.constant 0 : i32
    return %arg1, %c0_i32 : i32, i32
  }
  func.func @transform_2(%arg0: i32, %arg1: i32) -> (i32, i32) {
    %c0_i32 = arith.constant 0 : i32
    %c0_i32_0 = arith.constant 0 : i32
    %c0_i32_1 = arith.constant 0 : i32
    return %c0_i32, %c0_i32_0 : i32, i32
  }
  func.func @transform_3(%arg0: i32, %arg1: i32) -> (i32, i32) {
    %c0_i32 = arith.constant 0 : i32
    %c0_i32_0 = arith.constant 0 : i32
    %c0_i32_1 = arith.constant 0 : i32
    return %c0_i32, %c0_i32_0 : i32, i32
  }
  func.func @transform_4(%arg0: i32, %arg1: i32) -> (i32, i32) {
    %c0_i32 = arith.constant 0 : i32
    %c0_i32_0 = arith.constant 0 : i32
    return %arg0, %c0_i32 : i32, i32
  }
}

module attributes {stable_mosaic.version = 11 : i64} {
  func.func @kernel(%arg0: i32, %arg1: i32, %arg2: memref<16x512xf32, #tpu.memory_space<vmem>>, %arg3: memref<512x128xbf16, #tpu.memory_space<vmem>>, %arg4: memref<1x128xf32, #tpu.memory_space<vmem>>, %arg5: memref<1x128xf32, #tpu.memory_space<vmem>>, %arg6: memref<16x128xf32, #tpu.memory_space<vmem>>, %arg7: memref<16x128xf32, #tpu.memory_space<vmem>>) attributes {dimension_semantics = [#tpu.dimension_semantics<parallel>, #tpu.dimension_semantics<arbitrary>], iteration_bounds = array<i64: 1, 2>, scalar_prefetch = 0 : i64, scratch_operands = 1 : i64, tpu.core_type = #tpu.core_type<tc>, window_params = [{transform_indices = @transform_0, window_bounds = array<i64: 16, 512>}, {transform_indices = @transform_1, window_bounds = array<i64: 512, 128>}, {pipeline_mode = #tpu.pipeline_mode<synchronous>, transform_indices = @transform_2, window_bounds = array<i64: 1, 128>}, {pipeline_mode = #tpu.pipeline_mode<synchronous>, transform_indices = @transform_3, window_bounds = array<i64: 1, 128>}, {transform_indices = @transform_4, window_bounds = array<i64: 16, 128>}]} {
    %c0_i32 = arith.constant 0 : i32
    %0 = arith.cmpi eq, %arg1, %c0_i32 : i32
    %1 = arith.extui %0 : i1 to i32
    %c0_i32_0 = arith.constant 0 : i32
    %2 = arith.cmpi ne, %1, %c0_i32_0 : i32
    scf.if %2 {
      %cst_9 = arith.constant 0.000000e+00 : f32
      %13 = vector.broadcast %cst_9 : f32 to vector<16x128xf32>
      %c0_10 = arith.constant 0 : index
      %c0_11 = arith.constant 0 : index
      %14 = vector.load %arg7[%c0_10, %c0_11] : memref<16x128xf32, #tpu.memory_space<vmem>>, vector<16x128xf32>
      tpu.vector_store %arg7[%c0_10, %c0_11], %13 {strides = array<i32>} : memref<16x128xf32, #tpu.memory_space<vmem>>, vector<16x128xf32>,
    } else {
    }
    %c0 = arith.constant 0 : index
    %c0_1 = arith.constant 0 : index
    %3 = vector.load %arg2[%c0, %c0_1] : memref<16x512xf32, #tpu.memory_space<vmem>>, vector<16x512xf32>
    %4 = arith.truncf %3 : vector<16x512xf32> to vector<16x512xbf16>
    %c0_2 = arith.constant 0 : index
    %c0_3 = arith.constant 0 : index
    %5 = vector.load %arg7[%c0_2, %c0_3] : memref<16x128xf32, #tpu.memory_space<vmem>>, vector<16x128xf32>
    %c0_4 = arith.constant 0 : index
    %c0_5 = arith.constant 0 : index
    %6 = vector.load %arg3[%c0_4, %c0_5] : memref<512x128xbf16, #tpu.memory_space<vmem>>, vector<512x128xbf16>
    %cst = arith.constant dense<0.000000e+00> : vector<16x128xf32>
    %7 = tpu.matmul %4, %6, %cst {dimension_numbers = #tpu.dot_dimension_numbers<[1], [0], [0], [1], [0, 0, 1, 1], [], []>} : vector<16x512xbf16>, vector<512x128xbf16>, vector<16x128xf32> -> vector<16x128xf32>
    %8 = arith.addf %5, %7 : vector<16x128xf32>
    %c0_6 = arith.constant 0 : index
    %c0_7 = arith.constant 0 : index
    %9 = vector.load %arg7[%c0_6, %c0_7] : memref<16x128xf32, #tpu.memory_space<vmem>>, vector<16x128xf32>
    tpu.vector_store %arg7[%c0_6, %c0_7], %8 {strides = array<i32>} : memref<16x128xf32, #tpu.memory_space<vmem>>, vector<16x128xf32>,
    %c1_i32 = arith.constant 1 : i32
    %10 = arith.cmpi eq, %arg1, %c1_i32 : i32
    %11 = arith.extui %10 : i1 to i32
    %c0_i32_8 = arith.constant 0 : i32
    %12 = arith.cmpi ne, %11, %c0_i32_8 : i32
    scf.if %12 {
      %c0_9 = arith.constant 0 : index
      %c0_10 = arith.constant 0 : index
      %13 = vector.load %arg7[%c0_9, %c0_10] : memref<16x128xf32, #tpu.memory_space<vmem>>, vector<16x128xf32>
      %c0_11 = arith.constant 0 : index
      %c0_12 = arith.constant 0 : index
      %14 = vector.load %arg4[%c0_11, %c0_12] : memref<1x128xf32, #tpu.memory_space<vmem>>, vector<1x128xf32>
      %15 = vector.broadcast %14 : vector<1x128xf32> to vector<16x128xf32>
      %16 = arith.mulf %13, %15 : vector<16x128xf32>
      %c0_13 = arith.constant 0 : index
      %c0_14 = arith.constant 0 : index
      %17 = vector.load %arg5[%c0_13, %c0_14] : memref<1x128xf32, #tpu.memory_space<vmem>>, vector<1x128xf32>
      %18 = vector.broadcast %17 : vector<1x128xf32> to vector<16x128xf32>
      %19 = arith.addf %16, %18 : vector<16x128xf32>
      %cst_15 = arith.constant 0.000000e+00 : f32
      %20 = vector.broadcast %cst_15 : f32 to vector<16x128xf32>
      %21 = arith.maximumf %19, %20 : vector<16x128xf32>
      %c0_16 = arith.constant 0 : index
      %c0_17 = arith.constant 0 : index
      %22 = vector.load %arg6[%c0_16, %c0_17] : memref<16x128xf32, #tpu.memory_space<vmem>>, vector<16x128xf32>
      tpu.vector_store %arg6[%c0_16, %c0_17], %21 {strides = array<i32>} : memref<16x128xf32, #tpu.memory_space<vmem>>, vector<16x128xf32>,
    } else {
    }
    return
  }
  func.func @transform_0(%arg0: i32, %arg1: i32) -> (i32, i32) {
    %c0_i32 = arith.constant 0 : i32
    return %arg0, %arg1 : i32, i32
  }
  func.func @transform_1(%arg0: i32, %arg1: i32) -> (i32, i32) {
    %c0_i32 = arith.constant 0 : i32
    %c0_i32_0 = arith.constant 0 : i32
    return %arg1, %c0_i32 : i32, i32
  }
  func.func @transform_2(%arg0: i32, %arg1: i32) -> (i32, i32) {
    %c0_i32 = arith.constant 0 : i32
    %c0_i32_0 = arith.constant 0 : i32
    %c0_i32_1 = arith.constant 0 : i32
    return %c0_i32, %c0_i32_0 : i32, i32
  }
  func.func @transform_3(%arg0: i32, %arg1: i32) -> (i32, i32) {
    %c0_i32 = arith.constant 0 : i32
    %c0_i32_0 = arith.constant 0 : i32
    %c0_i32_1 = arith.constant 0 : i32
    return %c0_i32, %c0_i32_0 : i32, i32
  }
  func.func @transform_4(%arg0: i32, %arg1: i32) -> (i32, i32) {
    %c0_i32 = arith.constant 0 : i32
    %c0_i32_0 = arith.constant 0 : i32
    return %arg0, %c0_i32 : i32, i32
  }
}

module attributes {stable_mosaic.version = 11 : i64} {
  func.func @kernel(%arg0: i32, %arg1: i32, %arg2: memref<512x32xf32, #tpu.memory_space<vmem>>, %arg3: memref<32x128xbf16, #tpu.memory_space<vmem>>, %arg4: memref<1x128xf32, #tpu.memory_space<vmem>>, %arg5: memref<512x128xf32, #tpu.memory_space<vmem>>, %arg6: memref<512x128xf32, #tpu.memory_space<vmem>>) attributes {dimension_semantics = [#tpu.dimension_semantics<parallel>, #tpu.dimension_semantics<arbitrary>], iteration_bounds = array<i64: 16, 1>, scalar_prefetch = 0 : i64, scratch_operands = 1 : i64, tpu.core_type = #tpu.core_type<tc>, window_params = [{transform_indices = @transform_0, window_bounds = array<i64: 512, 32>}, {transform_indices = @transform_1, window_bounds = array<i64: 32, 128>}, {pipeline_mode = #tpu.pipeline_mode<synchronous>, transform_indices = @transform_2, window_bounds = array<i64: 1, 128>}, {transform_indices = @transform_3, window_bounds = array<i64: 512, 128>}]} {
    %c0_i32 = arith.constant 0 : i32
    %0 = arith.cmpi eq, %arg1, %c0_i32 : i32
    %1 = arith.extui %0 : i1 to i32
    %c0_i32_0 = arith.constant 0 : i32
    %2 = arith.cmpi ne, %1, %c0_i32_0 : i32
    scf.if %2 {
      %cst_10 = arith.constant 0.000000e+00 : f32
      %13 = vector.broadcast %cst_10 : f32 to vector<512x128xf32>
      %c0_11 = arith.constant 0 : index
      %c0_12 = arith.constant 0 : index
      %14 = vector.load %arg6[%c0_11, %c0_12] : memref<512x128xf32, #tpu.memory_space<vmem>>, vector<512x128xf32>
      tpu.vector_store %arg6[%c0_11, %c0_12], %13 {strides = array<i32>} : memref<512x128xf32, #tpu.memory_space<vmem>>, vector<512x128xf32>,
    } else {
    }
    %c0 = arith.constant 0 : index
    %c0_1 = arith.constant 0 : index
    %3 = vector.load %arg2[%c0, %c0_1] : memref<512x32xf32, #tpu.memory_space<vmem>>, vector<512x32xf32>
    %4 = arith.truncf %3 : vector<512x32xf32> to vector<512x32xbf16>
    %c0_2 = arith.constant 0 : index
    %c0_3 = arith.constant 0 : index
    %5 = vector.load %arg6[%c0_2, %c0_3] : memref<512x128xf32, #tpu.memory_space<vmem>>, vector<512x128xf32>
    %c0_4 = arith.constant 0 : index
    %c0_5 = arith.constant 0 : index
    %6 = vector.load %arg3[%c0_4, %c0_5] : memref<32x128xbf16, #tpu.memory_space<vmem>>, vector<32x128xbf16>
    %cst = arith.constant dense<0.000000e+00> : vector<512x128xf32>
    %7 = tpu.matmul %4, %6, %cst {dimension_numbers = #tpu.dot_dimension_numbers<[1], [0], [0], [1], [0, 0, 1, 1], [], []>} : vector<512x32xbf16>, vector<32x128xbf16>, vector<512x128xf32> -> vector<512x128xf32>
    %8 = arith.addf %5, %7 : vector<512x128xf32>
    %c0_6 = arith.constant 0 : index
    %c0_7 = arith.constant 0 : index
    %9 = vector.load %arg6[%c0_6, %c0_7] : memref<512x128xf32, #tpu.memory_space<vmem>>, vector<512x128xf32>
    tpu.vector_store %arg6[%c0_6, %c0_7], %8 {strides = array<i32>} : memref<512x128xf32, #tpu.memory_space<vmem>>, vector<512x128xf32>,
    %c0_i32_8 = arith.constant 0 : i32
    %10 = arith.cmpi eq, %arg1, %c0_i32_8 : i32
    %11 = arith.extui %10 : i1 to i32
    %c0_i32_9 = arith.constant 0 : i32
    %12 = arith.cmpi ne, %11, %c0_i32_9 : i32
    scf.if %12 {
      %c0_10 = arith.constant 0 : index
      %c0_11 = arith.constant 0 : index
      %13 = vector.load %arg6[%c0_10, %c0_11] : memref<512x128xf32, #tpu.memory_space<vmem>>, vector<512x128xf32>
      %c0_12 = arith.constant 0 : index
      %c0_13 = arith.constant 0 : index
      %14 = vector.load %arg4[%c0_12, %c0_13] : memref<1x128xf32, #tpu.memory_space<vmem>>, vector<1x128xf32>
      %15 = vector.broadcast %14 : vector<1x128xf32> to vector<512x128xf32>
      %16 = arith.addf %13, %15 : vector<512x128xf32>
      %c0_14 = arith.constant 0 : index
      %c0_15 = arith.constant 0 : index
      %17 = vector.load %arg5[%c0_14, %c0_15] : memref<512x128xf32, #tpu.memory_space<vmem>>, vector<512x128xf32>
      tpu.vector_store %arg5[%c0_14, %c0_15], %16 {strides = array<i32>} : memref<512x128xf32, #tpu.memory_space<vmem>>, vector<512x128xf32>,
    } else {
    }
    return
  }
  func.func @transform_0(%arg0: i32, %arg1: i32) -> (i32, i32) {
    %c0_i32 = arith.constant 0 : i32
    return %arg0, %arg1 : i32, i32
  }
  func.func @transform_1(%arg0: i32, %arg1: i32) -> (i32, i32) {
    %c0_i32 = arith.constant 0 : i32
    %c0_i32_0 = arith.constant 0 : i32
    return %arg1, %c0_i32 : i32, i32
  }
  func.func @transform_2(%arg0: i32, %arg1: i32) -> (i32, i32) {
    %c0_i32 = arith.constant 0 : i32
    %c0_i32_0 = arith.constant 0 : i32
    %c0_i32_1 = arith.constant 0 : i32
    return %c0_i32, %c0_i32_0 : i32, i32
  }
  func.func @transform_3(%arg0: i32, %arg1: i32) -> (i32, i32) {
    %c0_i32 = arith.constant 0 : i32
    %c0_i32_0 = arith.constant 0 : i32
    return %arg0, %c0_i32 : i32, i32
  }
}

</mosaic_0001>

<bundles_post_ra>
// kernel: vit3d_unetr_forward.22
= control target key start
LH: loop header
LB: loop body
LE: loop exit
PB: predicated region body
PF: predicated region fallthrough
CT: control target
= control target key end

     0   :  { %s655_s1 = inlined_call_operand.vmem [shape: bf16[512,128], index: 1, kind: input, shape index: {}]   ;;  %s656_s0 = inlined_call_operand.vmem [shape: f32[16,512], index: 0, kind: input, shape index: {}]   ;;  %s657_s2 = inlined_call_operand.vmem [shape: f32[1,128], index: 2, kind: input, shape index: {}]   ;;  %s658_s3 = inlined_call_operand.vmem [shape: f32[16,128], index: 3, kind: output, shape index: {}]  }
   0x1   :  { %v474_v0 = vld [vmem:[%s655_s1 + $0x78] sm:$0xff]   ;;  %v478_v4 = vld [vmem:[%s655_s1 + $0x70] sm:$0xff]   ;;  %v482_v8 = vld [vmem:[%s655_s1 + $0x68] sm:$0xff]  }
   0x2   :  { %v475_v1 = vld [vmem:[%s655_s1 + $0xf8] sm:$0xff]   ;;  %430 = vmatprep.subr.bf16.mxu0 %v474_v0  ;;  %v479_v5 = vld [vmem:[%s655_s1 + $0xf0] sm:$0xff]   ;;  %v483_v9 = vld [vmem:[%s655_s1 + $0xe8] sm:$0xff]  }
   0x3   :  { %v476_v2 = vld [vmem:[%s655_s1 + $0x38] sm:$0xff]   ;;  %452 = vmatprep.subr.bf16.mxu1 %v475_v1  ;;  %v480_v6 = vld [vmem:[%s655_s1 + $0x30] sm:$0xff]   ;;  %v484_v10 = vld [vmem:[%s655_s1 + $0x28] sm:$0xff]  }
   0x4   :  { %v477_v3 = vld [vmem:[%s655_s1 + $0xb8] sm:$0xff]   ;;  %431 = vmatpush3.bf16.msra.mxu0 %v476_v2  ;;  %v481_v7 = vld [vmem:[%s655_s1 + $0xb0] sm:$0xff]   ;;  %v485_v11 = vld [vmem:[%s655_s1 + $0xa8] sm:$0xff]  }
   0x5   :  { %453 = vmatpush3.bf16.msra.mxu1 %v477_v3  ;;  %432 = vmatprep.subr.bf16.mxu0 %v478_v4  ;;  %v486_v12 = vld [vmem:[%s655_s1 + $0x60] sm:$0xff]   ;;  %v490_v16 = vld [vmem:[%s655_s1 + $0x58] sm:$0xff]   ;;  %v494_v20 = vld [vmem:[%s655_s1 + $0x50] sm:$0xff]  }
   0x6   :  { %454 = vmatprep.subr.bf16.mxu1 %v479_v5  ;;  %v487_v13 = vld [vmem:[%s655_s1 + $0xe0] sm:$0xff]   ;;  %v491_v17 = vld [vmem:[%s655_s1 + $0xd8] sm:$0xff]   ;;  %v495_v21 = vld [vmem:[%s655_s1 + $0xd0] sm:$0xff]  }
   0x7   :  { %v488_v14 = vld [vmem:[%s655_s1 + $0x20] sm:$0xff]   ;;  %v492_v18 = vld [vmem:[%s655_s1 + $0x18] sm:$0xff]   ;;  %v496_v22 = vld [vmem:[%s655_s1 + $0x10] sm:$0xff]  }
   0x8   :  { %433 = vmatpush3.bf16.msra.mxu0 %v480_v6  ;;  %v489_v15 = vld [vmem:[%s655_s1 + $0xa0] sm:$0xff]   ;;  %v493_v19 = vld [vmem:[%s655_s1 + $0x98] sm:$0xff]   ;;  %v497_v23 = vld [vmem:[%s655_s1 + $0x90] sm:$0xff]  }
   0x9   :  { %455 = vmatpush3.bf16.msra.mxu1 %v481_v7  ;;  %434 = vmatprep.subr.bf16.mxu0 %v482_v8  ;;  %v498_v24 = vld [vmem:[%s655_s1 + $0x48] sm:$0xff]   ;;  %v502_v28 = vld [vmem:[%s655_s1 + $0x40] sm:$0xff]   ;;  %v24_v34 = vld [vmem:[%s656_s0 + $0x18] sm:$0xff] }
   0xa   :  { %456 = vmatprep.subr.bf16.mxu1 %v483_v9  ;;  %v499_v25 = vld [vmem:[%s655_s1 + $0xc8] sm:$0xff]   ;;  %v503_v29 = vld [vmem:[%s655_s1 + $0xc0] sm:$0xff]   ;;  %v28_v36 = vld [vmem:[%s656_s0 + $0x38] sm:$0xff] }
   0xb   :  { %v500_v26 = vld [vmem:[%s655_s1 + $0x8] sm:$0xff]   ;;  %v504_v30 = vld [vmem:[%s655_s1] sm:$0xff]   ;;  %v32_v39 = vpack.c.bf16 %v28_v36, %v24_v34  ;;  %v23_v41 = vld [vmem:[%s656_s0 + $0x10] sm:$0xff] }
   0xc   :  { %435 = vmatpush3.bf16.msra.mxu0 %v484_v10  ;;  %v501_v27 = vld [vmem:[%s655_s1 + $0x88] sm:$0xff]   ;;  %v505_v31 = vld [vmem:[%s655_s1 + $0x80] sm:$0xff]   ;;  %v27_v42 = vld [vmem:[%s656_s0 + $0x30] sm:$0xff] }
   0xd   :  { %457 = vmatpush3.bf16.msra.mxu1 %v485_v11  ;;  %436 = vmatprep.subr.bf16.mxu0 %v486_v12  ;;  %v22_v32 = vld [vmem:[%s656_s0 + $0x8] sm:$0xff]  ;;  %v21_v37 = vld [vmem:[%s656_s0] sm:$0xff]  ;;  %v31_v43 = vpack.c.bf16 %v27_v42, %v23_v41 }
   0xe   :  { %458 = vmatprep.subr.bf16.mxu1 %v487_v13  ;;  %v26_v33 = vld [vmem:[%s656_s0 + $0x28] sm:$0xff]  ;;  %v25_v38 = vld [vmem:[%s656_s0 + $0x20] sm:$0xff]  ;;  %364 = vmatprep.mubr.bf16.mxu1 %v32_v39 }
   0xf   :  { %v30_v35 = vpack.c.bf16 %v26_v33, %v22_v32  ;;  %v29_v40 = vpack.c.bf16 %v25_v38, %v21_v37  ;;  %v429_v51 = vld [vmem:[%s657_s2] ss:$0 sm:$0xff] }
  0x10   :  { %437 = vmatpush3.bf16.msra.mxu0 %v488_v14 }
  0x11   :  { %459 = vmatpush3.bf16.msra.mxu1 %v489_v15  ;;  %438 = vmatprep.subr.bf16.mxu0 %v490_v16 }
  0x12   :  { %460 = vmatprep.subr.bf16.mxu1 %v491_v17  ;;  %323 = vmatprep.mubr.bf16.mxu0 %v30_v35 }
  0x14   :  { %439 = vmatpush3.bf16.msra.mxu0 %v492_v18 }
  0x15   :  { %461 = vmatpush3.bf16.msra.mxu1 %v493_v19  ;;  %440 = vmatprep.subr.bf16.mxu0 %v494_v20 }
  0x16   :  { %462 = vmatprep.subr.bf16.mxu1 %v495_v21 }
  0x18   :  { %441 = vmatpush3.bf16.msra.mxu0 %v496_v22 }
  0x19   :  { %463 = vmatpush3.bf16.msra.mxu1 %v497_v23  ;;  %442 = vmatprep.subr.bf16.mxu0 %v498_v24 }
  0x1a   :  { %464 = vmatprep.subr.bf16.mxu1 %v499_v25 }
  0x1c   :  { %443 = vmatpush3.bf16.msra.mxu0 %v500_v26 }
  0x1d   :  { %465 = vmatpush3.bf16.msra.mxu1 %v501_v27  ;;  %444 = vmatprep.subr.bf16.mxu0 %v502_v28 }
  0x1e   :  { %466 = vmatprep.subr.bf16.mxu1 %v503_v29 }
  0x20   :  { %445 = vmatpush3.bf16.msra.mxu0 %v504_v30 }
  0x21   :  { %467 = vmatpush3.bf16.msra.mxu1 %v505_v31 }
  0x23   :  { %324 = vmatmul.mubr.bf16.vlgmr.msra.gmra.mxu0 %v29_v40 }
  0x24   :  { %365 = vmatmul.mubr.bf16.vlgmr.msra.gmra.mxu1 %v31_v43 }
  0xe3   :  { %v446_v44 = vpop.f32.mrf.mxu0 }
  0xe4   :  { %v468_v45 = vpop.f32.mrf.mxu1 }
  0xe5   :  { %v447_v46 = vpop.f32.mrf.mxu0 }
  0xe6   :  { %v448_v47 = vadd.f32 %v447_v46, %v446_v44  ;;  %v469_v48 = vpop.f32.mrf.mxu1 }
  0xe7   :  { %v470_v49 = vadd.f32 %v469_v48, %v468_v45  ;;  %v449_v50 = vpop.f32.mrf.mxu0 }
  0xe8   :  { %v471_v52 = vpop.f32.mrf.mxu1 }
  0xe9   :  { %v367_v53 = vadd.f32 %v470_v49, %v448_v47  ;;  %v450_v54 = vpop.f32.mrf.mxu0 }
  0xea   :  { %v451_v55 = vadd.f32 %v450_v54, %v449_v50  ;;  %v472_v56 = vpop.f32.mrf.mxu1 }
  0xeb   :  { %v389_v57 = vadd.f32 %v429_v51, %v367_v53  ;;  %v473_v58 = vadd.f32 %v472_v56, %v471_v52 }
  0xed   :  { %391 = vst [vmem:[%s658_s3] sm:$0xff] %v389_v57  ;;  %v370_v59 = vadd.f32 %v473_v58, %v451_v55 }
  0xef   :  { %v390_v60 = vadd.f32 %v429_v51, %v370_v59 }
  0xf1   :  { %392 = vst [vmem:[%s658_s3 + $0x8] sm:$0xff] %v390_v60 }

// kernel: vit3d_unetr_forward.23
= control target key start
LH: loop header
LB: loop body
LE: loop exit
PB: predicated region body
PF: predicated region fallthrough
CT: control target
= control target key end

     0   :  { %10 = vsyncpa [#allocation4], 0  ;;  %s325_s0 = inlined_call_operand.vmem [shape: f32[16,32], index: 0, kind: input, shape index: {}]   ;;  %s326_s1 = inlined_call_operand.vmem [shape: bf16[32,128], index: 1, kind: input, shape index: {}]   ;;  %s327_s2 = inlined_call_operand.vmem [shape: f32[1,128], index: 2, kind: input, shape index: {}]   ;;  %s328_s3 = inlined_call_operand.hbm [shape: f32[1,32], index: 3, kind: input, shape index: {}]   ;;  %s329_s4 = inlined_call_operand.hbm [shape: f32[1,32], index: 4, kind: input, shape index: {}]   ;;  %s330_s5 = inlined_call_operand.vmem [shape: f32[16,128], index: 5, kind: output, shape index: {}]  }
   0x1   :  { %11 = vsyncpa [#allocation6], 0  ;;  %s259_s18 = smov [#allocation3]   ;;  %s260_s20 = smov [#allocation5]  }
   0x2   :  { %s24_s19 = sshll.u32 %s259_s18, 4  ;;  %s34_s21 = sshll.u32 %s260_s20, 4  ;;  %s25_s19 = int_to_ptr.vmem [resolvable:$true] %s24_s19  ;;  %s35_s21 = int_to_ptr.vmem [resolvable:$true] %s34_s21 }
   0x3   :  { %s223_s22 = scalar_lea.vmem %s25_s19, 16  ;;  %s227_s23 = scalar_lea.vmem %s25_s19, 32 }
   0x4   :  { %p224_p0 = scmp.ne.s32.totalorder %s25_s19, %s223_s22  ;;  %p228_p1 = scmp.lt.s32.totalorder %s25_s19, %s25_s19 }
   0x5   :  { %p229_p2 = scmp.lt.s32.totalorder %s227_s23, %s223_s22 }
   0x7   :  { %p230_p3 = por %p229_p2, %p228_p1 }
   0x9   :  { %p231_p4 = pnand %p230_p3, %p224_p0 }
   0xb   :  { %234 = shalt.err (!%p231_p4)
}
   0xc   :  { %27 = dma.hbm_to_vmem [thread:$0]  %s328_s3, 16, %s25_s19, [#allocation4]  }
   0xd   :  { %s243_s26 = scalar_lea.vmem %s35_s21, 16  ;;  %s247_s27 = scalar_lea.vmem %s35_s21, 32 }
   0xe   :  { %p244_p5 = scmp.ne.s32.totalorder %s35_s21, %s243_s26  ;;  %p248_p6 = scmp.lt.s32.totalorder %s35_s21, %s35_s21 }
   0xf   :  { %p249_p7 = scmp.lt.s32.totalorder %s247_s27, %s243_s26 }
  0x11   :  { %p250_p8 = por %p249_p7, %p248_p6 }
  0x13   :  { %p251_p9 = pnand %p250_p8, %p244_p5 }
  0x15   :  { %254 = shalt.err (!%p251_p9)
}
  0x16   :  { %37 = dma.hbm_to_vmem [thread:$0]  %s329_s4, 16, %s35_s21, [#allocation6]  }
  0x17   :  { %255 = dma.done.wait [#allocation4], 16  }
  0x18   :  { %256 = vsyncadd [#allocation4], 4294967280 }
  0x19   :  { %257 = dma.done.wait [#allocation6], 16  }
  0x1a   :  { %258 = vsyncadd [#allocation6], 4294967280  ;;  %vm53_vm0 = vcmask 261120   ;;  %v51_v0 = vld [vmem:[%s325_s0] sm:$0xff]  ;;  %v52_v1 = vld [vmem:[%s325_s0 + $0x8] sm:$0xff]  ;;  %v261_v15 = vmov 0.0  }
  0x1b   :  { %v54_v2 = vsel %vm53_vm0, %v51_v0, 0.0  ;;  %v57_v3 = vsel %vm53_vm0, %v52_v1, 0.0  ;;  %v209_v14 = vld [vmem:[%s326_s1 + $0x8] sm:$0xff]   ;;  %197 = vmatprep.subr.bf16.mxu0 %v261_v15  ;;  %vm262_vm1 = vmmov 0   ;;  %v210_v16 = vld [vmem:[%s326_s1] sm:$0xff]  }
  0x1c   :  { %55 = vadd.xlane.f32.xlu0 %v54_v2  ;;  %201 = vmatprep.mubr.msk.bf16.mxu0 %vm262_vm1, %v261_v15  ;;  %v188_v25 = vld [vmem:[#allocation3] ss:$0 sm:$0xff]  ;;  %v189_v29 = vld [vmem:[#allocation5] ss:$0 sm:$0xff] }
  0x1d   :  { %198 = vmatpush3.bf16.msra.mxu0 %v209_v14  ;;  %v193_v34 = vld [vmem:[%s327_s2] ss:$0 sm:$0xff] }
  0x1e   :  { %199 = vmatprep.subr.bf16.mxu0 %v261_v15 }
  0x20   :  { %58 = vadd.xlane.f32.xlu0 %v57_v3 }
  0x21   :  { %200 = vmatpush3.bf16.msra.mxu0 %v210_v16 }
  0xa5   :  { %v56_v4 = vpop.xlane.xlu0 %55 }
  0xa6   :  { %v61_v5 = vmul.f32 0.03125, %v56_v4 }
  0xa8   :  { %v63_v6 = vsub.f32 %v51_v0, %v61_v5 }
  0xa9   :  { %v59_v7 = vpop.xlane.xlu0 %58 }
  0xaa   :  { %v62_v8 = vmul.f32 0.03125, %v59_v7  ;;  %v65_v9 = vmul.f32 %v63_v6, %v63_v6 }
  0xac   :  { %v64_v10 = vsub.f32 %v52_v1, %v62_v8  ;;  %v67_v11 = vsel %vm53_vm0, %v65_v9, 0.0 }
  0xad   :  { %68 = vadd.xlane.f32.xlu1 %v67_v11 }
  0xae   :  { %v66_v12 = vmul.f32 %v64_v10, %v64_v10 }
  0xb0   :  { %v70_v13 = vsel %vm53_vm0, %v66_v12, 0.0 }
  0xb1   :  { %71 = vadd.xlane.f32.xlu1 %v70_v13 }
 0x136   :  { %v69_v17 = vpop.xlane.xlu1 %68 }
 0x137   :  { %v73_v18 = vmul.f32 0.03125, %v69_v17 }
 0x139   :  { %v75_v19 = vadd.f32 1e-05, %v73_v18 }
 0x13a   :  { %v72_v20 = vpop.xlane.xlu1 %71 }
 0x13b   :  { %211 = vrsqrt.f32 %v75_v19  ;;  %v74_v21 = vmul.f32 0.03125, %v72_v20 }
 0x13d   :  { %v76_v22 = vadd.f32 1e-05, %v74_v21 }
 0x13f   :  { %213 = vrsqrt.f32 %v76_v22 }
 0x148   :  { %v212_v23 = vpop.eup %211 }
 0x149   :  { %v79_v24 = vmul.f32 %v212_v23, %v63_v6 }
 0x14b   :  { %v88_v28 = vmul.f32 %v188_v25, %v79_v24 }
 0x14c   :  { %v214_v26 = vpop.eup %213 }
 0x14d   :  { %v80_v27 = vmul.f32 %v214_v26, %v64_v10  ;;  %v97_v31 = vadd.f32 %v189_v29, %v88_v28 }
 0x14f   :  { %v89_v30 = vmul.f32 %v188_v25, %v80_v27 }
 0x151   :  { %v98_v32 = vadd.f32 %v189_v29, %v89_v30 }
 0x153   :  { %v99_v33 = vpack.c.bf16 %v98_v32, %v97_v31 }
 0x155   :  { %202 = vmatmul.mubr.msk.bf16.vlgmr.msra.gmra.mxu0 %vm53_vm0, %v99_v33 }
 0x215   :  { %v155_v35 = vpop.f32.mrf.mxu0 }
 0x216   :  { %v178_v36 = vadd.f32 %v193_v34, %v155_v35 }
 0x217   :  { %v203_v37 = vpop.f32.mrf.mxu0 }
 0x218   :  { %180 = vst [vmem:[%s330_s5] sm:$0xff] %v178_v36 }
 0x219   :  { %v158_v38 = vpop.f32.mrf.mxu0 }
 0x21a   :  { %v179_v39 = vadd.f32 %v193_v34, %v158_v38 }
 0x21b   :  { %v204_v40 = vpop.f32.mrf.mxu0 }
 0x21c   :  { %181 = vst [vmem:[%s330_s5 + $0x8] sm:$0xff] %v179_v39 }
 0x21d   :  { %186 = vsyncpa [#allocation4], 1 }
 0x21e   :  { %187 = vsyncpa [#allocation6], 1 }

// kernel: vit3d_unetr_forward.24
= control target key start
LH: loop header
LB: loop body
LE: loop exit
PB: predicated region body
PF: predicated region fallthrough
CT: control target
= control target key end

     0   :  { %s465_s12 = smov 0   ;;  %s500_s0 = inlined_call_operand.vmem [shape: f32[8,8,8], index: 0, kind: input, shape index: {}]   ;;  %s501_s1 = inlined_call_operand.vmem [shape: f32[8,8,8], index: 1, kind: input, shape index: {}]   ;;  %s502_s2 = inlined_call_operand.vmem [shape: f32[8,8,8], index: 2, kind: input, shape index: {}]   ;;  %s503_s3 = inlined_call_operand.vmem [shape: f32[8,8,8], index: 3, kind: output, shape index: {}]  }
   0x1 LB: > { %s392_s13 = sadd.s32 4294967295, %s441_s12   ;;  %p396_p0 = scmp.ge.s32.totalorder %s441_s12, 1  ;;  %s441_s12 = sphi %s465_s12, %s13_s12  }
   0x2   : > { %p154_p1 = scmp.lt.s32.totalorder %s441_s12, 9 }
   0x4   : > { %p155_p2 = pnand %p396_p0, %p154_p1 }
   0x5   : > { %p184_p3 = scmp.lt.s32.totalorder (!%p155_p2), %s392_s13, 7 }
   0x6   : > { %158 = sbr.rel (%p155_p2) target bundleno = 578 (0x242), region = 32 }
   0xb   : > { %v443_v0 = vmov 0.0   ;;  %vm444_vm0 = vmmov 0   ;;  %s505_s13 = smov (!%p184_p3, %s392_s13), 7  ;;  %vm207_vm1 = vcmask 64512   ;;  %vm268_vm2 = vcmask 1043456  }
   0xc   : > { %409 = vmatprep.subr.bf16.mxu0 %v443_v0  ;;  %411 = vmatprep.mubr.msk.bf16.mxu0 %vm444_vm0, %v443_v0  ;;  %s473_s14 = sshll.u32 %s505_s13, 3 }
   0xd   : > { %415 = vmatprep.subr.bf16.mxu1 %v443_v0  ;;  %417 = vmatprep.mubr.msk.bf16.mxu1 %vm444_vm0, %v443_v0  ;;  %s191_s17 = scalar_lea.vmem %s501_s1, %s473_s14  ;;  %s187_s20 = scalar_lea.vmem %s500_s0, %s473_s14 }
   0xe   : > { %v203_v1 = vld [vmem:[%s191_s17] sm:$0xff]  ;;  %s195_s23 = scalar_lea.vmem %s502_s2, %s473_s14  ;;  %s199_s26 = scalar_lea.vmem %s503_s3, %s473_s14 }
   0xf   : > { %v204_v2 = vpack.c.bf16 %v203_v1, %v203_v1  ;;  %v201_v4 = vld [vmem:[%s187_s20] sm:$0xff] }
  0x10   : > { %v202_v5 = vpack.c.bf16 %v201_v4, %v201_v4  ;;  %v205_v12 = vld [vmem:[%s195_s23] sm:$0xff] }
  0x11   : > { %v212_v3 = vsel %vm207_vm1, %v204_v2, 0  ;;  %v206_v13 = vpack.c.bf16 %v205_v12, %v205_v12 }
  0x12   : > { %410 = vmatpush3.bf16.xpose.msra.mxu0 %v212_v3 }
  0x13   : > { %v270_v14 = vsel %vm268_vm2, %v206_v13, 0 }
  0x14   : > { %416 = vmatpush3.bf16.msra.mxu1 %v270_v14 }
  0x19   : > { %412 = vmatmul.mubr.msk.bf16.vlgmr.msra.gmra.mxu0 %vm207_vm1, %v202_v5 }
  0xd9   : > { %v248_v6 = vpop.f32.mrf.mxu0 }
  0xda   : > { %v254_v7 = vmul.f32 0.35355338, %v248_v6 }
  0xdb   : > { %v413_v8 = vpop.f32.mrf.mxu0 }
  0xdc   : > { %v255_v9 = vsel %vm207_vm1, %v254_v7, -inf }
  0xdd   : > { %256 = vmax.xlane.f32.xlu0 %v255_v9  ;;  %v251_v10 = vpop.f32.mrf.mxu0 }
  0xdf   : > { %v414_v11 = vpop.f32.mrf.mxu0 }
 0x166   : > { %v257_v15 = vpop.xlane.xlu0 %256 }
 0x167   : > { %v258_v16 = vsub.f32 %v254_v7, %v257_v15 }
 0x169   : > { %v259_v17 = vmul.f32 1.442695, %v258_v16 }
 0x16b   : > { %431 = vpow2.f32 %v259_v17 }
 0x178   : > { %v432_v18 = vpop.eup %431 }
 0x179   : > { %v261_v19 = vsel %vm207_vm1, %v432_v18, 0.0  ;;  %v264_v20 = vpack.c.bf16 %v432_v18, %v432_v18 }
 0x17a   : > { %262 = vadd.xlane.f32.xlu0 %v261_v19 }
 0x17b   : > { %418 = vmatmul.mubr.msk.bf16.vlgmr.msra.gmra.mxu1 %vm207_vm1, %v264_v20 }
 0x203   : > { %v263_v21 = vpop.xlane.xlu0 %262 }
 0x204   : > { %433 = vrcp.f32 %v263_v21 }
 0x211   : > { %v434_v22 = vpop.eup %433 }
 0x23b   : > { %v306_v23 = vpop.f32.mrf.mxu1 }
 0x23c   : > { %v313_v24 = vmul.f32 %v434_v22, %v306_v23 }
 0x23d   : > { %v419_v25 = vpop.f32.mrf.mxu1 }
 0x23e   : > { %314 = vst.msk [vmem:[%s199_s26] sm:$0xff] %vm207_vm1, %v313_v24 }
 0x23f   : > { %v309_v26 = vpop.f32.mrf.mxu1 }
 0x241   : > { %v420_v27 = vpop.f32.mrf.mxu1 }
 0x242 PF: > { %s13_s12 = sadd.s32 1, %s441_s12  }
 0x243   : > { %p10_p4 = scmp.ge.s32.totalorder %s13_s12, 10  }
 0x245   :  { %12 = sbr.rel (!%p10_p4) target bundleno = 1 (0x1), region = 68 }

// kernel: vit3d_unetr_forward.26
= control target key start
LH: loop header
LB: loop body
LE: loop exit
PB: predicated region body
PF: predicated region fallthrough
CT: control target
= control target key end

     0   :  { %10 = vsyncpa [#allocation4], 0  ;;  %s387_s0 = inlined_call_operand.vmem [shape: f32[16,32], index: 0, kind: input, shape index: {}]   ;;  %s388_s1 = inlined_call_operand.vmem [shape: bf16[32,128], index: 1, kind: input, shape index: {}]   ;;  %s389_s2 = inlined_call_operand.vmem [shape: f32[1,128], index: 2, kind: input, shape index: {}]   ;;  %s390_s3 = inlined_call_operand.hbm [shape: f32[1,32], index: 3, kind: input, shape index: {}]   ;;  %s391_s4 = inlined_call_operand.hbm [shape: f32[1,32], index: 4, kind: input, shape index: {}]   ;;  %s392_s5 = inlined_call_operand.vmem [shape: f32[16,128], index: 5, kind: output, shape index: {}]  }
   0x1   :  { %11 = vsyncpa [#allocation6], 0  ;;  %s321_s18 = smov [#allocation3]   ;;  %s322_s20 = smov [#allocation5]  }
   0x2   :  { %s24_s19 = sshll.u32 %s321_s18, 4  ;;  %s34_s21 = sshll.u32 %s322_s20, 4  ;;  %s25_s19 = int_to_ptr.vmem [resolvable:$true] %s24_s19  ;;  %s35_s21 = int_to_ptr.vmem [resolvable:$true] %s34_s21 }
   0x3   :  { %s285_s22 = scalar_lea.vmem %s25_s19, 16  ;;  %s289_s23 = scalar_lea.vmem %s25_s19, 32 }
   0x4   :  { %p286_p0 = scmp.ne.s32.totalorder %s25_s19, %s285_s22  ;;  %p290_p1 = scmp.lt.s32.totalorder %s25_s19, %s25_s19 }
   0x5   :  { %p291_p2 = scmp.lt.s32.totalorder %s289_s23, %s285_s22 }
   0x7   :  { %p292_p3 = por %p291_p2, %p290_p1 }
   0x9   :  { %p293_p4 = pnand %p292_p3, %p286_p0 }
   0xb   :  { %296 = shalt.err (!%p293_p4)
}
   0xc   :  { %27 = dma.hbm_to_vmem [thread:$0]  %s390_s3, 16, %s25_s19, [#allocation4]  }
   0xd   :  { %s305_s26 = scalar_lea.vmem %s35_s21, 16  ;;  %s309_s27 = scalar_lea.vmem %s35_s21, 32 }
   0xe   :  { %p306_p5 = scmp.ne.s32.totalorder %s35_s21, %s305_s26  ;;  %p310_p6 = scmp.lt.s32.totalorder %s35_s21, %s35_s21 }
   0xf   :  { %p311_p7 = scmp.lt.s32.totalorder %s309_s27, %s305_s26 }
  0x11   :  { %p312_p8 = por %p311_p7, %p310_p6 }
  0x13   :  { %p313_p9 = pnand %p312_p8, %p306_p5 }
  0x15   :  { %316 = shalt.err (!%p313_p9)
}
  0x16   :  { %37 = dma.hbm_to_vmem [thread:$0]  %s391_s4, 16, %s35_s21, [#allocation6]  }
  0x17   :  { %317 = dma.done.wait [#allocation4], 16  }
  0x18   :  { %318 = vsyncadd [#allocation4], 4294967280 }
  0x19   :  { %319 = dma.done.wait [#allocation6], 16  }
  0x1a   :  { %320 = vsyncadd [#allocation6], 4294967280  ;;  %vm53_vm0 = vcmask 261120   ;;  %v51_v0 = vld [vmem:[%s387_s0] sm:$0xff]  ;;  %v52_v1 = vld [vmem:[%s387_s0 + $0x8] sm:$0xff]  ;;  %v323_v15 = vmov 0.0  }
  0x1b   :  { %v54_v2 = vsel %vm53_vm0, %v51_v0, 0.0  ;;  %v57_v3 = vsel %vm53_vm0, %v52_v1, 0.0  ;;  %v263_v14 = vld [vmem:[%s388_s1 + $0x8] sm:$0xff]   ;;  %251 = vmatprep.subr.bf16.mxu0 %v323_v15  ;;  %vm324_vm1 = vmmov 0   ;;  %v264_v16 = vld [vmem:[%s388_s1] sm:$0xff]  }
  0x1c   :  { %55 = vadd.xlane.f32.xlu0 %v54_v2  ;;  %255 = vmatprep.mubr.msk.bf16.mxu0 %vm324_vm1, %v323_v15  ;;  %v242_v25 = vld [vmem:[#allocation3] ss:$0 sm:$0xff]  ;;  %v243_v29 = vld [vmem:[#allocation5] ss:$0 sm:$0xff] }
  0x1d   :  { %252 = vmatpush3.bf16.msra.mxu0 %v263_v14  ;;  %v247_v34 = vld [vmem:[%s389_s2] ss:$0 sm:$0xff] }
  0x1e   :  { %253 = vmatprep.subr.bf16.mxu0 %v323_v15 }
  0x20   :  { %58 = vadd.xlane.f32.xlu0 %v57_v3 }
  0x21   :  { %254 = vmatpush3.bf16.msra.mxu0 %v264_v16 }
  0xa5   :  { %v56_v4 = vpop.xlane.xlu0 %55 }
  0xa6   :  { %v61_v5 = vmul.f32 0.03125, %v56_v4 }
  0xa8   :  { %v63_v6 = vsub.f32 %v51_v0, %v61_v5 }
  0xa9   :  { %v59_v7 = vpop.xlane.xlu0 %58 }
  0xaa   :  { %v62_v8 = vmul.f32 0.03125, %v59_v7  ;;  %v65_v9 = vmul.f32 %v63_v6, %v63_v6 }
  0xac   :  { %v64_v10 = vsub.f32 %v52_v1, %v62_v8  ;;  %v67_v11 = vsel %vm53_vm0, %v65_v9, 0.0 }
  0xad   :  { %68 = vadd.xlane.f32.xlu1 %v67_v11 }
  0xae   :  { %v66_v12 = vmul.f32 %v64_v10, %v64_v10 }
  0xb0   :  { %v70_v13 = vsel %vm53_vm0, %v66_v12, 0.0 }
  0xb1   :  { %71 = vadd.xlane.f32.xlu1 %v70_v13 }
 0x136   :  { %v69_v17 = vpop.xlane.xlu1 %68 }
 0x137   :  { %v73_v18 = vmul.f32 0.03125, %v69_v17 }
 0x139   :  { %v75_v19 = vadd.f32 1e-05, %v73_v18 }
 0x13a   :  { %v72_v20 = vpop.xlane.xlu1 %71 }
 0x13b   :  { %265 = vrsqrt.f32 %v75_v19  ;;  %v74_v21 = vmul.f32 0.03125, %v72_v20 }
 0x13d   :  { %v76_v22 = vadd.f32 1e-05, %v74_v21 }
 0x13f   :  { %267 = vrsqrt.f32 %v76_v22 }
 0x148   :  { %v266_v23 = vpop.eup %265 }
 0x149   :  { %v79_v24 = vmul.f32 %v266_v23, %v63_v6 }
 0x14b   :  { %v88_v28 = vmul.f32 %v242_v25, %v79_v24 }
 0x14c   :  { %v268_v26 = vpop.eup %267 }
 0x14d   :  { %v80_v27 = vmul.f32 %v268_v26, %v64_v10  ;;  %v97_v31 = vadd.f32 %v243_v29, %v88_v28 }
 0x14f   :  { %v89_v30 = vmul.f32 %v242_v25, %v80_v27 }
 0x151   :  { %v98_v32 = vadd.f32 %v243_v29, %v89_v30 }
 0x153   :  { %v99_v33 = vpack.c.bf16 %v98_v32, %v97_v31 }
 0x155   :  { %256 = vmatmul.mubr.msk.bf16.vlgmr.msra.gmra.mxu0 %vm53_vm0, %v99_v33 }
 0x215   :  { %v155_v35 = vpop.f32.mrf.mxu0 }
 0x216   :  { %v178_v36 = vadd.f32 %v247_v34, %v155_v35 }
 0x217   :  { %v257_v37 = vpop.f32.mrf.mxu0 }
 0x218   :  { %v182_v38 = vmul.f32 0.70710677, %v178_v36  ;;  %v180_v19 = vmul.f32 0.5, %v178_v36 }
 0x219   :  { %v158_v39 = vpop.f32.mrf.mxu0 }
 0x21a   :  { %v184_v40 = vand.u32 2147483647, %v182_v38  ;;  %v179_v41 = vadd.f32 %v247_v34, %v158_v39  ;;  %vm224_vm2 = vcmp.ge.f32.partialorder %v182_v38, 0.0 }
 0x21b   :  { %v258_v42 = vpop.f32.mrf.mxu0 }
 0x21c   :  { %v186_v43 = vmul.f32 0.3275911, %v184_v40  ;;  %v183_v44 = vmul.f32 0.70710677, %v179_v41  ;;  %v212_v49 = vsub.f32 0.0, %v184_v40  ;;  %v181_v24 = vmul.f32 0.5, %v179_v41 }
 0x21e   :  { %v188_v45 = vadd.f32 1.0, %v186_v43  ;;  %v185_v46 = vand.u32 2147483647, %v183_v44  ;;  %v214_v50 = vmul.f32 %v212_v49, %v184_v40  ;;  %vm225_vm3 = vcmp.ge.f32.partialorder %v183_v44, 0.0 }
 0x220   :  { %269 = vrcp.f32 %v188_v45  ;;  %v187_v47 = vmul.f32 0.3275911, %v185_v46  ;;  %v213_v51 = vsub.f32 0.0, %v185_v46  ;;  %v216_v54 = vmul.f32 1.442695, %v214_v50 }
 0x222   :  { %v189_v48 = vadd.f32 1.0, %v187_v47  ;;  %v215_v55 = vmul.f32 %v213_v51, %v185_v46 }
 0x224   :  { %271 = vrcp.f32 %v189_v48  ;;  %v218_v60 = vmul.f32 1.442695, %v215_v55 }
 0x225   :  { %273 = vpow2.f32 %v216_v54 }
 0x226   :  { %275 = vpow2.f32 %v218_v60 }
 0x22d   :  { %v270_v52 = vpop.eup %269 }
 0x22e   :  { %v194_v53 = vmul.f32 1.0614054, %v270_v52 }
 0x230   :  { %v196_v56 = vadd.f32 -1.4531521, %v194_v53 }
 0x231   :  { %v272_v57 = vpop.eup %271 }
 0x232   :  { %v198_v58 = vmul.f32 %v270_v52, %v196_v56  ;;  %v195_v59 = vmul.f32 1.0614054, %v272_v57  ;;  %v274_v9 = vpop.eup %273 }
 0x233   :  { %v276_v14 = vpop.eup %275 }
 0x234   :  { %v200_v61 = vadd.f32 1.4214138, %v198_v58  ;;  %v197_v62 = vadd.f32 -1.4531521, %v195_v59 }
 0x236   :  { %v202_v63 = vmul.f32 %v270_v52, %v200_v61  ;;  %v199_v0 = vmul.f32 %v272_v57, %v197_v62 }
 0x238   :  { %v204_v1 = vadd.f32 -0.28449672, %v202_v63  ;;  %v201_v2 = vadd.f32 1.4214138, %v199_v0 }
 0x23a   :  { %v206_v3 = vmul.f32 %v270_v52, %v204_v1  ;;  %v203_v4 = vmul.f32 %v272_v57, %v201_v2 }
 0x23c   :  { %v208_v5 = vadd.f32 0.2548296, %v206_v3  ;;  %v205_v6 = vadd.f32 -0.28449672, %v203_v4 }
 0x23e   :  { %v210_v7 = vmul.f32 %v270_v52, %v208_v5  ;;  %v207_v8 = vmul.f32 %v272_v57, %v205_v6 }
 0x240   :  { %v220_v10 = vmul.f32 %v274_v9, %v210_v7  ;;  %v209_v11 = vadd.f32 0.2548296, %v207_v8 }
 0x242   :  { %v222_v12 = vsub.f32 1.0, %v220_v10  ;;  %v211_v13 = vmul.f32 %v272_v57, %v209_v11 }
 0x244   :  { %v226_v15 = vsub.f32 0.0, %v222_v12  ;;  %v221_v16 = vmul.f32 %v276_v14, %v211_v13 }
 0x246   :  { %v228_v17 = vsel %vm224_vm2, %v222_v12, %v226_v15  ;;  %v223_v18 = vsub.f32 1.0, %v221_v16 }
 0x247   :  { %v230_v20 = vadd.f32 1.0, %v228_v17 }
 0x248   :  { %v227_v21 = vsub.f32 0.0, %v223_v18 }
 0x249   :  { %v232_v22 = vmul.f32 %v230_v20, %v180_v19 }
 0x24a   :  { %v229_v23 = vsel %vm225_vm3, %v223_v18, %v227_v21 }
 0x24b   :  { %234 = vst [vmem:[%s392_s5] sm:$0xff] %v232_v22  ;;  %v231_v25 = vadd.f32 1.0, %v229_v23 }
 0x24d   :  { %v233_v26 = vmul.f32 %v231_v25, %v181_v24 }
 0x24f   :  { %235 = vst [vmem:[%s392_s5 + $0x8] sm:$0xff] %v233_v26 }
 0x250   :  { %240 = vsyncpa [#allocation4], 1 }
 0x251   :  { %241 = vsyncpa [#allocation6], 1 }

// kernel: vit3d_unetr_forward.25
= control target key start
LH: loop header
LB: loop body
LE: loop exit
PB: predicated region body
PF: predicated region fallthrough
CT: control target
= control target key end

     0   :  { %v137_v0 = vmov 0.0   ;;  %vm138_vm0 = vmmov 0   ;;  %vm45_vm1 = vcmask 261120   ;;  %s191_s1 = inlined_call_operand.vmem [shape: bf16[32,128], index: 1, kind: input, shape index: {}]   ;;  %s192_s0 = inlined_call_operand.vmem [shape: f32[16,32], index: 0, kind: input, shape index: {}]   ;;  %s193_s2 = inlined_call_operand.vmem [shape: f32[1,128], index: 2, kind: input, shape index: {}]   ;;  %s194_s3 = inlined_call_operand.vmem [shape: f32[16,128], index: 3, kind: input, shape index: {}]   ;;  %s195_s4 = inlined_call_operand.vmem [shape: f32[16,128], index: 4, kind: output, shape index: {}]  }
   0x1   :  { %125 = vmatprep.subr.bf16.mxu0 %v137_v0  ;;  %v135_v1 = vld [vmem:[%s191_s1 + $0x8] sm:$0xff]   ;;  %129 = vmatprep.mubr.msk.bf16.mxu0 %vm138_vm0, %v137_v0  ;;  %v136_v2 = vld [vmem:[%s191_s1] sm:$0xff]  }
   0x2   :  { %126 = vmatpush3.bf16.msra.mxu0 %v135_v1  ;;  %v24_v3 = vld [vmem:[%s192_s0] sm:$0xff]  ;;  %v25_v4 = vld [vmem:[%s192_s0 + $0x8] sm:$0xff] }
   0x3   :  { %127 = vmatprep.subr.bf16.mxu0 %v137_v0  ;;  %v26_v5 = vpack.c.bf16 %v25_v4, %v24_v3  ;;  %v121_v6 = vld [vmem:[%s193_s2] ss:$0 sm:$0xff]  ;;  %v109_v13 = vld [vmem:[%s194_s3 + $0x8] sm:$0xff] }
   0x4   :  { %v108_v8 = vld [vmem:[%s194_s3] sm:$0xff] }
   0x6   :  { %128 = vmatpush3.bf16.msra.mxu0 %v136_v2 }
   0x9   :  { %130 = vmatmul.mubr.msk.bf16.vlgmr.msra.gmra.mxu0 %vm45_vm1, %v26_v5 }
  0xc9   :  { %v83_v7 = vpop.f32.mrf.mxu0 }
  0xca   :  { %v106_v9 = vadd.f32 %v121_v6, %v83_v7 }
  0xcb   :  { %v131_v10 = vpop.f32.mrf.mxu0 }
  0xcc   :  { %v110_v11 = vadd.f32 %v108_v8, %v106_v9 }
  0xcd   :  { %v86_v12 = vpop.f32.mrf.mxu0 }
  0xce   :  { %112 = vst [vmem:[%s195_s4] sm:$0xff] %v110_v11  ;;  %v107_v14 = vadd.f32 %v121_v6, %v86_v12 }
  0xcf   :  { %v132_v15 = vpop.f32.mrf.mxu0 }
  0xd0   :  { %v111_v16 = vadd.f32 %v109_v13, %v107_v14 }
  0xd2   :  { %113 = vst [vmem:[%s195_s4 + $0x8] sm:$0xff] %v111_v16 }

// kernel: vit3d_unetr_forward.27
= control target key start
LH: loop header
LB: loop body
LE: loop exit
PB: predicated region body
PF: predicated region fallthrough
CT: control target
= control target key end

     0   :  { %v163_v0 = vmov 0.0   ;;  %vm164_vm0 = vmmov 0   ;;  %vm61_vm1 = vcmask 523264   ;;  %s223_s1 = inlined_call_operand.vmem [shape: bf16[64,128], index: 1, kind: input, shape index: {}]   ;;  %s224_s0 = inlined_call_operand.vmem [shape: f32[16,64], index: 0, kind: input, shape index: {}]   ;;  %s225_s2 = inlined_call_operand.vmem [shape: f32[1,128], index: 2, kind: input, shape index: {}]   ;;  %s226_s3 = inlined_call_operand.vmem [shape: f32[16,128], index: 3, kind: input, shape index: {}]   ;;  %s227_s4 = inlined_call_operand.vmem [shape: f32[16,128], index: 4, kind: output, shape index: {}]  }
   0x1   :  { %145 = vmatprep.subr.bf16.mxu0 %v163_v0  ;;  %v159_v1 = vld [vmem:[%s223_s1 + $0x18] sm:$0xff]   ;;  %153 = vmatprep.mubr.msk.bf16.mxu0 %vm164_vm0, %v163_v0  ;;  %v160_v2 = vld [vmem:[%s223_s1 + $0x10] sm:$0xff]   ;;  %v161_v3 = vld [vmem:[%s223_s1 + $0x8] sm:$0xff]  }
   0x2   :  { %146 = vmatpush3.bf16.msra.mxu0 %v159_v1  ;;  %v162_v4 = vld [vmem:[%s223_s1] sm:$0xff]   ;;  %v25_v6 = vld [vmem:[%s224_s0 + $0x8] sm:$0xff] }
   0x3   :  { %147 = vmatprep.subr.bf16.mxu0 %v163_v0  ;;  %v24_v5 = vld [vmem:[%s224_s0] sm:$0xff]  ;;  %v125_v15 = vld [vmem:[%s226_s3 + $0x8] sm:$0xff] }
   0x4   :  { %v26_v7 = vpack.c.bf16 %v25_v6, %v24_v5  ;;  %v139_v8 = vld [vmem:[%s225_s2] ss:$0 sm:$0xff] }
   0x5   :  { %v124_v10 = vld [vmem:[%s226_s3] sm:$0xff] }
   0x6   :  { %148 = vmatpush3.bf16.msra.mxu0 %v160_v2 }
   0x7   :  { %149 = vmatprep.subr.bf16.mxu0 %v163_v0 }
   0xa   :  { %150 = vmatpush3.bf16.msra.mxu0 %v161_v3 }
   0xb   :  { %151 = vmatprep.subr.bf16.mxu0 %v163_v0 }
   0xe   :  { %152 = vmatpush3.bf16.msra.mxu0 %v162_v4 }
  0x11   :  { %154 = vmatmul.mubr.msk.bf16.vlgmr.msra.gmra.mxu0 %vm61_vm1, %v26_v7 }
  0xd1   :  { %v99_v9 = vpop.f32.mrf.mxu0 }
  0xd2   :  { %v122_v11 = vadd.f32 %v139_v8, %v99_v9 }
  0xd3   :  { %v155_v12 = vpop.f32.mrf.mxu0 }
  0xd4   :  { %v126_v13 = vadd.f32 %v124_v10, %v122_v11 }
  0xd5   :  { %v102_v14 = vpop.f32.mrf.mxu0 }
  0xd6   :  { %128 = vst [vmem:[%s227_s4] sm:$0xff] %v126_v13  ;;  %v123_v16 = vadd.f32 %v139_v8, %v102_v14 }
  0xd7   :  { %v156_v17 = vpop.f32.mrf.mxu0 }
  0xd8   :  { %v127_v18 = vadd.f32 %v125_v15, %v123_v16 }
  0xda   :  { %129 = vst [vmem:[%s227_s4 + $0x8] sm:$0xff] %v127_v18 }

// kernel: vit3d_unetr_forward.38
= control target key start
LH: loop header
LB: loop body
LE: loop exit
PB: predicated region body
PF: predicated region fallthrough
CT: control target
= control target key end

     0   :  { %vm16_vm0 = vcmask 261120   ;;  %s118_s0 = inlined_call_operand.vmem [shape: f32[16,32], index: 0, kind: input, shape index: {}]   ;;  %s119_s1 = inlined_call_operand.vmem [shape: f32[1,32], index: 1, kind: input, shape index: {}]   ;;  %s120_s2 = inlined_call_operand.vmem [shape: f32[1,32], index: 2, kind: input, shape index: {}]   ;;  %s121_s3 = inlined_call_operand.vmem [shape: f32[16,32], index: 3, kind: output, shape index: {}]  }
   0x1   :  { %v14_v0 = vld [vmem:[%s118_s0] sm:$0xff]  ;;  %v15_v1 = vld [vmem:[%s118_s0 + $0x8] sm:$0xff] }
   0x2   :  { %v17_v2 = vsel %vm16_vm0, %v14_v0, 0.0  ;;  %v20_v3 = vsel %vm16_vm0, %v15_v1, 0.0  ;;  %v68_v21 = vld [vmem:[%s119_s1] ss:$0 sm:$0xff] }
   0x3   :  { %18 = vadd.xlane.f32.xlu0 %v17_v2  ;;  %v69_v23 = vld [vmem:[%s120_s2] ss:$0 sm:$0xff] }
   0x7   :  { %21 = vadd.xlane.f32.xlu0 %v20_v3 }
  0x8c   :  { %v19_v4 = vpop.xlane.xlu0 %18 }
  0x8d   :  { %v24_v5 = vmul.f32 0.03125, %v19_v4 }
  0x8f   :  { %v26_v6 = vsub.f32 %v14_v0, %v24_v5 }
  0x90   :  { %v22_v7 = vpop.xlane.xlu0 %21 }
  0x91   :  { %v25_v8 = vmul.f32 0.03125, %v22_v7  ;;  %v28_v9 = vmul.f32 %v26_v6, %v26_v6 }
  0x93   :  { %v27_v10 = vsub.f32 %v15_v1, %v25_v8  ;;  %v30_v11 = vsel %vm16_vm0, %v28_v9, 0.0 }
  0x94   :  { %31 = vadd.xlane.f32.xlu1 %v30_v11 }
  0x95   :  { %v29_v12 = vmul.f32 %v27_v10, %v27_v10 }
  0x97   :  { %v33_v13 = vsel %vm16_vm0, %v29_v12, 0.0 }
  0x98   :  { %34 = vadd.xlane.f32.xlu1 %v33_v13 }
 0x11d   :  { %v32_v14 = vpop.xlane.xlu1 %31 }
 0x11e   :  { %v36_v15 = vmul.f32 0.03125, %v32_v14 }
 0x120   :  { %v38_v16 = vadd.f32 1e-05, %v36_v15 }
 0x121   :  { %v35_v17 = vpop.xlane.xlu1 %34 }
 0x122   :  { %70 = vrsqrt.f32 %v38_v16  ;;  %v37_v18 = vmul.f32 0.03125, %v35_v17 }
 0x124   :  { %v39_v19 = vadd.f32 1e-05, %v37_v18 }
 0x126   :  { %72 = vrsqrt.f32 %v39_v19 }
 0x12f   :  { %v71_v20 = vpop.eup %70 }
 0x130   :  { %v42_v22 = vmul.f32 %v71_v20, %v26_v6 }
 0x132   :  { %v51_v24 = vmul.f32 %v68_v21, %v42_v22 }
 0x133   :  { %v73_v25 = vpop.eup %72 }
 0x134   :  { %v60_v26 = vadd.f32 %v69_v23, %v51_v24  ;;  %v43_v27 = vmul.f32 %v73_v25, %v27_v10 }
 0x136   :  { %62 = vst.msk [vmem:[%s121_s3] sm:$0xff] %vm16_vm0, %v60_v26  ;;  %v52_v28 = vmul.f32 %v68_v21, %v43_v27 }
 0x138   :  { %v61_v29 = vadd.f32 %v69_v23, %v52_v28 }
 0x13a   :  { %63 = vst.msk [vmem:[%s121_s3 + $0x8] sm:$0xff] %vm16_vm0, %v61_v29 }

// kernel: vit3d_unetr_forward.33
= control target key start
LH: loop header
LB: loop body
LE: loop exit
PB: predicated region body
PF: predicated region fallthrough
CT: control target
= control target key end

     0   :  { %vm29_vm0 = vcmask 261120   ;;  %v187_v14 = vmov 0.0   ;;  %vm188_vm1 = vmmov 0   ;;  %s251_s0 = inlined_call_operand.vmem [shape: f32[16,32], index: 0, kind: input, shape index: {}]   ;;  %s252_s1 = inlined_call_operand.vmem [shape: bf16[32,128], index: 1, kind: input, shape index: {}]   ;;  %s253_s3 = inlined_call_operand.vmem [shape: f32[1,32], index: 3, kind: input, shape index: {}]   ;;  %s254_s4 = inlined_call_operand.vmem [shape: f32[1,32], index: 4, kind: input, shape index: {}]   ;;  %s255_s2 = inlined_call_operand.vmem [shape: f32[1,128], index: 2, kind: input, shape index: {}]   ;;  %s256_s5 = inlined_call_operand.vmem [shape: f32[16,128], index: 5, kind: output, shape index: {}]  }
   0x1   :  { %v27_v0 = vld [vmem:[%s251_s0] sm:$0xff]  ;;  %v28_v1 = vld [vmem:[%s251_s0 + $0x8] sm:$0xff]  ;;  %171 = vmatprep.subr.bf16.mxu0 %v187_v14  ;;  %175 = vmatprep.mubr.msk.bf16.mxu0 %vm188_vm1, %v187_v14 }
   0x2   :  { %v30_v2 = vsel %vm29_vm0, %v27_v0, 0.0  ;;  %v33_v3 = vsel %vm29_vm0, %v28_v1, 0.0  ;;  %v181_v15 = vld [vmem:[%s252_s1 + $0x8] sm:$0xff]   ;;  %v182_v16 = vld [vmem:[%s252_s1] sm:$0xff]  }
   0x3   :  { %31 = vadd.xlane.f32.xlu0 %v30_v2  ;;  %172 = vmatpush3.bf16.msra.mxu0 %v181_v15  ;;  %v162_v25 = vld [vmem:[%s253_s3] ss:$0 sm:$0xff] }
   0x4   :  { %173 = vmatprep.subr.bf16.mxu0 %v187_v14  ;;  %v163_v29 = vld [vmem:[%s254_s4] ss:$0 sm:$0xff] }
   0x5   :  { %v167_v34 = vld [vmem:[%s255_s2] ss:$0 sm:$0xff] }
   0x7   :  { %34 = vadd.xlane.f32.xlu0 %v33_v3  ;;  %174 = vmatpush3.bf16.msra.mxu0 %v182_v16 }
  0x8c   :  { %v32_v4 = vpop.xlane.xlu0 %31 }
  0x8d   :  { %v37_v5 = vmul.f32 0.03125, %v32_v4 }
  0x8f   :  { %v39_v6 = vsub.f32 %v27_v0, %v37_v5 }
  0x90   :  { %v35_v7 = vpop.xlane.xlu0 %34 }
  0x91   :  { %v38_v8 = vmul.f32 0.03125, %v35_v7  ;;  %v41_v9 = vmul.f32 %v39_v6, %v39_v6 }
  0x93   :  { %v40_v10 = vsub.f32 %v28_v1, %v38_v8  ;;  %v43_v11 = vsel %vm29_vm0, %v41_v9, 0.0 }
  0x94   :  { %44 = vadd.xlane.f32.xlu1 %v43_v11 }
  0x95   :  { %v42_v12 = vmul.f32 %v40_v10, %v40_v10 }
  0x97   :  { %v46_v13 = vsel %vm29_vm0, %v42_v12, 0.0 }
  0x98   :  { %47 = vadd.xlane.f32.xlu1 %v46_v13 }
 0x11d   :  { %v45_v17 = vpop.xlane.xlu1 %44 }
 0x11e   :  { %v49_v18 = vmul.f32 0.03125, %v45_v17 }
 0x120   :  { %v51_v19 = vadd.f32 1e-05, %v49_v18 }
 0x121   :  { %v48_v20 = vpop.xlane.xlu1 %47 }
 0x122   :  { %183 = vrsqrt.f32 %v51_v19  ;;  %v50_v21 = vmul.f32 0.03125, %v48_v20 }
 0x124   :  { %v52_v22 = vadd.f32 1e-05, %v50_v21 }
 0x126   :  { %185 = vrsqrt.f32 %v52_v22 }
 0x12f   :  { %v184_v23 = vpop.eup %183 }
 0x130   :  { %v55_v24 = vmul.f32 %v184_v23, %v39_v6 }
 0x132   :  { %v64_v28 = vmul.f32 %v162_v25, %v55_v24 }
 0x133   :  { %v186_v26 = vpop.eup %185 }
 0x134   :  { %v56_v27 = vmul.f32 %v186_v26, %v40_v10  ;;  %v73_v31 = vadd.f32 %v163_v29, %v64_v28 }
 0x136   :  { %v65_v30 = vmul.f32 %v162_v25, %v56_v27 }
 0x138   :  { %v74_v32 = vadd.f32 %v163_v29, %v65_v30 }
 0x13a   :  { %v75_v33 = vpack.c.bf16 %v74_v32, %v73_v31 }
 0x13c   :  { %176 = vmatmul.mubr.msk.bf16.vlgmr.msra.gmra.mxu0 %vm29_vm0, %v75_v33 }
 0x1fc   :  { %v131_v35 = vpop.f32.mrf.mxu0 }
 0x1fd   :  { %v154_v36 = vadd.f32 %v167_v34, %v131_v35 }
 0x1fe   :  { %v177_v37 = vpop.f32.mrf.mxu0 }
 0x1ff   :  { %156 = vst [vmem:[%s256_s5] sm:$0xff] %v154_v36 }
 0x200   :  { %v134_v38 = vpop.f32.mrf.mxu0 }
 0x201   :  { %v155_v39 = vadd.f32 %v167_v34, %v134_v38 }
 0x202   :  { %v178_v40 = vpop.f32.mrf.mxu0 }
 0x203   :  { %157 = vst [vmem:[%s256_s5 + $0x8] sm:$0xff] %v155_v39 }

// kernel: vit3d_unetr_forward.31
= control target key start
LH: loop header
LB: loop body
LE: loop exit
PB: predicated region body
PF: predicated region fallthrough
CT: control target
= control target key end

     0   :  { %vm29_vm0 = vcmask 261120   ;;  %v249_v14 = vmov 0.0   ;;  %vm250_vm1 = vmmov 0   ;;  %s313_s0 = inlined_call_operand.vmem [shape: f32[16,32], index: 0, kind: input, shape index: {}]   ;;  %s314_s1 = inlined_call_operand.vmem [shape: bf16[32,128], index: 1, kind: input, shape index: {}]   ;;  %s315_s3 = inlined_call_operand.vmem [shape: f32[1,32], index: 3, kind: input, shape index: {}]   ;;  %s316_s4 = inlined_call_operand.vmem [shape: f32[1,32], index: 4, kind: input, shape index: {}]   ;;  %s317_s2 = inlined_call_operand.vmem [shape: f32[1,128], index: 2, kind: input, shape index: {}]   ;;  %s318_s5 = inlined_call_operand.vmem [shape: f32[16,128], index: 5, kind: output, shape index: {}]  }
   0x1   :  { %v27_v0 = vld [vmem:[%s313_s0] sm:$0xff]  ;;  %v28_v1 = vld [vmem:[%s313_s0 + $0x8] sm:$0xff]  ;;  %225 = vmatprep.subr.bf16.mxu0 %v249_v14  ;;  %229 = vmatprep.mubr.msk.bf16.mxu0 %vm250_vm1, %v249_v14 }
   0x2   :  { %v30_v2 = vsel %vm29_vm0, %v27_v0, 0.0  ;;  %v33_v3 = vsel %vm29_vm0, %v28_v1, 0.0  ;;  %v235_v15 = vld [vmem:[%s314_s1 + $0x8] sm:$0xff]   ;;  %v236_v16 = vld [vmem:[%s314_s1] sm:$0xff]  }
   0x3   :  { %31 = vadd.xlane.f32.xlu0 %v30_v2  ;;  %226 = vmatpush3.bf16.msra.mxu0 %v235_v15  ;;  %v216_v25 = vld [vmem:[%s315_s3] ss:$0 sm:$0xff] }
   0x4   :  { %227 = vmatprep.subr.bf16.mxu0 %v249_v14  ;;  %v217_v29 = vld [vmem:[%s316_s4] ss:$0 sm:$0xff] }
   0x5   :  { %v221_v34 = vld [vmem:[%s317_s2] ss:$0 sm:$0xff] }
   0x7   :  { %34 = vadd.xlane.f32.xlu0 %v33_v3  ;;  %228 = vmatpush3.bf16.msra.mxu0 %v236_v16 }
  0x8c   :  { %v32_v4 = vpop.xlane.xlu0 %31 }
  0x8d   :  { %v37_v5 = vmul.f32 0.03125, %v32_v4 }
  0x8f   :  { %v39_v6 = vsub.f32 %v27_v0, %v37_v5 }
  0x90   :  { %v35_v7 = vpop.xlane.xlu0 %34 }
  0x91   :  { %v38_v8 = vmul.f32 0.03125, %v35_v7  ;;  %v41_v9 = vmul.f32 %v39_v6, %v39_v6 }
  0x93   :  { %v40_v10 = vsub.f32 %v28_v1, %v38_v8  ;;  %v43_v11 = vsel %vm29_vm0, %v41_v9, 0.0 }
  0x94   :  { %44 = vadd.xlane.f32.xlu1 %v43_v11 }
  0x95   :  { %v42_v12 = vmul.f32 %v40_v10, %v40_v10 }
  0x97   :  { %v46_v13 = vsel %vm29_vm0, %v42_v12, 0.0 }
  0x98   :  { %47 = vadd.xlane.f32.xlu1 %v46_v13 }
 0x11d   :  { %v45_v17 = vpop.xlane.xlu1 %44 }
 0x11e   :  { %v49_v18 = vmul.f32 0.03125, %v45_v17 }
 0x120   :  { %v51_v19 = vadd.f32 1e-05, %v49_v18 }
 0x121   :  { %v48_v20 = vpop.xlane.xlu1 %47 }
 0x122   :  { %237 = vrsqrt.f32 %v51_v19  ;;  %v50_v21 = vmul.f32 0.03125, %v48_v20 }
 0x124   :  { %v52_v22 = vadd.f32 1e-05, %v50_v21 }
 0x126   :  { %239 = vrsqrt.f32 %v52_v22 }
 0x12f   :  { %v238_v23 = vpop.eup %237 }
 0x130   :  { %v55_v24 = vmul.f32 %v238_v23, %v39_v6 }
 0x132   :  { %v64_v28 = vmul.f32 %v216_v25, %v55_v24 }
 0x133   :  { %v240_v26 = vpop.eup %239 }
 0x134   :  { %v56_v27 = vmul.f32 %v240_v26, %v40_v10  ;;  %v73_v31 = vadd.f32 %v217_v29, %v64_v28 }
 0x136   :  { %v65_v30 = vmul.f32 %v216_v25, %v56_v27 }
 0x138   :  { %v74_v32 = vadd.f32 %v217_v29, %v65_v30 }
 0x13a   :  { %v75_v33 = vpack.c.bf16 %v74_v32, %v73_v31 }
 0x13c   :  { %230 = vmatmul.mubr.msk.bf16.vlgmr.msra.gmra.mxu0 %vm29_vm0, %v75_v33 }
 0x1fc   :  { %v131_v35 = vpop.f32.mrf.mxu0 }
 0x1fd   :  { %v154_v36 = vadd.f32 %v221_v34, %v131_v35 }
 0x1fe   :  { %v231_v37 = vpop.f32.mrf.mxu0 }
 0x1ff   :  { %v158_v38 = vmul.f32 0.70710677, %v154_v36  ;;  %v156_v19 = vmul.f32 0.5, %v154_v36 }
 0x200   :  { %v134_v39 = vpop.f32.mrf.mxu0 }
 0x201   :  { %v160_v40 = vand.u32 2147483647, %v158_v38  ;;  %v155_v41 = vadd.f32 %v221_v34, %v134_v39  ;;  %vm200_vm2 = vcmp.ge.f32.partialorder %v158_v38, 0.0 }
 0x202   :  { %v232_v42 = vpop.f32.mrf.mxu0 }
 0x203   :  { %v162_v43 = vmul.f32 0.3275911, %v160_v40  ;;  %v159_v44 = vmul.f32 0.70710677, %v155_v41  ;;  %v188_v49 = vsub.f32 0.0, %v160_v40  ;;  %v157_v24 = vmul.f32 0.5, %v155_v41 }
 0x205   :  { %v164_v45 = vadd.f32 1.0, %v162_v43  ;;  %v161_v46 = vand.u32 2147483647, %v159_v44  ;;  %v190_v50 = vmul.f32 %v188_v49, %v160_v40  ;;  %vm201_vm3 = vcmp.ge.f32.partialorder %v159_v44, 0.0 }
 0x207   :  { %241 = vrcp.f32 %v164_v45  ;;  %v163_v47 = vmul.f32 0.3275911, %v161_v46  ;;  %v189_v51 = vsub.f32 0.0, %v161_v46  ;;  %v192_v54 = vmul.f32 1.442695, %v190_v50 }
 0x209   :  { %v165_v48 = vadd.f32 1.0, %v163_v47  ;;  %v191_v55 = vmul.f32 %v189_v51, %v161_v46 }
 0x20b   :  { %243 = vrcp.f32 %v165_v48  ;;  %v194_v60 = vmul.f32 1.442695, %v191_v55 }
 0x20c   :  { %245 = vpow2.f32 %v192_v54 }
 0x20d   :  { %247 = vpow2.f32 %v194_v60 }
 0x214   :  { %v242_v52 = vpop.eup %241 }
 0x215   :  { %v170_v53 = vmul.f32 1.0614054, %v242_v52 }
 0x217   :  { %v172_v56 = vadd.f32 -1.4531521, %v170_v53 }
 0x218   :  { %v244_v57 = vpop.eup %243 }
 0x219   :  { %v174_v58 = vmul.f32 %v242_v52, %v172_v56  ;;  %v171_v59 = vmul.f32 1.0614054, %v244_v57  ;;  %v246_v9 = vpop.eup %245 }
 0x21a   :  { %v248_v14 = vpop.eup %247 }
 0x21b   :  { %v176_v61 = vadd.f32 1.4214138, %v174_v58  ;;  %v173_v62 = vadd.f32 -1.4531521, %v171_v59 }
 0x21d   :  { %v178_v63 = vmul.f32 %v242_v52, %v176_v61  ;;  %v175_v0 = vmul.f32 %v244_v57, %v173_v62 }
 0x21f   :  { %v180_v1 = vadd.f32 -0.28449672, %v178_v63  ;;  %v177_v2 = vadd.f32 1.4214138, %v175_v0 }
 0x221   :  { %v182_v3 = vmul.f32 %v242_v52, %v180_v1  ;;  %v179_v4 = vmul.f32 %v244_v57, %v177_v2 }
 0x223   :  { %v184_v5 = vadd.f32 0.2548296, %v182_v3  ;;  %v181_v6 = vadd.f32 -0.28449672, %v179_v4 }
 0x225   :  { %v186_v7 = vmul.f32 %v242_v52, %v184_v5  ;;  %v183_v8 = vmul.f32 %v244_v57, %v181_v6 }
 0x227   :  { %v196_v10 = vmul.f32 %v246_v9, %v186_v7  ;;  %v185_v11 = vadd.f32 0.2548296, %v183_v8 }
 0x229   :  { %v198_v12 = vsub.f32 1.0, %v196_v10  ;;  %v187_v13 = vmul.f32 %v244_v57, %v185_v11 }
 0x22b   :  { %v202_v15 = vsub.f32 0.0, %v198_v12  ;;  %v197_v16 = vmul.f32 %v248_v14, %v187_v13 }
 0x22d   :  { %v204_v17 = vsel %vm200_vm2, %v198_v12, %v202_v15  ;;  %v199_v18 = vsub.f32 1.0, %v197_v16 }
 0x22e   :  { %v206_v20 = vadd.f32 1.0, %v204_v17 }
 0x22f   :  { %v203_v21 = vsub.f32 0.0, %v199_v18 }
 0x230   :  { %v208_v22 = vmul.f32 %v206_v20, %v156_v19 }
 0x231   :  { %v205_v23 = vsel %vm201_vm3, %v199_v18, %v203_v21 }
 0x232   :  { %210 = vst [vmem:[%s318_s5] sm:$0xff] %v208_v22  ;;  %v207_v25 = vadd.f32 1.0, %v205_v23 }
 0x234   :  { %v209_v26 = vmul.f32 %v207_v25, %v157_v24 }
 0x236   :  { %211 = vst [vmem:[%s318_s5 + $0x8] sm:$0xff] %v209_v26 }

// kernel: vit3d_unetr_forward.39
= control target key start
LH: loop header
LB: loop body
LE: loop exit
PB: predicated region body
PF: predicated region fallthrough
CT: control target
= control target key end

     0   :  { %s982_s15 = smov 0   ;;  %s984_s16 = smov 0   ;;  %s1105_s0 = inlined_call_operand.vmem [shape: f32[16,2048], index: 0, kind: input, shape index: {}]   ;;  %s1106_s1 = inlined_call_operand.vmem [shape: bf16[2048,128], index: 1, kind: input, shape index: {}]   ;;  %s1107_s2 = inlined_call_operand.vmem [shape: f32[1,128], index: 2, kind: input, shape index: {}]   ;;  %s1108_s3 = inlined_call_operand.vmem [shape: f32[1,128], index: 3, kind: input, shape index: {}]   ;;  %s1109_s4 = inlined_call_operand.vmem [shape: f32[16,128], index: 4, kind: output, shape index: {}]  }
   0x1   :  { %s986_s17 = smov 0   ;;  %s988_s18 = smov 0  }
   0x2   :  { %s990_s19 = smov 0  }
   0x3 LB: > { %s23_s20 = sadd.s32 1, %s950_s18  ;;  %p42_p1 = scmp.ne.s32.totalorder %s942_s16, %s938_s15  ;;  %s954_s19 = sphi %s990_s19, %s14_s19   ;;  %s950_s18 = sphi %s988_s18, %s1113_s18   ;;  %s946_s17 = sphi %s986_s17, %s1112_s17   ;;  %s942_s16 = sphi %s984_s16, %s1111_s16   ;;  %s938_s15 = sphi %s982_s15, %s1110_s15  }
   0x4   : > { %p24_p0 = scmp.ge.s32.totalorder %s23_s20, 4  ;;  %p43_p2 = scmp.eq.s32.totalorder %s954_s19, 0 }
   0x5   : > { %s35_s22 = sadd.s32 1, %s942_s16  ;;  %p750_p5 = scmp.ge.s32.totalorder %s954_s19, 4 }
   0x6   : > { %s1115_s20 = smov (%p24_p0, %s23_s20), 0  ;;  %p44_p3 = por %p43_p2, %p42_p1 }
   0x7   : > { %s31_s21 = ssub.s32 %s950_s18, %s1115_s20  ;;  %168 = sbr.rel (%p750_p5) target bundleno = 20 (0x14), region = 24 }
   0x8   : > { %p33_p4 = scmp.eq.s32.totalorder %s31_s21, 0 }
   0xa   : > { %s1017_s23 = scalar_select %p33_p4, %s942_s16, %s35_s22  }
   0xc   : > { %171 = sbr.rel (!%p44_p3) target bundleno = 20 (0x14), region = 28  ;;  %s173_s24 = sand.u32 (%p44_p3), 1, %s942_s16  }
   0xd   : > { %s798_s25 = sshll.u32 (%p44_p3), %s950_s18, 5  ;;  %s751_s26 = sshll.u32 (%p44_p3), %s173_s24, 6 }
   0xe   : > { %s181_s29 = scalar_lea.vmem (%p44_p3), %s1105_s0, %s798_s25  ;;  %s175_s30 = scalar_lea.vmem (%p44_p3), [#allocation3], %s751_s26 }
   0xf   : > { %v194_v0 = vld [vmem:[%s181_s29] sm:$0xff] (%p44_p3)  ;;  %v196_v1 = vld [vmem:[%s181_s29 + $0x8] sm:$0xff] (%p44_p3)  ;;  %v198_v2 = vld [vmem:[%s181_s29 + $0x10] sm:$0xff] (%p44_p3) }
  0x10   : > { %195 = vst [vmem:[%s175_s30] sm:$0xff] (%p44_p3), %v194_v0  ;;  %197 = vst [vmem:[%s175_s30 + $0x8] sm:$0xff] (%p44_p3), %v196_v1  ;;  %v200_v3 = vld [vmem:[%s181_s29 + $0x18] sm:$0xff] (%p44_p3)  ;;  %v202_v4 = vld [vmem:[%s181_s29 + $0x80] sm:$0xff] (%p44_p3) }
  0x11   : > { %199 = vst [vmem:[%s175_s30 + $0x10] sm:$0xff] %v198_v2  ;;  %v204_v5 = vld [vmem:[%s181_s29 + $0x88] sm:$0xff]  ;;  %201 = vst [vmem:[%s175_s30 + $0x18] sm:$0xff] %v200_v3  ;;  %v206_v6 = vld [vmem:[%s181_s29 + $0x90] sm:$0xff] }
  0x12   : > { %203 = vst [vmem:[%s175_s30 + $0x20] sm:$0xff] %v202_v4  ;;  %205 = vst [vmem:[%s175_s30 + $0x28] sm:$0xff] %v204_v5  ;;  %v208_v7 = vld [vmem:[%s181_s29 + $0x98] sm:$0xff] }
  0x13   : > { %207 = vst [vmem:[%s175_s30 + $0x30] sm:$0xff] %v206_v6  ;;  %209 = vst [vmem:[%s175_s30 + $0x38] sm:$0xff] %v208_v7 }
  0x14 PF: > { %p754_p6 = scmp.ge.s32.totalorder %s954_s19, 1  ;;  %p223_p7 = scmp.lt.s32.totalorder %s954_s19, 5 }
  0x16   : > { %p224_p8 = pnand %p754_p6, %p223_p7 }
  0x17   : > { %s230_s5 = sand.u32 (!%p224_p8), 1, %s938_s15   ;;  %s756_s6 = sshll.u32 (!%p224_p8), %s946_s17, 6 }
  0x18   : > { %227 = sbr.rel (%p224_p8) target bundleno = 291 (0x123), region = 55  ;;  %s755_s7 = sshll.u32 (!%p224_p8), %s230_s5, 6 }
  0x19   : > { %p263_p9 = scmp.lt.s32.totalorder (!%p224_p8), %s756_s6, 255  ;;  %s1034_s12 = scalar_lea.vmem (!%p224_p8), [#allocation3], %s755_s7 }
  0x1a   : > { %p758_p10 = scmp.ne.s32.totalorder (!%p224_p8), %s946_s17, 0 }
  0x1d   : > { %s1117_s6 = smov (!%p263_p9, %s756_s6), 255  ;;  %278 = sbr.rel (%p758_p10) target bundleno = 36 (0x24), region = 63 }
  0x1e   : > { %s757_s8 = sshll.u32 %s1117_s6, 2 }
  0x1f   : > { %s1032_s11 = scalar_lea.vmem %s1106_s1, %s757_s8 }
  0x22   : > { %v956_v8 = vmov 0.0  }
  0x23   : > { %279 = vst [vmem:[#allocation2] sm:$0xff] %v956_v8  ;;  %280 = vst [vmem:[#allocation2 + $0x8] sm:$0xff] %v956_v8 }
  0x24 PF: > { %v884_v9 = vld [vmem:[%s1032_s11 + $0x78] sm:$0xff]   ;;  %v888_v13 = vld [vmem:[%s1032_s11 + $0x70] sm:$0xff]   ;;  %v892_v17 = vld [vmem:[%s1032_s11 + $0x68] sm:$0xff]   ;;  %p791_p11 = scmp.ne.s32.totalorder %s946_s17, 3 }
  0x25   : > { %v885_v10 = vld [vmem:[%s1032_s11 + $0xf8] sm:$0xff]   ;;  %799 = vmatprep.subr.bf16.mxu0 %v884_v9  ;;  %v889_v14 = vld [vmem:[%s1032_s11 + $0xf0] sm:$0xff]   ;;  %v893_v18 = vld [vmem:[%s1032_s11 + $0xe8] sm:$0xff]  }
  0x26   : > { %v886_v11 = vld [vmem:[%s1032_s11 + $0x38] sm:$0xff]   ;;  %821 = vmatprep.subr.bf16.mxu1 %v885_v10  ;;  %v890_v15 = vld [vmem:[%s1032_s11 + $0x30] sm:$0xff]   ;;  %v894_v19 = vld [vmem:[%s1032_s11 + $0x28] sm:$0xff]  }
  0x27   : > { %v887_v12 = vld [vmem:[%s1032_s11 + $0xb8] sm:$0xff]   ;;  %800 = vmatpush3.bf16.msra.mxu0 %v886_v11  ;;  %v891_v16 = vld [vmem:[%s1032_s11 + $0xb0] sm:$0xff]   ;;  %v895_v20 = vld [vmem:[%s1032_s11 + $0xa8] sm:$0xff]  }
  0x28   : > { %822 = vmatpush3.bf16.msra.mxu1 %v887_v12  ;;  %801 = vmatprep.subr.bf16.mxu0 %v888_v13  ;;  %v896_v21 = vld [vmem:[%s1032_s11 + $0x60] sm:$0xff]   ;;  %v900_v25 = vld [vmem:[%s1032_s11 + $0x58] sm:$0xff]   ;;  %v904_v29 = vld [vmem:[%s1032_s11 + $0x50] sm:$0xff]  }
  0x29   : > { %823 = vmatprep.subr.bf16.mxu1 %v889_v14  ;;  %v897_v22 = vld [vmem:[%s1032_s11 + $0xe0] sm:$0xff]   ;;  %v901_v26 = vld [vmem:[%s1032_s11 + $0xd8] sm:$0xff]   ;;  %v905_v30 = vld [vmem:[%s1032_s11 + $0xd0] sm:$0xff]  }
  0x2a   : > { %v898_v23 = vld [vmem:[%s1032_s11 + $0x20] sm:$0xff]   ;;  %v902_v27 = vld [vmem:[%s1032_s11 + $0x18] sm:$0xff]   ;;  %v906_v31 = vld [vmem:[%s1032_s11 + $0x10] sm:$0xff]  }
  0x2b   : > { %802 = vmatpush3.bf16.msra.mxu0 %v890_v15  ;;  %v899_v24 = vld [vmem:[%s1032_s11 + $0xa0] sm:$0xff]   ;;  %v903_v28 = vld [vmem:[%s1032_s11 + $0x98] sm:$0xff]   ;;  %v907_v32 = vld [vmem:[%s1032_s11 + $0x90] sm:$0xff]  }
  0x2c   : > { %824 = vmatpush3.bf16.msra.mxu1 %v891_v16  ;;  %803 = vmatprep.subr.bf16.mxu0 %v892_v17  ;;  %v908_v33 = vld [vmem:[%s1032_s11 + $0x48] sm:$0xff]   ;;  %v912_v37 = vld [vmem:[%s1032_s11 + $0x40] sm:$0xff]   ;;  %v282_v41 = vld [vmem:[%s1034_s12 + $0x8] sm:$0xff] }
  0x2d   : > { %825 = vmatprep.subr.bf16.mxu1 %v893_v18  ;;  %v909_v34 = vld [vmem:[%s1032_s11 + $0xc8] sm:$0xff]   ;;  %v913_v38 = vld [vmem:[%s1032_s11 + $0xc0] sm:$0xff]   ;;  %v286_v42 = vld [vmem:[%s1034_s12 + $0x28] sm:$0xff] }
  0x2e   : > { %v910_v35 = vld [vmem:[%s1032_s11 + $0x8] sm:$0xff]   ;;  %v914_v39 = vld [vmem:[%s1032_s11] sm:$0xff]   ;;  %v290_v44 = vpack.c.bf16 %v286_v42, %v282_v41  ;;  %v281_v46 = vld [vmem:[%s1034_s12] sm:$0xff] }
  0x2f   : > { %804 = vmatpush3.bf16.msra.mxu0 %v894_v19  ;;  %v911_v36 = vld [vmem:[%s1032_s11 + $0x88] sm:$0xff]   ;;  %v915_v40 = vld [vmem:[%s1032_s11 + $0x80] sm:$0xff]   ;;  %v285_v47 = vld [vmem:[%s1034_s12 + $0x20] sm:$0xff] }
  0x30   : > { %826 = vmatpush3.bf16.msra.mxu1 %v895_v20  ;;  %805 = vmatprep.subr.bf16.mxu0 %v896_v21  ;;  %v284_v43 = vld [vmem:[%s1034_s12 + $0x18] sm:$0xff]  ;;  %v289_v49 = vpack.c.bf16 %v285_v47, %v281_v46  ;;  %v283_v50 = vld [vmem:[%s1034_s12 + $0x10] sm:$0xff] }
  0x31   : > { %827 = vmatprep.subr.bf16.mxu1 %v897_v22  ;;  %v288_v45 = vld [vmem:[%s1034_s12 + $0x38] sm:$0xff]  ;;  %v287_v51 = vld [vmem:[%s1034_s12 + $0x30] sm:$0xff]  ;;  %583 = vmatprep.mubr.bf16.mxu0 %v290_v44 }
  0x32   : > { %v292_v48 = vpack.c.bf16 %v288_v45, %v284_v43  ;;  %v291_v52 = vpack.c.bf16 %v287_v51, %v283_v50  ;;  %v293_v60 = vld [vmem:[#allocation2] sm:$0xff]  ;;  %v294_v4 = vld [vmem:[#allocation2 + $0x8] sm:$0xff] }
  0x33   : > { %806 = vmatpush3.bf16.msra.mxu0 %v898_v23 }
  0x34   : > { %828 = vmatpush3.bf16.msra.mxu1 %v899_v24  ;;  %807 = vmatprep.subr.bf16.mxu0 %v900_v25 }
  0x35   : > { %829 = vmatprep.subr.bf16.mxu1 %v901_v26  ;;  %624 = vmatprep.mubr.bf16.mxu1 %v292_v48 }
  0x37   : > { %808 = vmatpush3.bf16.msra.mxu0 %v902_v27 }
  0x38   : > { %830 = vmatpush3.bf16.msra.mxu1 %v903_v28  ;;  %809 = vmatprep.subr.bf16.mxu0 %v904_v29 }
  0x39   : > { %831 = vmatprep.subr.bf16.mxu1 %v905_v30 }
  0x3b   : > { %810 = vmatpush3.bf16.msra.mxu0 %v906_v31 }
  0x3c   : > { %832 = vmatpush3.bf16.msra.mxu1 %v907_v32  ;;  %811 = vmatprep.subr.bf16.mxu0 %v908_v33 }
  0x3d   : > { %833 = vmatprep.subr.bf16.mxu1 %v909_v34 }
  0x3f   : > { %812 = vmatpush3.bf16.msra.mxu0 %v910_v35 }
  0x40   : > { %834 = vmatpush3.bf16.msra.mxu1 %v911_v36  ;;  %813 = vmatprep.subr.bf16.mxu0 %v912_v37 }
  0x41   : > { %835 = vmatprep.subr.bf16.mxu1 %v913_v38 }
  0x43   : > { %814 = vmatpush3.bf16.msra.mxu0 %v914_v39 }
  0x44   : > { %836 = vmatpush3.bf16.msra.mxu1 %v915_v40 }
  0x46   : > { %584 = vmatmul.mubr.bf16.vlgmr.msra.gmra.mxu0 %v289_v49 }
  0x47   : > { %625 = vmatmul.mubr.bf16.vlgmr.msra.gmra.mxu1 %v291_v52 }
 0x106   : > { %v815_v53 = vpop.f32.mrf.mxu0 }
 0x107   : > { %v837_v54 = vpop.f32.mrf.mxu1 }
 0x108   : > { %v816_v55 = vpop.f32.mrf.mxu0 }
 0x109   : > { %v817_v56 = vadd.f32 %v816_v55, %v815_v53  ;;  %v838_v57 = vpop.f32.mrf.mxu1 }
 0x10a   : > { %v839_v58 = vadd.f32 %v838_v57, %v837_v54  ;;  %v818_v59 = vpop.f32.mrf.mxu0 }
 0x10b   : > { %v840_v61 = vpop.f32.mrf.mxu1 }
 0x10c   : > { %v627_v62 = vadd.f32 %v839_v58, %v817_v56  ;;  %v819_v63 = vpop.f32.mrf.mxu0 }
 0x10d   : > { %v820_v0 = vadd.f32 %v819_v63, %v818_v59  ;;  %v841_v1 = vpop.f32.mrf.mxu1 }
 0x10e   : > { %v633_v2 = vadd.f32 %v627_v62, %v293_v60  ;;  %v842_v3 = vadd.f32 %v841_v1, %v840_v61 }
 0x110   : > { %635 = vst [vmem:[#allocation2] sm:$0xff] %v633_v2  ;;  %v630_v5 = vadd.f32 %v842_v3, %v820_v0  ;;  %640 = sbr.rel (%p791_p11) target bundleno = 291 (0x123), region = 67 }
 0x112   : > { %v634_v6 = vadd.f32 %v630_v5, %v294_v4 }
 0x114   : > { %636 = vst [vmem:[#allocation2 + $0x8] sm:$0xff] %v634_v6 }
 0x115   : > { %v792_v8 = vld [vmem:[%s1107_s2] ss:$0 sm:$0xff] }
 0x116   : > { %v793_v9 = vld [vmem:[%s1108_s3] ss:$0 sm:$0xff] }
 0x117   : > { %v641_v7 = vld [vmem:[#allocation2] sm:$0xff] }
 0x118   : > { %v650_v10 = vmul.f32 %v792_v8, %v641_v7 }
 0x11a   : > { %v659_v13 = vadd.f32 %v793_v9, %v650_v10 }
 0x11b   : > { %v642_v11 = vld [vmem:[#allocation2 + $0x8] sm:$0xff] }
 0x11c   : > { %v651_v12 = vmul.f32 %v792_v8, %v642_v11  ;;  %v661_v15 = vmax.f32 %v659_v13, 0.0 }
 0x11e   : > { %v660_v14 = vadd.f32 %v793_v9, %v651_v12  ;;  %663 = vst [vmem:[%s1109_s4] sm:$0xff] %v661_v15 }
 0x120   : > { %v662_v16 = vmax.f32 %v660_v14, 0.0 }
 0x122   : > { %664 = vst [vmem:[%s1109_s4 + $0x8] sm:$0xff] %v662_v16 }
 0x123 PF: > { %s14_s19 = sadd.s32 1, %s954_s19   ;;  %s1110_s15 = smov %s942_s16 }
 0x124   : > { %p11_p12 = scmp.ge.s32.totalorder %s14_s19, 6   ;;  %s1111_s16 = smov %s1017_s23 }
 0x125   : > { %s1112_s17 = smov %s950_s18  ;;  %s1113_s18 = smov %s1115_s20 }
 0x126   :  { %13 = sbr.rel (!%p11_p12) target bundleno = 3 (0x3), region = 105 }

// kernel: vit3d_unetr_forward.40
= control target key start
LH: loop header
LB: loop body
LE: loop exit
PB: predicated region body
PF: predicated region fallthrough
CT: control target
= control target key end

     0   :  { %s982_s15 = smov 0   ;;  %s984_s16 = smov 0   ;;  %s1105_s0 = inlined_call_operand.vmem [shape: f32[16,1024], index: 0, kind: input, shape index: {}]   ;;  %s1106_s1 = inlined_call_operand.vmem [shape: bf16[1024,128], index: 1, kind: input, shape index: {}]   ;;  %s1107_s2 = inlined_call_operand.vmem [shape: f32[1,128], index: 2, kind: input, shape index: {}]   ;;  %s1108_s3 = inlined_call_operand.vmem [shape: f32[1,128], index: 3, kind: input, shape index: {}]   ;;  %s1109_s4 = inlined_call_operand.vmem [shape: f32[16,128], index: 4, kind: output, shape index: {}]  }
   0x1   :  { %s986_s17 = smov 0   ;;  %s988_s18 = smov 0  }
   0x2   :  { %s990_s19 = smov 0  }
   0x3 LB: > { %s23_s20 = sadd.s32 1, %s950_s18  ;;  %p42_p1 = scmp.ne.s32.totalorder %s942_s16, %s938_s15  ;;  %s954_s19 = sphi %s990_s19, %s14_s19   ;;  %s950_s18 = sphi %s988_s18, %s1113_s18   ;;  %s946_s17 = sphi %s986_s17, %s1112_s17   ;;  %s942_s16 = sphi %s984_s16, %s1111_s16   ;;  %s938_s15 = sphi %s982_s15, %s1110_s15  }
   0x4   : > { %p24_p0 = scmp.ge.s32.totalorder %s23_s20, 2  ;;  %p43_p2 = scmp.eq.s32.totalorder %s954_s19, 0 }
   0x5   : > { %s35_s22 = sadd.s32 1, %s942_s16  ;;  %p750_p5 = scmp.ge.s32.totalorder %s954_s19, 2 }
   0x6   : > { %s1115_s20 = smov (%p24_p0, %s23_s20), 0  ;;  %p44_p3 = por %p43_p2, %p42_p1 }
   0x7   : > { %s31_s21 = ssub.s32 %s950_s18, %s1115_s20  ;;  %168 = sbr.rel (%p750_p5) target bundleno = 20 (0x14), region = 24 }
   0x8   : > { %p33_p4 = scmp.eq.s32.totalorder %s31_s21, 0 }
   0xa   : > { %s1017_s23 = scalar_select %p33_p4, %s942_s16, %s35_s22  }
   0xc   : > { %171 = sbr.rel (!%p44_p3) target bundleno = 20 (0x14), region = 28  ;;  %s173_s24 = sand.u32 (%p44_p3), 1, %s942_s16  }
   0xd   : > { %s798_s25 = sshll.u32 (%p44_p3), %s950_s18, 5  ;;  %s751_s26 = sshll.u32 (%p44_p3), %s173_s24, 6 }
   0xe   : > { %s181_s29 = scalar_lea.vmem (%p44_p3), %s1105_s0, %s798_s25  ;;  %s175_s30 = scalar_lea.vmem (%p44_p3), [#allocation3], %s751_s26 }
   0xf   : > { %v194_v0 = vld [vmem:[%s181_s29] sm:$0xff] (%p44_p3)  ;;  %v196_v1 = vld [vmem:[%s181_s29 + $0x8] sm:$0xff] (%p44_p3)  ;;  %v198_v2 = vld [vmem:[%s181_s29 + $0x10] sm:$0xff] (%p44_p3) }
  0x10   : > { %195 = vst [vmem:[%s175_s30] sm:$0xff] (%p44_p3), %v194_v0  ;;  %197 = vst [vmem:[%s175_s30 + $0x8] sm:$0xff] (%p44_p3), %v196_v1  ;;  %v200_v3 = vld [vmem:[%s181_s29 + $0x18] sm:$0xff] (%p44_p3)  ;;  %v202_v4 = vld [vmem:[%s181_s29 + $0x40] sm:$0xff] (%p44_p3) }
  0x11   : > { %199 = vst [vmem:[%s175_s30 + $0x10] sm:$0xff] %v198_v2  ;;  %v204_v5 = vld [vmem:[%s181_s29 + $0x48] sm:$0xff]  ;;  %201 = vst [vmem:[%s175_s30 + $0x18] sm:$0xff] %v200_v3  ;;  %v206_v6 = vld [vmem:[%s181_s29 + $0x50] sm:$0xff] }
  0x12   : > { %203 = vst [vmem:[%s175_s30 + $0x20] sm:$0xff] %v202_v4  ;;  %205 = vst [vmem:[%s175_s30 + $0x28] sm:$0xff] %v204_v5  ;;  %v208_v7 = vld [vmem:[%s181_s29 + $0x58] sm:$0xff] }
  0x13   : > { %207 = vst [vmem:[%s175_s30 + $0x30] sm:$0xff] %v206_v6  ;;  %209 = vst [vmem:[%s175_s30 + $0x38] sm:$0xff] %v208_v7 }
  0x14 PF: > { %p754_p6 = scmp.ge.s32.totalorder %s954_s19, 1  ;;  %p223_p7 = scmp.lt.s32.totalorder %s954_s19, 3 }
  0x16   : > { %p224_p8 = pnand %p754_p6, %p223_p7 }
  0x17   : > { %s230_s5 = sand.u32 (!%p224_p8), 1, %s938_s15   ;;  %s756_s6 = sshll.u32 (!%p224_p8), %s946_s17, 6 }
  0x18   : > { %227 = sbr.rel (%p224_p8) target bundleno = 291 (0x123), region = 55  ;;  %s755_s7 = sshll.u32 (!%p224_p8), %s230_s5, 6 }
  0x19   : > { %p263_p9 = scmp.lt.s32.totalorder (!%p224_p8), %s756_s6, 127  ;;  %s1034_s12 = scalar_lea.vmem (!%p224_p8), [#allocation3], %s755_s7 }
  0x1a   : > { %p758_p10 = scmp.ne.s32.totalorder (!%p224_p8), %s946_s17, 0 }
  0x1d   : > { %s1117_s6 = smov (!%p263_p9, %s756_s6), 127  ;;  %278 = sbr.rel (%p758_p10) target bundleno = 36 (0x24), region = 63 }
  0x1e   : > { %s757_s8 = sshll.u32 %s1117_s6, 2 }
  0x1f   : > { %s1032_s11 = scalar_lea.vmem %s1106_s1, %s757_s8 }
  0x22   : > { %v956_v8 = vmov 0.0  }
  0x23   : > { %279 = vst [vmem:[#allocation2] sm:$0xff] %v956_v8  ;;  %280 = vst [vmem:[#allocation2 + $0x8] sm:$0xff] %v956_v8 }
  0x24 PF: > { %v884_v9 = vld [vmem:[%s1032_s11 + $0x78] sm:$0xff]   ;;  %v888_v13 = vld [vmem:[%s1032_s11 + $0x70] sm:$0xff]   ;;  %v892_v17 = vld [vmem:[%s1032_s11 + $0x68] sm:$0xff]   ;;  %p791_p11 = scmp.ne.s32.totalorder %s946_s17, 1 }
  0x25   : > { %v885_v10 = vld [vmem:[%s1032_s11 + $0xf8] sm:$0xff]   ;;  %799 = vmatprep.subr.bf16.mxu0 %v884_v9  ;;  %v889_v14 = vld [vmem:[%s1032_s11 + $0xf0] sm:$0xff]   ;;  %v893_v18 = vld [vmem:[%s1032_s11 + $0xe8] sm:$0xff]  }
  0x26   : > { %v886_v11 = vld [vmem:[%s1032_s11 + $0x38] sm:$0xff]   ;;  %821 = vmatprep.subr.bf16.mxu1 %v885_v10  ;;  %v890_v15 = vld [vmem:[%s1032_s11 + $0x30] sm:$0xff]   ;;  %v894_v19 = vld [vmem:[%s1032_s11 + $0x28] sm:$0xff]  }
  0x27   : > { %v887_v12 = vld [vmem:[%s1032_s11 + $0xb8] sm:$0xff]   ;;  %800 = vmatpush3.bf16.msra.mxu0 %v886_v11  ;;  %v891_v16 = vld [vmem:[%s1032_s11 + $0xb0] sm:$0xff]   ;;  %v895_v20 = vld [vmem:[%s1032_s11 + $0xa8] sm:$0xff]  }
  0x28   : > { %822 = vmatpush3.bf16.msra.mxu1 %v887_v12  ;;  %801 = vmatprep.subr.bf16.mxu0 %v888_v13  ;;  %v896_v21 = vld [vmem:[%s1032_s11 + $0x60] sm:$0xff]   ;;  %v900_v25 = vld [vmem:[%s1032_s11 + $0x58] sm:$0xff]   ;;  %v904_v29 = vld [vmem:[%s1032_s11 + $0x50] sm:$0xff]  }
  0x29   : > { %823 = vmatprep.subr.bf16.mxu1 %v889_v14  ;;  %v897_v22 = vld [vmem:[%s1032_s11 + $0xe0] sm:$0xff]   ;;  %v901_v26 = vld [vmem:[%s1032_s11 + $0xd8] sm:$0xff]   ;;  %v905_v30 = vld [vmem:[%s1032_s11 + $0xd0] sm:$0xff]  }
  0x2a   : > { %v898_v23 = vld [vmem:[%s1032_s11 + $0x20] sm:$0xff]   ;;  %v902_v27 = vld [vmem:[%s1032_s11 + $0x18] sm:$0xff]   ;;  %v906_v31 = vld [vmem:[%s1032_s11 + $0x10] sm:$0xff]  }
  0x2b   : > { %802 = vmatpush3.bf16.msra.mxu0 %v890_v15  ;;  %v899_v24 = vld [vmem:[%s1032_s11 + $0xa0] sm:$0xff]   ;;  %v903_v28 = vld [vmem:[%s1032_s11 + $0x98] sm:$0xff]   ;;  %v907_v32 = vld [vmem:[%s1032_s11 + $0x90] sm:$0xff]  }
  0x2c   : > { %824 = vmatpush3.bf16.msra.mxu1 %v891_v16  ;;  %803 = vmatprep.subr.bf16.mxu0 %v892_v17  ;;  %v908_v33 = vld [vmem:[%s1032_s11 + $0x48] sm:$0xff]   ;;  %v912_v37 = vld [vmem:[%s1032_s11 + $0x40] sm:$0xff]   ;;  %v282_v41 = vld [vmem:[%s1034_s12 + $0x8] sm:$0xff] }
  0x2d   : > { %825 = vmatprep.subr.bf16.mxu1 %v893_v18  ;;  %v909_v34 = vld [vmem:[%s1032_s11 + $0xc8] sm:$0xff]   ;;  %v913_v38 = vld [vmem:[%s1032_s11 + $0xc0] sm:$0xff]   ;;  %v286_v42 = vld [vmem:[%s1034_s12 + $0x28] sm:$0xff] }
  0x2e   : > { %v910_v35 = vld [vmem:[%s1032_s11 + $0x8] sm:$0xff]   ;;  %v914_v39 = vld [vmem:[%s1032_s11] sm:$0xff]   ;;  %v290_v44 = vpack.c.bf16 %v286_v42, %v282_v41  ;;  %v281_v46 = vld [vmem:[%s1034_s12] sm:$0xff] }
  0x2f   : > { %804 = vmatpush3.bf16.msra.mxu0 %v894_v19  ;;  %v911_v36 = vld [vmem:[%s1032_s11 + $0x88] sm:$0xff]   ;;  %v915_v40 = vld [vmem:[%s1032_s11 + $0x80] sm:$0xff]   ;;  %v285_v47 = vld [vmem:[%s1034_s12 + $0x20] sm:$0xff] }
  0x30   : > { %826 = vmatpush3.bf16.msra.mxu1 %v895_v20  ;;  %805 = vmatprep.subr.bf16.mxu0 %v896_v21  ;;  %v284_v43 = vld [vmem:[%s1034_s12 + $0x18] sm:$0xff]  ;;  %v289_v49 = vpack.c.bf16 %v285_v47, %v281_v46  ;;  %v283_v50 = vld [vmem:[%s1034_s12 + $0x10] sm:$0xff] }
  0x31   : > { %827 = vmatprep.subr.bf16.mxu1 %v897_v22  ;;  %v288_v45 = vld [vmem:[%s1034_s12 + $0x38] sm:$0xff]  ;;  %v287_v51 = vld [vmem:[%s1034_s12 + $0x30] sm:$0xff]  ;;  %583 = vmatprep.mubr.bf16.mxu0 %v290_v44 }
  0x32   : > { %v292_v48 = vpack.c.bf16 %v288_v45, %v284_v43  ;;  %v291_v52 = vpack.c.bf16 %v287_v51, %v283_v50  ;;  %v293_v60 = vld [vmem:[#allocation2] sm:$0xff]  ;;  %v294_v4 = vld [vmem:[#allocation2 + $0x8] sm:$0xff] }
  0x33   : > { %806 = vmatpush3.bf16.msra.mxu0 %v898_v23 }
  0x34   : > { %828 = vmatpush3.bf16.msra.mxu1 %v899_v24  ;;  %807 = vmatprep.subr.bf16.mxu0 %v900_v25 }
  0x35   : > { %829 = vmatprep.subr.bf16.mxu1 %v901_v26  ;;  %624 = vmatprep.mubr.bf16.mxu1 %v292_v48 }
  0x37   : > { %808 = vmatpush3.bf16.msra.mxu0 %v902_v27 }
  0x38   : > { %830 = vmatpush3.bf16.msra.mxu1 %v903_v28  ;;  %809 = vmatprep.subr.bf16.mxu0 %v904_v29 }
  0x39   : > { %831 = vmatprep.subr.bf16.mxu1 %v905_v30 }
  0x3b   : > { %810 = vmatpush3.bf16.msra.mxu0 %v906_v31 }
  0x3c   : > { %832 = vmatpush3.bf16.msra.mxu1 %v907_v32  ;;  %811 = vmatprep.subr.bf16.mxu0 %v908_v33 }
  0x3d   : > { %833 = vmatprep.subr.bf16.mxu1 %v909_v34 }
  0x3f   : > { %812 = vmatpush3.bf16.msra.mxu0 %v910_v35 }
  0x40   : > { %834 = vmatpush3.bf16.msra.mxu1 %v911_v36  ;;  %813 = vmatprep.subr.bf16.mxu0 %v912_v37 }
  0x41   : > { %835 = vmatprep.subr.bf16.mxu1 %v913_v38 }
  0x43   : > { %814 = vmatpush3.bf16.msra.mxu0 %v914_v39 }
  0x44   : > { %836 = vmatpush3.bf16.msra.mxu1 %v915_v40 }
  0x46   : > { %584 = vmatmul.mubr.bf16.vlgmr.msra.gmra.mxu0 %v289_v49 }
  0x47   : > { %625 = vmatmul.mubr.bf16.vlgmr.msra.gmra.mxu1 %v291_v52 }
 0x106   : > { %v815_v53 = vpop.f32.mrf.mxu0 }
 0x107   : > { %v837_v54 = vpop.f32.mrf.mxu1 }
 0x108   : > { %v816_v55 = vpop.f32.mrf.mxu0 }
 0x109   : > { %v817_v56 = vadd.f32 %v816_v55, %v815_v53  ;;  %v838_v57 = vpop.f32.mrf.mxu1 }
 0x10a   : > { %v839_v58 = vadd.f32 %v838_v57, %v837_v54  ;;  %v818_v59 = vpop.f32.mrf.mxu0 }
 0x10b   : > { %v840_v61 = vpop.f32.mrf.mxu1 }
 0x10c   : > { %v627_v62 = vadd.f32 %v839_v58, %v817_v56  ;;  %v819_v63 = vpop.f32.mrf.mxu0 }
 0x10d   : > { %v820_v0 = vadd.f32 %v819_v63, %v818_v59  ;;  %v841_v1 = vpop.f32.mrf.mxu1 }
 0x10e   : > { %v633_v2 = vadd.f32 %v627_v62, %v293_v60  ;;  %v842_v3 = vadd.f32 %v841_v1, %v840_v61 }
 0x110   : > { %635 = vst [vmem:[#allocation2] sm:$0xff] %v633_v2  ;;  %v630_v5 = vadd.f32 %v842_v3, %v820_v0  ;;  %640 = sbr.rel (%p791_p11) target bundleno = 291 (0x123), region = 67 }
 0x112   : > { %v634_v6 = vadd.f32 %v630_v5, %v294_v4 }
 0x114   : > { %636 = vst [vmem:[#allocation2 + $0x8] sm:$0xff] %v634_v6 }
 0x115   : > { %v792_v8 = vld [vmem:[%s1107_s2] ss:$0 sm:$0xff] }
 0x116   : > { %v793_v9 = vld [vmem:[%s1108_s3] ss:$0 sm:$0xff] }
 0x117   : > { %v641_v7 = vld [vmem:[#allocation2] sm:$0xff] }
 0x118   : > { %v650_v10 = vmul.f32 %v792_v8, %v641_v7 }
 0x11a   : > { %v659_v13 = vadd.f32 %v793_v9, %v650_v10 }
 0x11b   : > { %v642_v11 = vld [vmem:[#allocation2 + $0x8] sm:$0xff] }
 0x11c   : > { %v651_v12 = vmul.f32 %v792_v8, %v642_v11  ;;  %v661_v15 = vmax.f32 %v659_v13, 0.0 }
 0x11e   : > { %v660_v14 = vadd.f32 %v793_v9, %v651_v12  ;;  %663 = vst [vmem:[%s1109_s4] sm:$0xff] %v661_v15 }
 0x120   : > { %v662_v16 = vmax.f32 %v660_v14, 0.0 }
 0x122   : > { %664 = vst [vmem:[%s1109_s4 + $0x8] sm:$0xff] %v662_v16 }
 0x123 PF: > { %s14_s19 = sadd.s32 1, %s954_s19   ;;  %s1110_s15 = smov %s942_s16 }
 0x124   : > { %p11_p12 = scmp.ge.s32.totalorder %s14_s19, 4   ;;  %s1111_s16 = smov %s1017_s23 }
 0x125   : > { %s1112_s17 = smov %s950_s18  ;;  %s1113_s18 = smov %s1115_s20 }
 0x126   :  { %13 = sbr.rel (!%p11_p12) target bundleno = 3 (0x3), region = 105 }

// kernel: vit3d_unetr_forward.43
= control target key start
LH: loop header
LB: loop body
LE: loop exit
PB: predicated region body
PF: predicated region fallthrough
CT: control target
= control target key end

     0   :  { %s1486_s12 = smov 0   ;;  %s1488_s13 = smov 0   ;;  %s1765_s0 = inlined_call_operand.vmem [shape: f32[8192,32], index: 0, kind: input, shape index: {}]   ;;  %s1766_s1 = inlined_call_operand.vmem [shape: bf16[32,128], index: 1, kind: input, shape index: {}]   ;;  %s1767_s2 = inlined_call_operand.vmem [shape: f32[1,128], index: 2, kind: input, shape index: {}]   ;;  %s1768_s3 = inlined_call_operand.vmem [shape: f32[8192,128], index: 3, kind: output, shape index: {}]  }
   0x1   :  { %s1490_s14 = smov 0  }
   0x2 LB: > { %s25_s15 = sadd.s32 1, %s1460_s13  ;;  %p1268_p0 = scmp.ge.s32.totalorder %s1464_s14, 1  ;;  %s1464_s14 = sphi %s1490_s14, %s13_s14   ;;  %s1460_s13 = sphi %s1488_s13, %s1770_s13   ;;  %s1456_s12 = sphi %s1486_s12, %s1769_s12  }
   0x3   : > { %p27_p1 = scmp.ge.s32.totalorder %s25_s15, 16  ;;  %p166_p2 = scmp.lt.s32.totalorder %s1464_s14, 17 }
   0x5   : > { %s1772_s15 = smov (%p27_p1, %s25_s15), 0  ;;  %p167_p3 = pnand %p1268_p0, %p166_p2 }
   0x6   : > { %s1269_s18 = sshll.u32 (!%p167_p3), %s1456_s12, 6 }
   0x7   : > { %170 = sbr.rel (%p167_p3) target bundleno = 279 (0x117), region = 32  ;;  %p199_p4 = scmp.lt.s32.totalorder (!%p167_p3), %s1269_s18, 1023 }
   0xc   : > { %v1440_v0 = vld [vmem:[%s1766_s1 + $0x8] sm:$0xff]   ;;  %v1441_v1 = vld [vmem:[%s1766_s1] sm:$0xff]   ;;  %s1774_s18 = smov (!%p199_p4, %s1269_s18), 1023  ;;  %vm464_vm0 = vcmask 261120  }
   0xd   : > { %1344 = vmatprep.subr.bf16.mxu0 %v1440_v0  ;;  %1412 = vmatprep.subr.bf16.mxu1 %v1440_v0  ;;  %s1270_s21 = sshll.u32 %s1774_s18, 3 }
   0xe   : > { %1345 = vmatpush3.bf16.msra.mxu0 %v1440_v0  ;;  %1414 = vmatpush3.bf16.msra.mxu1 %v1440_v0  ;;  %s1518_s24 = scalar_lea.vmem %s1765_s0, %s1270_s21  ;;  %s1626_s29 = scalar_lea.vmem %s1768_s3, %s1270_s21 }
   0xf   : > { %1346 = vmatprep.subr.bf16.mxu0 %v1441_v1  ;;  %1413 = vmatprep.subr.bf16.mxu1 %v1441_v1  ;;  %v288_v2 = vld [vmem:[%s1518_s24] sm:$0xff]  ;;  %v289_v3 = vld [vmem:[%s1518_s24 + $0x8] sm:$0xff]  ;;  %v290_v7 = vld [vmem:[%s1518_s24 + $0x10] sm:$0xff] }
  0x10   : > { %v320_v4 = vld [vmem:[%s1518_s24 + $0x100] sm:$0xff]  ;;  %v352_v5 = vpack.c.bf16 %v289_v3, %v288_v2  ;;  %v321_v6 = vld [vmem:[%s1518_s24 + $0x108] sm:$0xff]  ;;  %v291_v8 = vld [vmem:[%s1518_s24 + $0x18] sm:$0xff] }
  0x11   : > { %v368_v9 = vpack.c.bf16 %v321_v6, %v320_v4  ;;  %v353_v10 = vpack.c.bf16 %v291_v8, %v290_v7  ;;  %v322_v11 = vld [vmem:[%s1518_s24 + $0x110] sm:$0xff]  ;;  %v323_v12 = vld [vmem:[%s1518_s24 + $0x118] sm:$0xff]  ;;  %v292_v13 = vld [vmem:[%s1518_s24 + $0x20] sm:$0xff] }
  0x12   : > { %1347 = vmatpush3.bf16.msra.mxu0 %v1441_v1  ;;  %1415 = vmatpush3.bf16.msra.mxu1 %v1441_v1  ;;  %v369_v14 = vpack.c.bf16 %v323_v12, %v322_v11  ;;  %v293_v15 = vld [vmem:[%s1518_s24 + $0x28] sm:$0xff]  ;;  %v324_v16 = vld [vmem:[%s1518_s24 + $0x120] sm:$0xff]  ;;  %v294_v20 = vld [vmem:[%s1518_s24 + $0x30] sm:$0xff] }
  0x13   : > { %1348 = vmatprep.mubr.msk.bf16.mxu0 %vm464_vm0, %v352_v5  ;;  %v325_v17 = vld [vmem:[%s1518_s24 + $0x128] sm:$0xff]  ;;  %1380 = vmatprep.mubr.msk.bf16.mxu1 %vm464_vm0, %v368_v9  ;;  %v354_v18 = vpack.c.bf16 %v293_v15, %v292_v13  ;;  %v295_v21 = vld [vmem:[%s1518_s24 + $0x38] sm:$0xff]  ;;  %v326_v22 = vld [vmem:[%s1518_s24 + $0x130] sm:$0xff] }
  0x14   : > { %v370_v19 = vpack.c.bf16 %v325_v17, %v324_v16  ;;  %v327_v23 = vld [vmem:[%s1518_s24 + $0x138] sm:$0xff]  ;;  %v296_v24 = vld [vmem:[%s1518_s24 + $0x40] sm:$0xff]  ;;  %v297_v25 = vld [vmem:[%s1518_s24 + $0x48] sm:$0xff]  ;;  %v355_v28 = vpack.c.bf16 %v295_v21, %v294_v20 }
  0x15   : > { %1349 = vmatmul.mubr.msk.bf16.vlgmr.msra.gmra.mxu0 %vm464_vm0, %v353_v10  ;;  %1381 = vmatmul.mubr.msk.bf16.vlgmr.msra.gmra.mxu1 %vm464_vm0, %v369_v14  ;;  %v328_v26 = vld [vmem:[%s1518_s24 + $0x140] sm:$0xff]  ;;  %v329_v27 = vld [vmem:[%s1518_s24 + $0x148] sm:$0xff]  ;;  %v371_v29 = vpack.c.bf16 %v327_v23, %v326_v22  ;;  %v356_v30 = vpack.c.bf16 %v297_v25, %v296_v24  ;;  %v298_v32 = vld [vmem:[%s1518_s24 + $0x50] sm:$0xff] }
  0x16   : > { %1352 = vmatprep.mubr.msk.bf16.mxu0 %vm464_vm0, %v354_v18  ;;  %1384 = vmatprep.mubr.msk.bf16.mxu1 %vm464_vm0, %v370_v19  ;;  %v372_v31 = vpack.c.bf16 %v329_v27, %v328_v26  ;;  %v299_v33 = vld [vmem:[%s1518_s24 + $0x58] sm:$0xff]  ;;  %v330_v34 = vld [vmem:[%s1518_s24 + $0x150] sm:$0xff]  ;;  %v300_v36 = vld [vmem:[%s1518_s24 + $0x60] sm:$0xff] }
  0x17   : > { %v331_v35 = vld [vmem:[%s1518_s24 + $0x158] sm:$0xff]  ;;  %v301_v37 = vld [vmem:[%s1518_s24 + $0x68] sm:$0xff]  ;;  %v332_v38 = vld [vmem:[%s1518_s24 + $0x160] sm:$0xff]  ;;  %v357_v40 = vpack.c.bf16 %v299_v33, %v298_v32 }
  0x18   : > { %v333_v39 = vld [vmem:[%s1518_s24 + $0x168] sm:$0xff]  ;;  %v373_v41 = vpack.c.bf16 %v331_v35, %v330_v34  ;;  %v358_v42 = vpack.c.bf16 %v301_v37, %v300_v36  ;;  %v302_v44 = vld [vmem:[%s1518_s24 + $0x70] sm:$0xff]  ;;  %v303_v45 = vld [vmem:[%s1518_s24 + $0x78] sm:$0xff] }
  0x19   : > { %v374_v43 = vpack.c.bf16 %v333_v39, %v332_v38  ;;  %v334_v46 = vld [vmem:[%s1518_s24 + $0x170] sm:$0xff]  ;;  %v335_v47 = vld [vmem:[%s1518_s24 + $0x178] sm:$0xff]  ;;  %v304_v48 = vld [vmem:[%s1518_s24 + $0x80] sm:$0xff]  ;;  %v359_v52 = vpack.c.bf16 %v303_v45, %v302_v44 }
  0x1a   : > { %v305_v49 = vld [vmem:[%s1518_s24 + $0x88] sm:$0xff]  ;;  %v336_v50 = vld [vmem:[%s1518_s24 + $0x180] sm:$0xff]  ;;  %v375_v53 = vpack.c.bf16 %v335_v47, %v334_v46  ;;  %v306_v56 = vld [vmem:[%s1518_s24 + $0x90] sm:$0xff] }
  0x1b   : > { %v337_v51 = vld [vmem:[%s1518_s24 + $0x188] sm:$0xff]  ;;  %v360_v54 = vpack.c.bf16 %v305_v49, %v304_v48  ;;  %v307_v57 = vld [vmem:[%s1518_s24 + $0x98] sm:$0xff]  ;;  %v338_v58 = vld [vmem:[%s1518_s24 + $0x190] sm:$0xff] }
  0x1c   : > { %v376_v55 = vpack.c.bf16 %v337_v51, %v336_v50  ;;  %v339_v59 = vld [vmem:[%s1518_s24 + $0x198] sm:$0xff]  ;;  %v308_v60 = vld [vmem:[%s1518_s24 + $0xa0] sm:$0xff]  ;;  %v309_v61 = vld [vmem:[%s1518_s24 + $0xa8] sm:$0xff]  ;;  %v361_v0 = vpack.c.bf16 %v307_v57, %v306_v56 }
  0x1d   : > { %1353 = vmatmul.mubr.msk.bf16.gmra.mxu0 %vm464_vm0, %v355_v28  ;;  %1385 = vmatmul.mubr.msk.bf16.gmra.mxu1 %vm464_vm0, %v371_v29  ;;  %v340_v62 = vld [vmem:[%s1518_s24 + $0x1a0] sm:$0xff]  ;;  %v341_v63 = vld [vmem:[%s1518_s24 + $0x1a8] sm:$0xff]  ;;  %v377_v1 = vpack.c.bf16 %v339_v59, %v338_v58  ;;  %v362_v2 = vpack.c.bf16 %v309_v61, %v308_v60  ;;  %v310_v4 = vld [vmem:[%s1518_s24 + $0xb0] sm:$0xff] }
  0x1e   : > { %1356 = vmatprep.mubr.msk.bf16.mxu0 %vm464_vm0, %v356_v30  ;;  %1388 = vmatprep.mubr.msk.bf16.mxu1 %vm464_vm0, %v372_v31  ;;  %v378_v3 = vpack.c.bf16 %v341_v63, %v340_v62  ;;  %v311_v5 = vld [vmem:[%s1518_s24 + $0xb8] sm:$0xff]  ;;  %v342_v6 = vld [vmem:[%s1518_s24 + $0x1b0] sm:$0xff]  ;;  %v312_v8 = vld [vmem:[%s1518_s24 + $0xc0] sm:$0xff] }
  0x1f   : > { %v343_v7 = vld [vmem:[%s1518_s24 + $0x1b8] sm:$0xff]  ;;  %v313_v9 = vld [vmem:[%s1518_s24 + $0xc8] sm:$0xff]  ;;  %v344_v10 = vld [vmem:[%s1518_s24 + $0x1c0] sm:$0xff]  ;;  %v363_v12 = vpack.c.bf16 %v311_v5, %v310_v4 }
  0x20   : > { %v345_v11 = vld [vmem:[%s1518_s24 + $0x1c8] sm:$0xff]  ;;  %v379_v13 = vpack.c.bf16 %v343_v7, %v342_v6  ;;  %v364_v14 = vpack.c.bf16 %v313_v9, %v312_v8  ;;  %v314_v16 = vld [vmem:[%s1518_s24 + $0xd0] sm:$0xff]  ;;  %v315_v17 = vld [vmem:[%s1518_s24 + $0xd8] sm:$0xff] }
  0x21   : > { %v380_v15 = vpack.c.bf16 %v345_v11, %v344_v10  ;;  %v346_v18 = vld [vmem:[%s1518_s24 + $0x1d0] sm:$0xff]  ;;  %v347_v19 = vld [vmem:[%s1518_s24 + $0x1d8] sm:$0xff]  ;;  %v316_v20 = vld [vmem:[%s1518_s24 + $0xe0] sm:$0xff]  ;;  %v365_v24 = vpack.c.bf16 %v315_v17, %v314_v16 }
  0x22   : > { %v317_v21 = vld [vmem:[%s1518_s24 + $0xe8] sm:$0xff]  ;;  %v348_v22 = vld [vmem:[%s1518_s24 + $0x1e0] sm:$0xff]  ;;  %v381_v25 = vpack.c.bf16 %v347_v19, %v346_v18  ;;  %v318_v28 = vld [vmem:[%s1518_s24 + $0xf0] sm:$0xff] }
  0x23   : > { %v349_v23 = vld [vmem:[%s1518_s24 + $0x1e8] sm:$0xff]  ;;  %v366_v26 = vpack.c.bf16 %v317_v21, %v316_v20  ;;  %v319_v29 = vld [vmem:[%s1518_s24 + $0xf8] sm:$0xff]  ;;  %v350_v30 = vld [vmem:[%s1518_s24 + $0x1f0] sm:$0xff] }
  0x24   : > { %v382_v27 = vpack.c.bf16 %v349_v23, %v348_v22  ;;  %v351_v31 = vld [vmem:[%s1518_s24 + $0x1f8] sm:$0xff]  ;;  %v367_v32 = vpack.c.bf16 %v319_v29, %v318_v28  ;;  %v1619_v34 = vld [vmem:[%s1767_s2] ss:$0 sm:$0xff] }
  0x25   : > { %1357 = vmatmul.mubr.msk.bf16.gmra.mxu0 %vm464_vm0, %v357_v40  ;;  %1389 = vmatmul.mubr.msk.bf16.gmra.mxu1 %vm464_vm0, %v373_v41  ;;  %v383_v33 = vpack.c.bf16 %v351_v31, %v350_v30 }
  0x26   : > { %1360 = vmatprep.mubr.msk.bf16.mxu0 %vm464_vm0, %v358_v42  ;;  %1392 = vmatprep.mubr.msk.bf16.mxu1 %vm464_vm0, %v374_v43 }
  0x2d   : > { %1361 = vmatmul.mubr.msk.bf16.gmra.mxu0 %vm464_vm0, %v359_v52  ;;  %1393 = vmatmul.mubr.msk.bf16.gmra.mxu1 %vm464_vm0, %v375_v53 }
  0x2e   : > { %1364 = vmatprep.mubr.msk.bf16.mxu0 %vm464_vm0, %v360_v54  ;;  %1396 = vmatprep.mubr.msk.bf16.mxu1 %vm464_vm0, %v376_v55 }
  0x35   : > { %1365 = vmatmul.mubr.msk.bf16.gmra.mxu0 %vm464_vm0, %v361_v0  ;;  %1397 = vmatmul.mubr.msk.bf16.gmra.mxu1 %vm464_vm0, %v377_v1 }
  0x36   : > { %1368 = vmatprep.mubr.msk.bf16.mxu0 %vm464_vm0, %v362_v2  ;;  %1400 = vmatprep.mubr.msk.bf16.mxu1 %vm464_vm0, %v378_v3 }
  0x3d   : > { %1369 = vmatmul.mubr.msk.bf16.gmra.mxu0 %vm464_vm0, %v363_v12  ;;  %1401 = vmatmul.mubr.msk.bf16.gmra.mxu1 %vm464_vm0, %v379_v13 }
  0x3e   : > { %1372 = vmatprep.mubr.msk.bf16.mxu0 %vm464_vm0, %v364_v14  ;;  %1404 = vmatprep.mubr.msk.bf16.mxu1 %vm464_vm0, %v380_v15 }
  0x45   : > { %1373 = vmatmul.mubr.msk.bf16.gmra.mxu0 %vm464_vm0, %v365_v24  ;;  %1405 = vmatmul.mubr.msk.bf16.gmra.mxu1 %vm464_vm0, %v381_v25 }
  0x46   : > { %1376 = vmatprep.mubr.msk.bf16.mxu0 %vm464_vm0, %v366_v26  ;;  %1408 = vmatprep.mubr.msk.bf16.mxu1 %vm464_vm0, %v382_v27 }
  0x4d   : > { %1377 = vmatmul.mubr.msk.bf16.gmra.mxu0 %vm464_vm0, %v367_v32  ;;  %1409 = vmatmul.mubr.msk.bf16.gmra.mxu1 %vm464_vm0, %v383_v33 }
  0xd5   : > { %v1350_v35 = vpop.f32.mrf.mxu0  ;;  %v1382_v37 = vpop.f32.mrf.mxu1 }
  0xd6   : > { %v1054_v36 = vadd.f32 %v1350_v35, %v1619_v34  ;;  %v1086_v38 = vadd.f32 %v1382_v37, %v1619_v34 }
  0xd7   : > { %v595_v39 = vpop.f32.mrf.mxu0  ;;  %v723_v41 = vpop.f32.mrf.mxu1 }
  0xd8   : > { %1118 = vst [vmem:[%s1626_s29 + $0x10] sm:$0xff] %v1054_v36  ;;  %v1052_v40 = vadd.f32 %v1619_v34, %v595_v39  ;;  %1150 = vst [vmem:[%s1626_s29 + $0x110] sm:$0xff] %v1086_v38  ;;  %v1084_v42 = vadd.f32 %v1619_v34, %v723_v41 }
  0xd9   : > { %v1351_v43 = vpop.f32.mrf.mxu0  ;;  %v1383_v45 = vpop.f32.mrf.mxu1 }
  0xda   : > { %1116 = vst [vmem:[%s1626_s29] sm:$0xff] %v1052_v40  ;;  %v1055_v44 = vadd.f32 %v1351_v43, %v1619_v34  ;;  %1148 = vst [vmem:[%s1626_s29 + $0x100] sm:$0xff] %v1084_v42  ;;  %v1087_v46 = vadd.f32 %v1383_v45, %v1619_v34 }
  0xdb   : > { %v598_v47 = vpop.f32.mrf.mxu0  ;;  %v726_v49 = vpop.f32.mrf.mxu1 }
  0xdc   : > { %1119 = vst [vmem:[%s1626_s29 + $0x18] sm:$0xff] %v1055_v44  ;;  %v1053_v48 = vadd.f32 %v1619_v34, %v598_v47  ;;  %1151 = vst [vmem:[%s1626_s29 + $0x118] sm:$0xff] %v1087_v46  ;;  %v1085_v50 = vadd.f32 %v1619_v34, %v726_v49 }
  0xdd   : > { %v1354_v51 = vpop.f32.mrf.mxu0  ;;  %v1386_v53 = vpop.f32.mrf.mxu1 }
  0xde   : > { %1117 = vst [vmem:[%s1626_s29 + $0x8] sm:$0xff] %v1053_v48  ;;  %v1058_v52 = vadd.f32 %v1354_v51, %v1619_v34  ;;  %1149 = vst [vmem:[%s1626_s29 + $0x108] sm:$0xff] %v1085_v50  ;;  %v1090_v54 = vadd.f32 %v1386_v53, %v1619_v34 }
  0xdf   : > { %v611_v55 = vpop.f32.mrf.mxu0  ;;  %v739_v57 = vpop.f32.mrf.mxu1 }
  0xe0   : > { %1122 = vst [vmem:[%s1626_s29 + $0x30] sm:$0xff] %v1058_v52  ;;  %v1056_v56 = vadd.f32 %v1619_v34, %v611_v55  ;;  %1154 = vst [vmem:[%s1626_s29 + $0x130] sm:$0xff] %v1090_v54  ;;  %v1088_v58 = vadd.f32 %v1619_v34, %v739_v57 }
  0xe1   : > { %v1355_v59 = vpop.f32.mrf.mxu0  ;;  %v1387_v61 = vpop.f32.mrf.mxu1 }
  0xe2   : > { %1120 = vst [vmem:[%s1626_s29 + $0x20] sm:$0xff] %v1056_v56  ;;  %v1059_v60 = vadd.f32 %v1355_v59, %v1619_v34  ;;  %1152 = vst [vmem:[%s1626_s29 + $0x120] sm:$0xff] %v1088_v58  ;;  %v1091_v62 = vadd.f32 %v1387_v61, %v1619_v34 }
  0xe3   : > { %v614_v63 = vpop.f32.mrf.mxu0  ;;  %v742_v1 = vpop.f32.mrf.mxu1 }
  0xe4   : > { %1123 = vst [vmem:[%s1626_s29 + $0x38] sm:$0xff] %v1059_v60  ;;  %v1057_v0 = vadd.f32 %v1619_v34, %v614_v63  ;;  %1155 = vst [vmem:[%s1626_s29 + $0x138] sm:$0xff] %v1091_v62  ;;  %v1089_v2 = vadd.f32 %v1619_v34, %v742_v1 }
  0xe5   : > { %v1358_v3 = vpop.f32.mrf.mxu0  ;;  %v1390_v5 = vpop.f32.mrf.mxu1 }
  0xe6   : > { %1121 = vst [vmem:[%s1626_s29 + $0x28] sm:$0xff] %v1057_v0  ;;  %v1062_v4 = vadd.f32 %v1358_v3, %v1619_v34  ;;  %1153 = vst [vmem:[%s1626_s29 + $0x128] sm:$0xff] %v1089_v2  ;;  %v1094_v6 = vadd.f32 %v1390_v5, %v1619_v34 }
  0xe7   : > { %v627_v7 = vpop.f32.mrf.mxu0  ;;  %v755_v9 = vpop.f32.mrf.mxu1 }
  0xe8   : > { %1126 = vst [vmem:[%s1626_s29 + $0x50] sm:$0xff] %v1062_v4  ;;  %v1060_v8 = vadd.f32 %v1619_v34, %v627_v7  ;;  %1158 = vst [vmem:[%s1626_s29 + $0x150] sm:$0xff] %v1094_v6  ;;  %v1092_v10 = vadd.f32 %v1619_v34, %v755_v9 }
  0xe9   : > { %v1359_v11 = vpop.f32.mrf.mxu0  ;;  %v1391_v13 = vpop.f32.mrf.mxu1 }
  0xea   : > { %1124 = vst [vmem:[%s1626_s29 + $0x40] sm:$0xff] %v1060_v8  ;;  %v1063_v12 = vadd.f32 %v1359_v11, %v1619_v34  ;;  %1156 = vst [vmem:[%s1626_s29 + $0x140] sm:$0xff] %v1092_v10  ;;  %v1095_v14 = vadd.f32 %v1391_v13, %v1619_v34 }
  0xeb   : > { %v630_v15 = vpop.f32.mrf.mxu0  ;;  %v758_v17 = vpop.f32.mrf.mxu1 }
  0xec   : > { %1127 = vst [vmem:[%s1626_s29 + $0x58] sm:$0xff] %v1063_v12  ;;  %v1061_v16 = vadd.f32 %v1619_v34, %v630_v15  ;;  %1159 = vst [vmem:[%s1626_s29 + $0x158] sm:$0xff] %v1095_v14  ;;  %v1093_v18 = vadd.f32 %v1619_v34, %v758_v17 }
  0xed   : > { %v1362_v19 = vpop.f32.mrf.mxu0  ;;  %v1394_v21 = vpop.f32.mrf.mxu1 }
  0xee   : > { %1125 = vst [vmem:[%s1626_s29 + $0x48] sm:$0xff] %v1061_v16  ;;  %v1066_v20 = vadd.f32 %v1362_v19, %v1619_v34  ;;  %1157 = vst [vmem:[%s1626_s29 + $0x148] sm:$0xff] %v1093_v18  ;;  %v1098_v22 = vadd.f32 %v1394_v21, %v1619_v34 }
  0xef   : > { %v643_v23 = vpop.f32.mrf.mxu0  ;;  %v771_v25 = vpop.f32.mrf.mxu1 }
  0xf0   : > { %1130 = vst [vmem:[%s1626_s29 + $0x70] sm:$0xff] %v1066_v20  ;;  %v1064_v24 = vadd.f32 %v1619_v34, %v643_v23  ;;  %1162 = vst [vmem:[%s1626_s29 + $0x170] sm:$0xff] %v1098_v22  ;;  %v1096_v26 = vadd.f32 %v1619_v34, %v771_v25 }
  0xf1   : > { %v1363_v27 = vpop.f32.mrf.mxu0  ;;  %v1395_v29 = vpop.f32.mrf.mxu1 }
  0xf2   : > { %1128 = vst [vmem:[%s1626_s29 + $0x60] sm:$0xff] %v1064_v24  ;;  %v1067_v28 = vadd.f32 %v1363_v27, %v1619_v34  ;;  %1160 = vst [vmem:[%s1626_s29 + $0x160] sm:$0xff] %v1096_v26  ;;  %v1099_v30 = vadd.f32 %v1395_v29, %v1619_v34 }
  0xf3   : > { %v646_v31 = vpop.f32.mrf.mxu0  ;;  %v774_v33 = vpop.f32.mrf.mxu1 }
  0xf4   : > { %1131 = vst [vmem:[%s1626_s29 + $0x78] sm:$0xff] %v1067_v28  ;;  %v1065_v32 = vadd.f32 %v1619_v34, %v646_v31  ;;  %1163 = vst [vmem:[%s1626_s29 + $0x178] sm:$0xff] %v1099_v30  ;;  %v1097_v35 = vadd.f32 %v1619_v34, %v774_v33 }
  0xf5   : > { %v1366_v36 = vpop.f32.mrf.mxu0  ;;  %v1398_v38 = vpop.f32.mrf.mxu1 }
  0xf6   : > { %1129 = vst [vmem:[%s1626_s29 + $0x68] sm:$0xff] %v1065_v32  ;;  %v1070_v37 = vadd.f32 %v1366_v36, %v1619_v34  ;;  %1161 = vst [vmem:[%s1626_s29 + $0x168] sm:$0xff] %v1097_v35  ;;  %v1102_v39 = vadd.f32 %v1398_v38, %v1619_v34 }
  0xf7   : > { %v659_v40 = vpop.f32.mrf.mxu0  ;;  %v787_v42 = vpop.f32.mrf.mxu1 }
  0xf8   : > { %1134 = vst [vmem:[%s1626_s29 + $0x90] sm:$0xff] %v1070_v37  ;;  %v1068_v41 = vadd.f32 %v1619_v34, %v659_v40  ;;  %1166 = vst [vmem:[%s1626_s29 + $0x190] sm:$0xff] %v1102_v39  ;;  %v1100_v43 = vadd.f32 %v1619_v34, %v787_v42 }
  0xf9   : > { %v1367_v44 = vpop.f32.mrf.mxu0  ;;  %v1399_v46 = vpop.f32.mrf.mxu1 }
  0xfa   : > { %1132 = vst [vmem:[%s1626_s29 + $0x80] sm:$0xff] %v1068_v41  ;;  %v1071_v45 = vadd.f32 %v1367_v44, %v1619_v34  ;;  %1164 = vst [vmem:[%s1626_s29 + $0x180] sm:$0xff] %v1100_v43  ;;  %v1103_v47 = vadd.f32 %v1399_v46, %v1619_v34 }
  0xfb   : > { %v662_v48 = vpop.f32.mrf.mxu0  ;;  %v790_v50 = vpop.f32.mrf.mxu1 }
  0xfc   : > { %1135 = vst [vmem:[%s1626_s29 + $0x98] sm:$0xff] %v1071_v45  ;;  %v1069_v49 = vadd.f32 %v1619_v34, %v662_v48  ;;  %1167 = vst [vmem:[%s1626_s29 + $0x198] sm:$0xff] %v1103_v47  ;;  %v1101_v51 = vadd.f32 %v1619_v34, %v790_v50 }
  0xfd   : > { %v1370_v52 = vpop.f32.mrf.mxu0  ;;  %v1402_v54 = vpop.f32.mrf.mxu1 }
  0xfe   : > { %1133 = vst [vmem:[%s1626_s29 + $0x88] sm:$0xff] %v1069_v49  ;;  %v1074_v53 = vadd.f32 %v1370_v52, %v1619_v34  ;;  %1165 = vst [vmem:[%s1626_s29 + $0x188] sm:$0xff] %v1101_v51  ;;  %v1106_v55 = vadd.f32 %v1402_v54, %v1619_v34 }
  0xff   : > { %v675_v56 = vpop.f32.mrf.mxu0  ;;  %v803_v58 = vpop.f32.mrf.mxu1 }
 0x100   : > { %1138 = vst [vmem:[%s1626_s29 + $0xb0] sm:$0xff] %v1074_v53  ;;  %v1072_v57 = vadd.f32 %v1619_v34, %v675_v56  ;;  %1170 = vst [vmem:[%s1626_s29 + $0x1b0] sm:$0xff] %v1106_v55  ;;  %v1104_v59 = vadd.f32 %v1619_v34, %v803_v58 }
 0x101   : > { %v1371_v60 = vpop.f32.mrf.mxu0  ;;  %v1403_v62 = vpop.f32.mrf.mxu1 }
 0x102   : > { %1136 = vst [vmem:[%s1626_s29 + $0xa0] sm:$0xff] %v1072_v57  ;;  %v1075_v61 = vadd.f32 %v1371_v60, %v1619_v34  ;;  %1168 = vst [vmem:[%s1626_s29 + $0x1a0] sm:$0xff] %v1104_v59  ;;  %v1107_v63 = vadd.f32 %v1403_v62, %v1619_v34 }
 0x103   : > { %v678_v0 = vpop.f32.mrf.mxu0  ;;  %v806_v2 = vpop.f32.mrf.mxu1 }
 0x104   : > { %1139 = vst [vmem:[%s1626_s29 + $0xb8] sm:$0xff] %v1075_v61  ;;  %v1073_v1 = vadd.f32 %v1619_v34, %v678_v0  ;;  %1171 = vst [vmem:[%s1626_s29 + $0x1b8] sm:$0xff] %v1107_v63  ;;  %v1105_v3 = vadd.f32 %v1619_v34, %v806_v2 }
 0x105   : > { %v1374_v4 = vpop.f32.mrf.mxu0  ;;  %v1406_v6 = vpop.f32.mrf.mxu1 }
 0x106   : > { %1137 = vst [vmem:[%s1626_s29 + $0xa8] sm:$0xff] %v1073_v1  ;;  %v1078_v5 = vadd.f32 %v1374_v4, %v1619_v34  ;;  %1169 = vst [vmem:[%s1626_s29 + $0x1a8] sm:$0xff] %v1105_v3  ;;  %v1110_v7 = vadd.f32 %v1406_v6, %v1619_v34 }
 0x107   : > { %v691_v8 = vpop.f32.mrf.mxu0  ;;  %v819_v10 = vpop.f32.mrf.mxu1 }
 0x108   : > { %1142 = vst [vmem:[%s1626_s29 + $0xd0] sm:$0xff] %v1078_v5  ;;  %v1076_v9 = vadd.f32 %v1619_v34, %v691_v8  ;;  %1174 = vst [vmem:[%s1626_s29 + $0x1d0] sm:$0xff] %v1110_v7  ;;  %v1108_v11 = vadd.f32 %v1619_v34, %v819_v10 }
 0x109   : > { %v1375_v12 = vpop.f32.mrf.mxu0  ;;  %v1407_v14 = vpop.f32.mrf.mxu1 }
 0x10a   : > { %1140 = vst [vmem:[%s1626_s29 + $0xc0] sm:$0xff] %v1076_v9  ;;  %v1079_v13 = vadd.f32 %v1375_v12, %v1619_v34  ;;  %1172 = vst [vmem:[%s1626_s29 + $0x1c0] sm:$0xff] %v1108_v11  ;;  %v1111_v15 = vadd.f32 %v1407_v14, %v1619_v34 }
 0x10b   : > { %v694_v16 = vpop.f32.mrf.mxu0  ;;  %v822_v18 = vpop.f32.mrf.mxu1 }
 0x10c   : > { %1143 = vst [vmem:[%s1626_s29 + $0xd8] sm:$0xff] %v1079_v13  ;;  %v1077_v17 = vadd.f32 %v1619_v34, %v694_v16  ;;  %1175 = vst [vmem:[%s1626_s29 + $0x1d8] sm:$0xff] %v1111_v15  ;;  %v1109_v19 = vadd.f32 %v1619_v34, %v822_v18 }
 0x10d   : > { %v1378_v20 = vpop.f32.mrf.mxu0  ;;  %v1410_v22 = vpop.f32.mrf.mxu1 }
 0x10e   : > { %1141 = vst [vmem:[%s1626_s29 + $0xc8] sm:$0xff] %v1077_v17  ;;  %v1082_v21 = vadd.f32 %v1378_v20, %v1619_v34  ;;  %1173 = vst [vmem:[%s1626_s29 + $0x1c8] sm:$0xff] %v1109_v19  ;;  %v1114_v23 = vadd.f32 %v1410_v22, %v1619_v34 }
 0x10f   : > { %v707_v24 = vpop.f32.mrf.mxu0  ;;  %v835_v26 = vpop.f32.mrf.mxu1 }
 0x110   : > { %1146 = vst [vmem:[%s1626_s29 + $0xf0] sm:$0xff] %v1082_v21  ;;  %v1080_v25 = vadd.f32 %v1619_v34, %v707_v24  ;;  %1178 = vst [vmem:[%s1626_s29 + $0x1f0] sm:$0xff] %v1114_v23  ;;  %v1112_v27 = vadd.f32 %v1619_v34, %v835_v26 }
 0x111   : > { %v1379_v28 = vpop.f32.mrf.mxu0  ;;  %v1411_v30 = vpop.f32.mrf.mxu1 }
 0x112   : > { %1144 = vst [vmem:[%s1626_s29 + $0xe0] sm:$0xff] %v1080_v25  ;;  %v1083_v29 = vadd.f32 %v1379_v28, %v1619_v34  ;;  %1176 = vst [vmem:[%s1626_s29 + $0x1e0] sm:$0xff] %v1112_v27  ;;  %v1115_v31 = vadd.f32 %v1411_v30, %v1619_v34 }
 0x113   : > { %v710_v32 = vpop.f32.mrf.mxu0  ;;  %v838_v35 = vpop.f32.mrf.mxu1 }
 0x114   : > { %1147 = vst [vmem:[%s1626_s29 + $0xf8] sm:$0xff] %v1083_v29  ;;  %v1081_v33 = vadd.f32 %v1619_v34, %v710_v32  ;;  %1179 = vst [vmem:[%s1626_s29 + $0x1f8] sm:$0xff] %v1115_v31  ;;  %v1113_v36 = vadd.f32 %v1619_v34, %v838_v35 }
 0x116   : > { %1145 = vst [vmem:[%s1626_s29 + $0xe8] sm:$0xff] %v1081_v33  ;;  %1177 = vst [vmem:[%s1626_s29 + $0x1e8] sm:$0xff] %v1113_v36 }
 0x117 PF: > { %s13_s14 = sadd.s32 1, %s1464_s14   ;;  %s1769_s12 = smov %s1460_s13 }
 0x118   : > { %p10_p5 = scmp.ge.s32.totalorder %s13_s14, 18   ;;  %s1770_s13 = smov %s1772_s15 }
 0x11a   :  { %12 = sbr.rel (!%p10_p5) target bundleno = 2 (0x2), region = 73 }

</bundles_post_ra>
